<compile_context>
chip_gen: v7x
topology: tpu7x:2x2x1
jax: 0.10.0
libtpu: 0.0.40
codegen_flags: <defaults>
</compile_context>

<pallas_src>
import functools
import math

import jax
import jax.numpy as jnp
from jax import lax
from jax.experimental import pallas as pl
from jax.experimental.pallas import tpu as pltpu

# ----------------------------- configuration --------------------------------
L_FREQ = 5                          # xyz frequency levels
L_FREQ_BG = 4                       # view-dir frequency levels
HIDDEN = 64                         # hidden_dim
HIDDEN_BG = 32                      # hidden_dim_bg
ENC_ROWS = 3 + 1 + 6 * L_FREQ       # x + ones(bias) + sin/cos octaves = 34
ENC_PAD = 48                        # padded K for the first sigma matmul
BG_ENC_ROWS = 3 + 1 + 6 * L_FREQ_BG  # 28
BG_ENC_PAD = 32
HEAD_PAD = 8                        # sigma head / bg head padded to 8 output rows
BOUND = 1.0
MIN_NEAR = 0.01
NUM_STEPS = 64
BLOB_DENSITY = 0.5
BLOB_RADIUS = 0.5
BG_RADIUS = 0.2                     # > 0 -> bg_net active
SIGMA_CLAMP = 15.0                  # safety clamp before exp (alpha saturates long before)

RAY_TILE = 256                      # rays per grid step (lanes) in the fused kernel
SAMPLE_BATCH = 4                    # consecutive samples lane-batched per MXU call -> N=1024
POINT_TILE = 1024                   # points per grid step in the standalone density kernel
BG_TILE = 256
VMEM_LIMIT = 32 * 1024 * 1024       # comfortable on v5e/v6e/v7x (v7x has 64 MiB total)


# ------------------------------ kernel helpers --------------------------------
def _lane_tile(x, reps):
    """Repeat a (C, T) value `reps` times along the lane axis -> (C, reps*T)."""
    return x if reps == 1 else jnp.concatenate([x] * reps, axis=1)


def _freq_encode(x, num_freqs, pad_rows):
    """In-register frequency encoding, channel-major.

    Rows: [x (3), ones (1, bias row), sin(2^0 x), cos(2^0 x), ..., zero pad].
    Only the base sin/cos hit the EUP; higher octaves come from angle-doubling
    identities (sin 2a = 2 s c, cos 2a = 1 - 2 s^2) on the VPU."""
    t = x.shape[1]
    pieces = [x, jnp.ones((1, t), jnp.float32)]
    s = jnp.sin(x)
    c = jnp.cos(x)
    for i in range(num_freqs):
        pieces.append(s)
        pieces.append(c)
        if i + 1 < num_freqs:
            s, c = 2.0 * s * c, 1.0 - 2.0 * s * s
    rows = 4 + 6 * num_freqs
    if pad_rows > rows:
        pieces.append(jnp.zeros((pad_rows - rows, t), jnp.float32))
    return jnp.concatenate(pieces, axis=0)                          # (pad_rows, t)


def _sigma_core(xyz, w0, w1, b1b, w2, b2b):
    """common_forward on a channel-major tile.

    xyz: (3, N) f32.  w0:(64,ENC_PAD) bf16 (bias folded), w1:(64,64) bf16,
    w2:(8,64) bf16 (rows 4:8 zero).  b1b:(64,N), b2b:(8,N) pre-broadcast f32.
    Returns sigma (1, N), albedo (3, N) in f32."""
    enc = _freq_encode(xyz, L_FREQ, ENC_PAD).astype(jnp.bfloat16)   # (48, N)
    h = jnp.dot(w0, enc, preferred_element_type=jnp.float32)        # (64, N) f32
    h = jnp.maximum(h, 0.0).astype(jnp.bfloat16)
    h = jnp.dot(w1, h, preferred_element_type=jnp.float32) + b1b    # (64, N)
    h = jnp.maximum(h, 0.0).astype(jnp.bfloat16)
    h = jnp.dot(w2, h, preferred_element_type=jnp.float32) + b2b    # (8, N) f32

    # density_blob (density_activation == 'exp' branch)
    d2 = (xyz[0:1, :] * xyz[0:1, :] + xyz[1:2, :] * xyz[1:2, :]
          + xyz[2:3, :] * xyz[2:3, :])
    blob = BLOB_DENSITY * jnp.exp(d2 * (-1.0 / (2.0 * BLOB_RADIUS * BLOB_RADIUS)))

    # trunc_exp forward == exp (clamped for numerical safety; alpha saturates anyway)
    sigma = jnp.exp(jnp.minimum(h[0:1, :] + blob, SIGMA_CLAMP))     # (1, N)
    albedo = jax.nn.sigmoid(h[1:4, :])                              # (3, N)
    return sigma, albedo


# --------------------------------- kernels ------------------------------------
def raymarch_kernel(o_ref, d_ref, near_ref, far_ref,
                    w0_ref, w1_ref, b1_ref, w2_ref, b2_ref,
                    out_ref, *, num_steps, sample_batch):
    """Fused uniform sampling + sigma MLP + alpha compositing for one ray tile.

    SAMPLE_BATCH consecutive samples are lane-concatenated so each MXU call sees
    N = sample_batch * RAY_TILE points.  Output rows: 0-2 img, 3 depth, 4 wsum."""
    o = o_ref[...]                      # (3, TR)
    dvec = d_ref[...]                   # (3, TR)
    nears = near_ref[...]               # (1, TR)
    fars = far_ref[...]                 # (1, TR)
    delta = (fars - nears) * (1.0 / num_steps)       # (1, TR); missed rays -> 0
    tr = o.shape[1]
    sb = sample_batch
    n = sb * tr

    w0 = w0_ref[...]
    w1 = w1_ref[...]
    w2 = w2_ref[...]
    # hoist bias broadcasts out of the step loop (JAX does not CSE broadcast_in_dim)
    b1b = jnp.broadcast_to(b1_ref[...], (HIDDEN, n))
    b2b = jnp.broadcast_to(b2_ref[...], (HEAD_PAD, n))

    # lane-batched per-ray constants (computed once)
    o_b = _lane_tile(o, sb)
    d_b = _lane_tile(dvec, sb)
    nears_b = _lane_tile(nears, sb)
    delta_b = _lane_tile(delta, sb)
    offs = jnp.concatenate(
        [jnp.full((1, tr), j + 0.5, jnp.float32) for j in range(sb)], axis=1)

    def body(it, carry):
        trans, wsum, depth, img = carry
        base = (it * sb).astype(jnp.float32)
        t_b = nears_b + delta_b * (base + offs)                     # (1, sb*TR)
        xyz = jnp.clip(o_b + d_b * t_b, -BOUND, BOUND)              # (3, sb*TR)
        sigma_b, rgb_b = _sigma_core(xyz, w0, w1, b1b, w2, b2b)
        # sequential (exclusive-transmittance) compositing over the sb samples
        for j in range(sb):
            lo, hi = j * tr, (j + 1) * tr
            alpha = 1.0 - jnp.exp(-sigma_b[:, lo:hi] * delta)       # (1, TR)
            wgt = alpha * trans
            trans = trans * (1.0 - alpha + 1e-10)
            wsum = wsum + wgt
            depth = depth + wgt * t_b[:, lo:hi]
            img = img + wgt * rgb_b[:, lo:hi]
        return (trans, wsum, depth, img)

    init = (jnp.ones((1, tr), jnp.float32),
            jnp.zeros((1, tr), jnp.float32),
            jnp.zeros((1, tr), jnp.float32),
            jnp.zeros((3, tr), jnp.float32))
    _, wsum, depth, img = lax.fori_loop(0, num_steps // sb, body, init)

    # single aligned (8, TR) store: rows 0-2 img, 3 depth, 4 wsum, 5-7 pad
    out_ref[...] = jnp.concatenate(
        [img, depth, wsum, jnp.zeros((3, tr), jnp.float32)], axis=0)


def density_kernel(x_ref, w0_ref, w1_ref, b1_ref, w2_ref, b2_ref, out_ref):
    """Standalone common_forward: one aligned (8, TILE) store = [sigma, rgb, pad]."""
    x = x_ref[...]
    t = x.shape[1]
    b1b = jnp.broadcast_to(b1_ref[...], (HIDDEN, t))
    b2b = jnp.broadcast_to(b2_ref[...], (HEAD_PAD, t))
    sigma, albedo = _sigma_core(x, w0_ref[...], w1_ref[...], b1b, w2_ref[...], b2b)
    out_ref[...] = jnp.concatenate(
        [sigma, albedo, jnp.zeros((4, t), jnp.float32)], axis=0)


def bg_kernel(d_ref, w0_ref, w1_ref, b1_ref, out_ref):
    """background: frequency encoder_bg + 2-layer bg MLP + sigmoid, channel-major.
    Head is padded to 8 rows; rows 0-2 are rgb."""
    d = d_ref[...]
    t = d.shape[1]
    enc = _freq_encode(d, L_FREQ_BG, BG_ENC_PAD).astype(jnp.bfloat16)   # (32, T)
    h = jnp.dot(w0_ref[...], enc, preferred_element_type=jnp.float32)   # (32, T)
    h = jnp.maximum(h, 0.0).astype(jnp.bfloat16)
    h = (jnp.dot(w1_ref[...], h, preferred_element_type=jnp.float32)
         + jnp.broadcast_to(b1_ref[...], (HEAD_PAD, t)))                # (8, T)
    out_ref[...] = jax.nn.sigmoid(h)


# ------------------------------ parameter packing ------------------------------
def _pack_sigma(params):
    """Pack sigma_net params: bias0 folded into w0 (ones row), K padded to ENC_PAD,
    head padded to 8 rows, matmul weights cast to bf16."""
    w0, b0, w1, b1, w2, b2 = params
    w0p = jnp.zeros((HIDDEN, ENC_PAD), jnp.float32)
    w0p = w0p.at[:, 0:3].set(w0[:, 0:3])                       # x part
    w0p = w0p.at[:, 3:4].set(b0)                               # bias via ones row
    w0p = w0p.at[:, 4:4 + 6 * L_FREQ].set(w0[:, 3:3 + 6 * L_FREQ])
    w2p = jnp.zeros((HEAD_PAD, HIDDEN), jnp.float32).at[0:4, :].set(w2)
    b2p = jnp.zeros((HEAD_PAD, 1), jnp.float32).at[0:4, :].set(b2)
    return (w0p.astype(jnp.bfloat16), w1.astype(jnp.bfloat16),
            b1.astype(jnp.float32), w2p.astype(jnp.bfloat16), b2p)


def _pack_bg(params):
    w0, b0, w1, b1 = params
    w0p = jnp.zeros((HIDDEN_BG, BG_ENC_PAD), jnp.float32)
    w0p = w0p.at[:, 0:3].set(w0[:, 0:3])
    w0p = w0p.at[:, 3:4].set(b0)
    w0p = w0p.at[:, 4:4 + 6 * L_FREQ_BG].set(w0[:, 3:3 + 6 * L_FREQ_BG])
    w1p = jnp.zeros((HEAD_PAD, HIDDEN_BG), jnp.float32).at[0:3, :].set(w1)
    b1p = jnp.zeros((HEAD_PAD, 1), jnp.float32).at[0:3, :].set(b1)
    return (w0p.astype(jnp.bfloat16), w1p.astype(jnp.bfloat16), b1p)


# ------------------------------ pallas wrappers --------------------------------
def _pad_cols(x_t, n_pad, fill=0.0):
    """Pad a channel-major (C, n) array to (C, n_pad) with `fill`."""
    c, n = x_t.shape
    out = jnp.full((c, n_pad), fill, jnp.float32)
    return out.at[:, :n].set(x_t.astype(jnp.float32))


def ngp_render_rays(o_t, d_t, nears_t, fars_t, packed, *,
                    tile=RAY_TILE, num_steps=NUM_STEPS, sample_batch=SAMPLE_BATCH):
    """Fused ray marching.  Inputs channel-major & lane-padded to a tile multiple.
    Returns an (8, n_pad) slab: rows 0-2 img, 3 depth, 4 wsum."""
    assert num_steps % sample_batch == 0
    n_pad = o_t.shape[1]
    w0, w1, b1, w2, b2 = packed
    full = lambda i: (0, 0)
    spec3 = pl.BlockSpec((3, tile), lambda i: (0, i))
    spec1 = pl.BlockSpec((1, tile), lambda i: (0, i))

    pts = n_pad * num_steps
    wbytes = int(2 * (w0.size + w1.size + w2.size) + 4 * (b1.size + b2.size))
    cost = pl.CostEstimate(
        flops=int(2 * pts * (ENC_PAD * HIDDEN + HIDDEN * HIDDEN + HIDDEN * HEAD_PAD)),
        transcendentals=int(pts * 12),
        bytes_accessed=int(4 * (8 * n_pad + 8 * n_pad) + wbytes))

    out = pl.pallas_call(
        functools.partial(raymarch_kernel, num_steps=num_steps,
                          sample_batch=sample_batch),
        out_shape=jax.ShapeDtypeStruct((8, n_pad), jnp.float32),
        grid=(n_pad // tile,),
        in_specs=[spec3, spec3, spec1, spec1,
                  pl.BlockSpec(w0.shape, full), pl.BlockSpec(w1.shape, full),
                  pl.BlockSpec(b1.shape, full), pl.BlockSpec(w2.shape, full),
                  pl.BlockSpec(b2.shape, full)],
        out_specs=pl.BlockSpec((8, tile), lambda i: (0, i)),
        compiler_params=pltpu.CompilerParams(
            dimension_semantics=("parallel",), vmem_limit_bytes=VMEM_LIMIT),
        cost_estimate=cost,
    )(o_t, d_t, nears_t, fars_t, w0, w1, b1, w2, b2)
    return out


def ngp_density(x, sigma_params, *, tile=POINT_TILE):
    """x: (P, 3) points -> (sigma (P,), albedo (P, 3)).  Tail is padded."""
    p = x.shape[0]
    p_pad = max(tile, ((p + tile - 1) // tile) * tile)
    x_t = _pad_cols(x.T, p_pad)                                      # (3, p_pad)
    w0, w1, b1, w2, b2 = _pack_sigma(sigma_params)
    full = lambda i: (0, 0)

    wbytes = int(2 * (w0.size + w1.size + w2.size) + 4 * (b1.size + b2.size))
    cost = pl.CostEstimate(
        flops=int(2 * p_pad * (ENC_PAD * HIDDEN + HIDDEN * HIDDEN + HIDDEN * HEAD_PAD)),
        transcendentals=int(p_pad * 11),
        bytes_accessed=int(4 * (3 * p_pad + 8 * p_pad) + wbytes))

    out = pl.pallas_call(
        density_kernel,
        out_shape=jax.ShapeDtypeStruct((8, p_pad), jnp.float32),
        grid=(p_pad // tile,),
        in_specs=[pl.BlockSpec((3, tile), lambda i: (0, i)),
                  pl.BlockSpec(w0.shape, full), pl.BlockSpec(w1.shape, full),
                  pl.BlockSpec(b1.shape, full), pl.BlockSpec(w2.shape, full),
                  pl.BlockSpec(b2.shape, full)],
        out_specs=pl.BlockSpec((8, tile), lambda i: (0, i)),
        compiler_params=pltpu.CompilerParams(
            dimension_semantics=("parallel",), vmem_limit_bytes=VMEM_LIMIT),
        cost_estimate=cost,
    )(x_t, w0, w1, b1, w2, b2)
    return out[0, :p], out[1:4, :p].T


def ngp_background(dirs, bg_params, *, tile=BG_TILE):
    """dirs: (N, 3) unit view directions -> rgb (N, 3)."""
    n = dirs.shape[0]
    n_pad = max(tile, ((n + tile - 1) // tile) * tile)
    d_t = _pad_cols(dirs.T, n_pad)
    w0, w1, b1 = _pack_bg(bg_params)
    full = lambda i: (0, 0)

    cost = pl.CostEstimate(
        flops=int(2 * n_pad * (BG_ENC_PAD * HIDDEN_BG + HIDDEN_BG * HEAD_PAD)),
        transcendentals=int(n_pad * 9),
        bytes_accessed=int(4 * (3 * n_pad + 8 * n_pad)
                           + 2 * (w0.size + w1.size) + 4 * b1.size))

    out = pl.pallas_call(
        bg_kernel,
        out_shape=jax.ShapeDtypeStruct((8, n_pad), jnp.float32),
        grid=(n_pad // tile,),
        in_specs=[pl.BlockSpec((3, tile), lambda i: (0, i)),
                  pl.BlockSpec(w0.shape, full), pl.BlockSpec(w1.shape, full),
                  pl.BlockSpec(b1.shape, full)],
        out_specs=pl.BlockSpec((8, tile), lambda i: (0, i)),
        compiler_params=pltpu.CompilerParams(
            dimension_semantics=("parallel",), vmem_limit_bytes=VMEM_LIMIT),
        cost_estimate=cost,
    )(d_t, w0, w1, b1)
    return out[0:3, :n].T


# ------------------------------ parameter init ---------------------------------
def _linear_init(key, fan_in, fan_out):
    """nn.Linear-style init, stored (out_features, in_features) / (out_features, 1)."""
    kw, kb = jax.random.split(key)
    lim = 1.0 / math.sqrt(fan_in)
    w = jax.random.uniform(kw, (fan_out, fan_in), jnp.float32, -lim, lim)
    b = jax.random.uniform(kb, (fan_out, 1), jnp.float32, -lim, lim)
    return w, b


def init_params(key):
    k = jax.random.split(key, 5)
    # sigma_net: MLP(in_dim=33, 4, hidden_dim=64, num_layers=3)
    w0, b0 = _linear_init(k[0], 3 + 6 * L_FREQ, HIDDEN)
    w1, b1 = _linear_init(k[1], HIDDEN, HIDDEN)
    w2, b2 = _linear_init(k[2], HIDDEN, 4)
    # bg_net: MLP(in_dim_bg=27, 3, hidden_dim_bg=32, num_layers_bg=2)
    bw0, bb0 = _linear_init(k[3], 3 + 6 * L_FREQ_BG, HIDDEN_BG)
    bw1, bb1 = _linear_init(k[4], HIDDEN_BG, 3)
    return (w0, b0, w1, b1, w2, b2), (bw0, bb0, bw1, bb1)


# ------------------------------- forward glue -----------------------------------
def _near_far_from_aabb(rays_o, rays_d):
    """Axis-aligned slab test, aabb = [-bound, bound]^3.  Missed rays get fars == nears
    (zero step size -> zero weights -> pure background)."""
    safe_d = jnp.where(jnp.abs(rays_d) < 1e-8, jnp.full_like(rays_d, 1e-8), rays_d)
    inv_d = 1.0 / safe_d
    t1 = (-BOUND - rays_o) * inv_d
    t2 = (BOUND - rays_o) * inv_d
    nears = jnp.maximum(jnp.max(jnp.minimum(t1, t2), axis=-1), MIN_NEAR)
    fars = jnp.maximum(jnp.min(jnp.maximum(t1, t2), axis=-1), nears)
    return nears, fars


def instant_ngp_forward(rays_o, rays_d, sigma_params, bg_params,
                        num_steps=NUM_STEPS, tile_rays=RAY_TILE,
                        sample_batch=SAMPLE_BATCH):
    """Volume-rendering forward (inference path, shading='albedo'), fully fused."""
    prefix = rays_o.shape[:-1]
    rays_o = rays_o.reshape(-1, 3).astype(jnp.float32)
    rays_d = rays_d.reshape(-1, 3).astype(jnp.float32)
    n = rays_o.shape[0]

    nears, fars = _near_far_from_aabb(rays_o, rays_d)

    # channel-major, lane-pad to a tile multiple with >=2 tiles so the "parallel"
    # grid axis can feed both v7x TensorCores.  Padded rays: d=(1,1,1), near==far
    # -> delta=0 -> exact no-ops.
    n_pad = max(2 * tile_rays, ((n + tile_rays - 1) // tile_rays) * tile_rays)
    o_t = jnp.zeros((3, n_pad), jnp.float32).at[:, :n].set(rays_o.T)
    d_t = jnp.ones((3, n_pad), jnp.float32).at[:, :n].set(rays_d.T)
    base = jnp.full((1, n_pad), MIN_NEAR, jnp.float32)
    nears_t = base.at[0, :n].set(nears)
    fars_t = base.at[0, :n].set(fars)

    packed = _pack_sigma(sigma_params)
    out = ngp_render_rays(o_t, d_t, nears_t, fars_t, packed,
                          tile=tile_rays, num_steps=num_steps,
                          sample_batch=sample_batch)
    image = out[0:3, :n].T                                           # (n, 3)
    depth = out[3, :n]
    weights_sum = out[4, :n]

    # background (bg_radius > 0 -> learned background MLP)
    dirs = rays_d / jnp.maximum(jnp.linalg.norm(rays_d, axis=-1, keepdims=True), 1e-12)
    bg_color = ngp_background(dirs, bg_params)                       # (n, 3)
    image = image + (1.0 - weights_sum)[:, None] * bg_color

    return {"image": image.reshape(*prefix, 3),
            "depth": depth.reshape(*prefix),
            "weights_sum": weights_sum.reshape(*prefix)}


def _reference_forward(rays_o, rays_d, sigma_params, bg_params, num_steps=NUM_STEPS):
    """Unfused reference: XLA sampling + standalone density kernel + XLA compositing."""
    prefix = rays_o.shape[:-1]
    ro = rays_o.reshape(-1, 3).astype(jnp.float32)
    rd = rays_d.reshape(-1, 3).astype(jnp.float32)
    n = ro.shape[0]
    nears, fars = _near_far_from_aabb(ro, rd)
    deltas = (fars - nears) * (1.0 / num_steps)                      # (n,)
    steps = jnp.arange(num_steps, dtype=jnp.float32) + 0.5
    ts = nears[:, None] + deltas[:, None] * steps[None, :]           # (n, T)
    xyzs = jnp.clip(ro[:, None, :] + rd[:, None, :] * ts[..., None], -BOUND, BOUND)

    sigma, albedo = ngp_density(xyzs.reshape(-1, 3), sigma_params)
    sigma = sigma.reshape(n, num_steps)
    rgbs = albedo.reshape(n, num_steps, 3)

    alphas = 1.0 - jnp.exp(-sigma * deltas[:, None])
    trans = jnp.cumprod(1.0 - alphas + 1e-10, axis=-1)
    trans = jnp.concatenate([jnp.ones((n, 1), jnp.float32), trans[:, :-1]], axis=-1)
    weights = alphas * trans
    weights_sum = weights.sum(-1)
    depth = (weights * ts).sum(-1)
    image = (weights[..., None] * rgbs).sum(-2)

    dirs = rd / jnp.maximum(jnp.linalg.norm(rd, axis=-1, keepdims=True), 1e-12)
    image = image + (1.0 - weights_sum)[:, None] * ngp_background(dirs, bg_params)
    return {"image": image.reshape(*prefix, 3),
            "depth": depth.reshape(*prefix),
            "weights_sum": weights_sum.reshape(*prefix)}


# ----------------------------------- main ---------------------------------------
if __name__ == "__main__":
    key = jax.random.PRNGKey(0)
    k_o, k_d, k_p = jax.random.split(key, 3)

    # small ray bundle: prefix (2, 32) -> 64 rays, 64 samples/ray
    prefix = (2, 32)
    rays_o = jax.random.uniform(k_o, prefix + (3,), jnp.float32, -0.5, 0.5)
    rays_d = jax.random.normal(k_d, prefix + (3,), jnp.float32)
    rays_d = rays_d / jnp.linalg.norm(rays_d, axis=-1, keepdims=True)

    sigma_params, bg_params = init_params(k_p)

    results = jax.jit(instant_ngp_forward)(rays_o, rays_d, sigma_params, bg_params)
    jax.block_until_ready(results)

    ref = jax.jit(_reference_forward)(rays_o, rays_d, sigma_params, bg_params)
    jax.block_until_ready(ref)

    img = results["image"]
    assert img.shape == prefix + (3,)
    assert results["depth"].shape == prefix
    assert results["weights_sum"].shape == prefix
    assert bool(jnp.all(jnp.isfinite(img)))
    assert bool(jnp.all(jnp.isfinite(results["depth"])))
    assert bool(jnp.all(jnp.isfinite(results["weights_sum"])))
    # fused kernel must agree with the unfused (sample-in-XLA + density kernel) path
    assert bool(jnp.allclose(results["image"], ref["image"], atol=5e-3, rtol=5e-3))
    assert bool(jnp.allclose(results["depth"], ref["depth"], atol=5e-3, rtol=5e-3))
    assert bool(jnp.allclose(results["weights_sum"], ref["weights_sum"], atol=5e-3, rtol=5e-3))

    print("KERNEL_OK")
</pallas_src>

<mosaic_0001>
module attributes {stable_mosaic.version = 11 : i64} {
  func.func @bg_kernel(%arg0: i32, %arg1: memref<3x256xf32, #tpu.memory_space<vmem>>, %arg2: memref<32x32xbf16, #tpu.memory_space<vmem>>, %arg3: memref<8x32xbf16, #tpu.memory_space<vmem>>, %arg4: memref<8x1xf32, #tpu.memory_space<vmem>>, %arg5: memref<8x256xf32, #tpu.memory_space<vmem>>) attributes {dimension_semantics = [#tpu.dimension_semantics<parallel>], iteration_bounds = array<i64: 1>, scalar_prefetch = 0 : i64, scratch_operands = 0 : i64, tpu.core_type = #tpu.core_type<tc>, window_params = [{transform_indices = @transform_0, window_bounds = array<i64: 3, 256>}, {pipeline_mode = #tpu.pipeline_mode<synchronous>, transform_indices = @transform_1, window_bounds = array<i64: 32, 32>}, {pipeline_mode = #tpu.pipeline_mode<synchronous>, transform_indices = @transform_2, window_bounds = array<i64: 8, 32>}, {pipeline_mode = #tpu.pipeline_mode<synchronous>, transform_indices = @transform_3, window_bounds = array<i64: 8, 1>}, {transform_indices = @transform_4, window_bounds = array<i64: 8, 256>}]} {
    %c0 = arith.constant 0 : index
    %c0_0 = arith.constant 0 : index
    %0 = vector.load %arg1[%c0, %c0_0] : memref<3x256xf32, #tpu.memory_space<vmem>>, vector<3x256xf32>
    %cst = arith.constant 1.000000e+00 : f32
    %1 = vector.broadcast %cst : f32 to vector<1x256xf32>
    %2 = math.sin %0 : vector<3x256xf32>
    %3 = math.cos %0 : vector<3x256xf32>
    %cst_1 = arith.constant 2.000000e+00 : f32
    %4 = vector.broadcast %cst_1 : f32 to vector<3x256xf32>
    %5 = arith.mulf %4, %2 : vector<3x256xf32>
    %6 = arith.mulf %5, %3 : vector<3x256xf32>
    %cst_2 = arith.constant 2.000000e+00 : f32
    %7 = vector.broadcast %cst_2 : f32 to vector<3x256xf32>
    %8 = arith.mulf %7, %2 : vector<3x256xf32>
    %9 = arith.mulf %8, %2 : vector<3x256xf32>
    %cst_3 = arith.constant 1.000000e+00 : f32
    %10 = vector.broadcast %cst_3 : f32 to vector<3x256xf32>
    %11 = arith.subf %10, %9 : vector<3x256xf32>
    %cst_4 = arith.constant 2.000000e+00 : f32
    %12 = vector.broadcast %cst_4 : f32 to vector<3x256xf32>
    %13 = arith.mulf %12, %6 : vector<3x256xf32>
    %14 = arith.mulf %13, %11 : vector<3x256xf32>
    %cst_5 = arith.constant 2.000000e+00 : f32
    %15 = vector.broadcast %cst_5 : f32 to vector<3x256xf32>
    %16 = arith.mulf %15, %6 : vector<3x256xf32>
    %17 = arith.mulf %16, %6 : vector<3x256xf32>
    %cst_6 = arith.constant 1.000000e+00 : f32
    %18 = vector.broadcast %cst_6 : f32 to vector<3x256xf32>
    %19 = arith.subf %18, %17 : vector<3x256xf32>
    %cst_7 = arith.constant 2.000000e+00 : f32
    %20 = vector.broadcast %cst_7 : f32 to vector<3x256xf32>
    %21 = arith.mulf %20, %14 : vector<3x256xf32>
    %22 = arith.mulf %21, %19 : vector<3x256xf32>
    %cst_8 = arith.constant 2.000000e+00 : f32
    %23 = vector.broadcast %cst_8 : f32 to vector<3x256xf32>
    %24 = arith.mulf %23, %14 : vector<3x256xf32>
    %25 = arith.mulf %24, %14 : vector<3x256xf32>
    %cst_9 = arith.constant 1.000000e+00 : f32
    %26 = vector.broadcast %cst_9 : f32 to vector<3x256xf32>
    %27 = arith.subf %26, %25 : vector<3x256xf32>
    %cst_10 = arith.constant 0.000000e+00 : f32
    %28 = vector.broadcast %cst_10 : f32 to vector<4x256xf32>
    %29 = tpu.concatenate %0, %1, %2, %3, %6, %11, %14, %19, %22, %27, %28 in 0 : vector<3x256xf32>, vector<1x256xf32>, vector<3x256xf32>, vector<3x256xf32>, vector<3x256xf32>, vector<3x256xf32>, vector<3x256xf32>, vector<3x256xf32>, vector<3x256xf32>, vector<3x256xf32>, vector<4x256xf32> -> vector<32x256xf32>
    %30 = arith.truncf %29 : vector<32x256xf32> to vector<32x256xbf16>
    %c0_11 = arith.constant 0 : index
    %c0_12 = arith.constant 0 : index
    %31 = vector.load %arg2[%c0_11, %c0_12] : memref<32x32xbf16, #tpu.memory_space<vmem>>, vector<32x32xbf16>
    %cst_13 = arith.constant dense<0.000000e+00> : vector<32x256xf32>
    %32 = tpu.matmul %31, %30, %cst_13 {dimension_numbers = #tpu.dot_dimension_numbers<[1], [0], [0], [1], [0, 0, 1, 1], [], []>} : vector<32x32xbf16>, vector<32x256xbf16>, vector<32x256xf32> -> vector<32x256xf32>
    %cst_14 = arith.constant 0.000000e+00 : f32
    %33 = vector.broadcast %cst_14 : f32 to vector<32x256xf32>
    %34 = arith.maximumf %32, %33 : vector<32x256xf32>
    %35 = arith.truncf %34 : vector<32x256xf32> to vector<32x256xbf16>
    %c0_15 = arith.constant 0 : index
    %c0_16 = arith.constant 0 : index
    %36 = vector.load %arg3[%c0_15, %c0_16] : memref<8x32xbf16, #tpu.memory_space<vmem>>, vector<8x32xbf16>
    %cst_17 = arith.constant dense<0.000000e+00> : vector<8x256xf32>
    %37 = tpu.matmul %36, %35, %cst_17 {dimension_numbers = #tpu.dot_dimension_numbers<[1], [0], [0], [1], [0, 0, 1, 1], [], []>} : vector<8x32xbf16>, vector<32x256xbf16>, vector<8x256xf32> -> vector<8x256xf32>
    %c0_18 = arith.constant 0 : index
    %c0_19 = arith.constant 0 : index
    %38 = vector.load %arg4[%c0_18, %c0_19] : memref<8x1xf32, #tpu.memory_space<vmem>>, vector<8x1xf32>
    %39 = vector.shape_cast %38 : vector<8x1xf32> to vector<8x1xf32>
    %40 = vector.broadcast %39 : vector<8x1xf32> to vector<8x256xf32>
    %41 = arith.addf %37, %40 : vector<8x256xf32>
    %42 = arith.negf %41 : vector<8x256xf32>
    %43 = math.exp %42 : vector<8x256xf32>
    %cst_20 = arith.constant 1.000000e+00 : f32
    %44 = vector.broadcast %cst_20 : f32 to vector<8x256xf32>
    %45 = arith.addf %44, %43 : vector<8x256xf32>
    %46 = arith.divf %44, %45 : vector<8x256xf32>
    %c0_21 = arith.constant 0 : index
    %c0_22 = arith.constant 0 : index
    %47 = vector.load %arg5[%c0_21, %c0_22] : memref<8x256xf32, #tpu.memory_space<vmem>>, vector<8x256xf32>
    tpu.vector_store %arg5[%c0_21, %c0_22], %46 {strides = array<i32>} : memref<8x256xf32, #tpu.memory_space<vmem>>, vector<8x256xf32>,
    return
  }
  func.func @transform_0(%arg0: i32) -> (i32, i32) {
    %c0_i32 = arith.constant 0 : i32
    %c0_i32_0 = arith.constant 0 : i32
    return %c0_i32, %arg0 : i32, i32
  }
  func.func @transform_1(%arg0: i32) -> (i32, i32) {
    %c0_i32 = arith.constant 0 : i32
    %c0_i32_0 = arith.constant 0 : i32
    %c0_i32_1 = arith.constant 0 : i32
    return %c0_i32, %c0_i32_0 : i32, i32
  }
  func.func @transform_2(%arg0: i32) -> (i32, i32) {
    %c0_i32 = arith.constant 0 : i32
    %c0_i32_0 = arith.constant 0 : i32
    %c0_i32_1 = arith.constant 0 : i32
    return %c0_i32, %c0_i32_0 : i32, i32
  }
  func.func @transform_3(%arg0: i32) -> (i32, i32) {
    %c0_i32 = arith.constant 0 : i32
    %c0_i32_0 = arith.constant 0 : i32
    %c0_i32_1 = arith.constant 0 : i32
    return %c0_i32, %c0_i32_0 : i32, i32
  }
  func.func @transform_4(%arg0: i32) -> (i32, i32) {
    %c0_i32 = arith.constant 0 : i32
    %c0_i32_0 = arith.constant 0 : i32
    return %c0_i32, %arg0 : i32, i32
  }
}

module attributes {stable_mosaic.version = 11 : i64} {
  func.func @raymarch_kernel(%arg0: i32, %arg1: memref<3x256xf32, #tpu.memory_space<vmem>>, %arg2: memref<3x256xf32, #tpu.memory_space<vmem>>, %arg3: memref<1x256xf32, #tpu.memory_space<vmem>>, %arg4: memref<1x256xf32, #tpu.memory_space<vmem>>, %arg5: memref<64x48xbf16, #tpu.memory_space<vmem>>, %arg6: memref<64x64xbf16, #tpu.memory_space<vmem>>, %arg7: memref<64x1xf32, #tpu.memory_space<vmem>>, %arg8: memref<8x64xbf16, #tpu.memory_space<vmem>>, %arg9: memref<8x1xf32, #tpu.memory_space<vmem>>, %arg10: memref<8x256xf32, #tpu.memory_space<vmem>>) attributes {dimension_semantics = [#tpu.dimension_semantics<parallel>], iteration_bounds = array<i64: 2>, scalar_prefetch = 0 : i64, scratch_operands = 0 : i64, tpu.core_type = #tpu.core_type<tc>, window_params = [{transform_indices = @transform_0, window_bounds = array<i64: 3, 256>}, {transform_indices = @transform_1, window_bounds = array<i64: 3, 256>}, {transform_indices = @transform_2, window_bounds = array<i64: 1, 256>}, {transform_indices = @transform_3, window_bounds = array<i64: 1, 256>}, {pipeline_mode = #tpu.pipeline_mode<synchronous>, transform_indices = @transform_4, window_bounds = array<i64: 64, 48>}, {pipeline_mode = #tpu.pipeline_mode<synchronous>, transform_indices = @transform_5, window_bounds = array<i64: 64, 64>}, {pipeline_mode = #tpu.pipeline_mode<synchronous>, transform_indices = @transform_6, window_bounds = array<i64: 64, 1>}, {pipeline_mode = #tpu.pipeline_mode<synchronous>, transform_indices = @transform_7, window_bounds = array<i64: 8, 64>}, {pipeline_mode = #tpu.pipeline_mode<synchronous>, transform_indices = @transform_8, window_bounds = array<i64: 8, 1>}, {transform_indices = @transform_9, window_bounds = array<i64: 8, 256>}]} {
    %c0 = arith.constant 0 : index
    %c0_0 = arith.constant 0 : index
    %0 = vector.load %arg1[%c0, %c0_0] : memref<3x256xf32, #tpu.memory_space<vmem>>, vector<3x256xf32>
    %c0_1 = arith.constant 0 : index
    %c0_2 = arith.constant 0 : index
    %1 = vector.load %arg2[%c0_1, %c0_2] : memref<3x256xf32, #tpu.memory_space<vmem>>, vector<3x256xf32>
    %c0_3 = arith.constant 0 : index
    %c0_4 = arith.constant 0 : index
    %2 = vector.load %arg3[%c0_3, %c0_4] : memref<1x256xf32, #tpu.memory_space<vmem>>, vector<1x256xf32>
    %c0_5 = arith.constant 0 : index
    %c0_6 = arith.constant 0 : index
    %3 = vector.load %arg4[%c0_5, %c0_6] : memref<1x256xf32, #tpu.memory_space<vmem>>, vector<1x256xf32>
    %4 = arith.subf %3, %2 : vector<1x256xf32>
    %cst = arith.constant 1.562500e-02 : f32
    %5 = vector.broadcast %cst : f32 to vector<1x256xf32>
    %6 = arith.mulf %4, %5 : vector<1x256xf32>
    %c0_7 = arith.constant 0 : index
    %c0_8 = arith.constant 0 : index
    %7 = vector.load %arg5[%c0_7, %c0_8] : memref<64x48xbf16, #tpu.memory_space<vmem>>, vector<64x48xbf16>
    %c0_9 = arith.constant 0 : index
    %c0_10 = arith.constant 0 : index
    %8 = vector.load %arg6[%c0_9, %c0_10] : memref<64x64xbf16, #tpu.memory_space<vmem>>, vector<64x64xbf16>
    %c0_11 = arith.constant 0 : index
    %c0_12 = arith.constant 0 : index
    %9 = vector.load %arg8[%c0_11, %c0_12] : memref<8x64xbf16, #tpu.memory_space<vmem>>, vector<8x64xbf16>
    %c0_13 = arith.constant 0 : index
    %c0_14 = arith.constant 0 : index
    %10 = vector.load %arg7[%c0_13, %c0_14] : memref<64x1xf32, #tpu.memory_space<vmem>>, vector<64x1xf32>
    %11 = vector.shape_cast %10 : vector<64x1xf32> to vector<64x1xf32>
    %12 = vector.broadcast %11 : vector<64x1xf32> to vector<64x1024xf32>
    %c0_15 = arith.constant 0 : index
    %c0_16 = arith.constant 0 : index
    %13 = vector.load %arg9[%c0_15, %c0_16] : memref<8x1xf32, #tpu.memory_space<vmem>>, vector<8x1xf32>
    %14 = vector.shape_cast %13 : vector<8x1xf32> to vector<8x1xf32>
    %15 = vector.broadcast %14 : vector<8x1xf32> to vector<8x1024xf32>
    %16 = tpu.concatenate %0, %0, %0, %0 in 1 : vector<3x256xf32>, vector<3x256xf32>, vector<3x256xf32>, vector<3x256xf32> -> vector<3x1024xf32>
    %17 = tpu.concatenate %1, %1, %1, %1 in 1 : vector<3x256xf32>, vector<3x256xf32>, vector<3x256xf32>, vector<3x256xf32> -> vector<3x1024xf32>
    %18 = tpu.concatenate %2, %2, %2, %2 in 1 : vector<1x256xf32>, vector<1x256xf32>, vector<1x256xf32>, vector<1x256xf32> -> vector<1x1024xf32>
    %19 = tpu.concatenate %6, %6, %6, %6 in 1 : vector<1x256xf32>, vector<1x256xf32>, vector<1x256xf32>, vector<1x256xf32> -> vector<1x1024xf32>
    %cst_17 = arith.constant 5.000000e-01 : f32
    %20 = vector.broadcast %cst_17 : f32 to vector<1x256xf32>
    %cst_18 = arith.constant 1.500000e+00 : f32
    %21 = vector.broadcast %cst_18 : f32 to vector<1x256xf32>
    %cst_19 = arith.constant 2.500000e+00 : f32
    %22 = vector.broadcast %cst_19 : f32 to vector<1x256xf32>
    %cst_20 = arith.constant 3.500000e+00 : f32
    %23 = vector.broadcast %cst_20 : f32 to vector<1x256xf32>
    %24 = tpu.concatenate %20, %21, %22, %23 in 1 : vector<1x256xf32>, vector<1x256xf32>, vector<1x256xf32>, vector<1x256xf32> -> vector<1x1024xf32>
    %cst_21 = arith.constant 1.000000e+00 : f32
    %25 = vector.broadcast %cst_21 : f32 to vector<1x256xf32>
    %cst_22 = arith.constant 0.000000e+00 : f32
    %26 = vector.broadcast %cst_22 : f32 to vector<1x256xf32>
    %cst_23 = arith.constant 0.000000e+00 : f32
    %27 = vector.broadcast %cst_23 : f32 to vector<1x256xf32>
    %cst_24 = arith.constant 0.000000e+00 : f32
    %28 = vector.broadcast %cst_24 : f32 to vector<3x256xf32>
    %c0_i32 = arith.constant 0 : i32
    %c16_i32 = arith.constant 16 : i32
    %29 = arith.addi %c0_i32, %c16_i32 : i32
    %c1_i32 = arith.constant 1 : i32
    %30:4 = scf.for %arg11 = %c0_i32 to %29 step %c1_i32 iter_args(%arg12 = %25, %arg13 = %26, %arg14 = %27, %arg15 = %28) -> (vector<1x256xf32>, vector<1x256xf32>, vector<1x256xf32>, vector<3x256xf32>)  : i32 {
      %c4_i32 = arith.constant 4 : i32
      %34 = arith.muli %arg11, %c4_i32 : i32
      %35 = arith.sitofp %34 : i32 to f32
      %36 = vector.broadcast %35 : f32 to vector<1x1024xf32>
      %37 = arith.addf %36, %24 : vector<1x1024xf32>
      %38 = arith.mulf %19, %37 : vector<1x1024xf32>
      %39 = arith.addf %18, %38 : vector<1x1024xf32>
      %40 = vector.broadcast %39 : vector<1x1024xf32> to vector<3x1024xf32>
      %41 = arith.mulf %17, %40 : vector<3x1024xf32>
      %42 = arith.addf %16, %41 : vector<3x1024xf32>
      %cst_29 = arith.constant -1.000000e+00 : f32
      %cst_30 = arith.constant 1.000000e+00 : f32
      %43 = vector.broadcast %cst_29 : f32 to vector<3x1024xf32>
      %44 = arith.maximumf %43, %42 : vector<3x1024xf32>
      %45 = vector.broadcast %cst_30 : f32 to vector<3x1024xf32>
      %46 = arith.minimumf %45, %44 : vector<3x1024xf32>
      %cst_31 = arith.constant 1.000000e+00 : f32
      %47 = vector.broadcast %cst_31 : f32 to vector<1x1024xf32>
      %48 = math.sin %46 : vector<3x1024xf32>
      %49 = math.cos %46 : vector<3x1024xf32>
      %cst_32 = arith.constant 2.000000e+00 : f32
      %50 = vector.broadcast %cst_32 : f32 to vector<3x1024xf32>
      %51 = arith.mulf %50, %48 : vector<3x1024xf32>
      %52 = arith.mulf %51, %49 : vector<3x1024xf32>
      %cst_33 = arith.constant 2.000000e+00 : f32
      %53 = vector.broadcast %cst_33 : f32 to vector<3x1024xf32>
      %54 = arith.mulf %53, %48 : vector<3x1024xf32>
      %55 = arith.mulf %54, %48 : vector<3x1024xf32>
      %cst_34 = arith.constant 1.000000e+00 : f32
      %56 = vector.broadcast %cst_34 : f32 to vector<3x1024xf32>
      %57 = arith.subf %56, %55 : vector<3x1024xf32>
      %cst_35 = arith.constant 2.000000e+00 : f32
      %58 = vector.broadcast %cst_35 : f32 to vector<3x1024xf32>
      %59 = arith.mulf %58, %52 : vector<3x1024xf32>
      %60 = arith.mulf %59, %57 : vector<3x1024xf32>
      %cst_36 = arith.constant 2.000000e+00 : f32
      %61 = vector.broadcast %cst_36 : f32 to vector<3x1024xf32>
      %62 = arith.mulf %61, %52 : vector<3x1024xf32>
      %63 = arith.mulf %62, %52 : vector<3x1024xf32>
      %cst_37 = arith.constant 1.000000e+00 : f32
      %64 = vector.broadcast %cst_37 : f32 to vector<3x1024xf32>
      %65 = arith.subf %64, %63 : vector<3x1024xf32>
      %cst_38 = arith.constant 2.000000e+00 : f32
      %66 = vector.broadcast %cst_38 : f32 to vector<3x1024xf32>
      %67 = arith.mulf %66, %60 : vector<3x1024xf32>
      %68 = arith.mulf %67, %65 : vector<3x1024xf32>
      %cst_39 = arith.constant 2.000000e+00 : f32
      %69 = vector.broadcast %cst_39 : f32 to vector<3x1024xf32>
      %70 = arith.mulf %69, %60 : vector<3x1024xf32>
      %71 = arith.mulf %70, %60 : vector<3x1024xf32>
      %cst_40 = arith.constant 1.000000e+00 : f32
      %72 = vector.broadcast %cst_40 : f32 to vector<3x1024xf32>
      %73 = arith.subf %72, %71 : vector<3x1024xf32>
      %cst_41 = arith.constant 2.000000e+00 : f32
      %74 = vector.broadcast %cst_41 : f32 to vector<3x1024xf32>
      %75 = arith.mulf %74, %68 : vector<3x1024xf32>
      %76 = arith.mulf %75, %73 : vector<3x1024xf32>
      %cst_42 = arith.constant 2.000000e+00 : f32
      %77 = vector.broadcast %cst_42 : f32 to vector<3x1024xf32>
      %78 = arith.mulf %77, %68 : vector<3x1024xf32>
      %79 = arith.mulf %78, %68 : vector<3x1024xf32>
      %cst_43 = arith.constant 1.000000e+00 : f32
      %80 = vector.broadcast %cst_43 : f32 to vector<3x1024xf32>
      %81 = arith.subf %80, %79 : vector<3x1024xf32>
      %cst_44 = arith.constant 0.000000e+00 : f32
      %82 = vector.broadcast %cst_44 : f32 to vector<14x1024xf32>
      %83 = tpu.concatenate %46, %47, %48, %49, %52, %57, %60, %65, %68, %73, %76, %81, %82 in 0 : vector<3x1024xf32>, vector<1x1024xf32>, vector<3x1024xf32>, vector<3x1024xf32>, vector<3x1024xf32>, vector<3x1024xf32>, vector<3x1024xf32>, vector<3x1024xf32>, vector<3x1024xf32>, vector<3x1024xf32>, vector<3x1024xf32>, vector<3x1024xf32>, vector<14x1024xf32> -> vector<48x1024xf32>
      %84 = arith.truncf %83 : vector<48x1024xf32> to vector<48x1024xbf16>
      %cst_45 = arith.constant dense<0.000000e+00> : vector<64x1024xf32>
      %85 = tpu.matmul %7, %84, %cst_45 {dimension_numbers = #tpu.dot_dimension_numbers<[1], [0], [0], [1], [0, 0, 1, 1], [], []>} : vector<64x48xbf16>, vector<48x1024xbf16>, vector<64x1024xf32> -> vector<64x1024xf32>
      %cst_46 = arith.constant 0.000000e+00 : f32
      %86 = vector.broadcast %cst_46 : f32 to vector<64x1024xf32>
      %87 = arith.maximumf %85, %86 : vector<64x1024xf32>
      %88 = arith.truncf %87 : vector<64x1024xf32> to vector<64x1024xbf16>
      %cst_47 = arith.constant dense<0.000000e+00> : vector<64x1024xf32>
      %89 = tpu.matmul %8, %88, %cst_47 {dimension_numbers = #tpu.dot_dimension_numbers<[1], [0], [0], [1], [0, 0, 1, 1], [], []>} : vector<64x64xbf16>, vector<64x1024xbf16>, vector<64x1024xf32> -> vector<64x1024xf32>
      %90 = arith.addf %89, %12 : vector<64x1024xf32>
      %cst_48 = arith.constant 0.000000e+00 : f32
      %91 = vector.broadcast %cst_48 : f32 to vector<64x1024xf32>
      %92 = arith.maximumf %90, %91 : vector<64x1024xf32>
      %93 = arith.truncf %92 : vector<64x1024xf32> to vector<64x1024xbf16>
      %cst_49 = arith.constant dense<0.000000e+00> : vector<8x1024xf32>
      %94 = tpu.matmul %9, %93, %cst_49 {dimension_numbers = #tpu.dot_dimension_numbers<[1], [0], [0], [1], [0, 0, 1, 1], [], []>} : vector<8x64xbf16>, vector<64x1024xbf16>, vector<8x1024xf32> -> vector<8x1024xf32>
      %95 = arith.addf %94, %15 : vector<8x1024xf32>
      %96 = vector.extract_strided_slice %46 {offsets = [0, 0], sizes = [1, 1024], strides = [1, 1]} : vector<3x1024xf32> to vector<1x1024xf32>
      %97 = vector.extract_strided_slice %46 {offsets = [0, 0], sizes = [1, 1024], strides = [1, 1]} : vector<3x1024xf32> to vector<1x1024xf32>
      %98 = arith.mulf %96, %97 : vector<1x1024xf32>
      %99 = vector.extract_strided_slice %46 {offsets = [1, 0], sizes = [1, 1024], strides = [1, 1]} : vector<3x1024xf32> to vector<1x1024xf32>
      %100 = vector.extract_strided_slice %46 {offsets = [1, 0], sizes = [1, 1024], strides = [1, 1]} : vector<3x1024xf32> to vector<1x1024xf32>
      %101 = arith.mulf %99, %100 : vector<1x1024xf32>
      %102 = arith.addf %98, %101 : vector<1x1024xf32>
      %103 = vector.extract_strided_slice %46 {offsets = [2, 0], sizes = [1, 1024], strides = [1, 1]} : vector<3x1024xf32> to vector<1x1024xf32>
      %104 = vector.extract_strided_slice %46 {offsets = [2, 0], sizes = [1, 1024], strides = [1, 1]} : vector<3x1024xf32> to vector<1x1024xf32>
      %105 = arith.mulf %103, %104 : vector<1x1024xf32>
      %106 = arith.addf %102, %105 : vector<1x1024xf32>
      %cst_50 = arith.constant -2.000000e+00 : f32
      %107 = vector.broadcast %cst_50 : f32 to vector<1x1024xf32>
      %108 = arith.mulf %106, %107 : vector<1x1024xf32>
      %109 = math.exp %108 : vector<1x1024xf32>
      %cst_51 = arith.constant 5.000000e-01 : f32
      %110 = vector.broadcast %cst_51 : f32 to vector<1x1024xf32>
      %111 = arith.mulf %110, %109 : vector<1x1024xf32>
      %112 = vector.extract_strided_slice %95 {offsets = [0, 0], sizes = [1, 1024], strides = [1, 1]} : vector<8x1024xf32> to vector<1x1024xf32>
      %113 = arith.addf %112, %111 : vector<1x1024xf32>
      %cst_52 = arith.constant 1.500000e+01 : f32
      %114 = vector.broadcast %cst_52 : f32 to vector<1x1024xf32>
      %115 = arith.minimumf %113, %114 : vector<1x1024xf32>
      %116 = math.exp %115 : vector<1x1024xf32>
      %117 = vector.extract_strided_slice %95 {offsets = [1, 0], sizes = [3, 1024], strides = [1, 1]} : vector<8x1024xf32> to vector<3x1024xf32>
      %118 = arith.negf %117 : vector<3x1024xf32>
      %119 = math.exp %118 : vector<3x1024xf32>
      %cst_53 = arith.constant 1.000000e+00 : f32
      %120 = vector.broadcast %cst_53 : f32 to vector<3x1024xf32>
      %121 = arith.addf %120, %119 : vector<3x1024xf32>
      %122 = arith.divf %120, %121 : vector<3x1024xf32>
      %123 = vector.extract_strided_slice %116 {offsets = [0, 0], sizes = [1, 256], strides = [1, 1]} : vector<1x1024xf32> to vector<1x256xf32>
      %cst_54 = arith.constant 0.000000e+00 : f32
      %124 = vector.broadcast %cst_54 : f32 to vector<1x256xf32>
      %125 = arith.subf %124, %123 : vector<1x256xf32>
      %126 = arith.mulf %125, %6 : vector<1x256xf32>
      %127 = math.exp %126 : vector<1x256xf32>
      %cst_55 = arith.constant 1.000000e+00 : f32
      %128 = vector.broadcast %cst_55 : f32 to vector<1x256xf32>
      %129 = arith.subf %128, %127 : vector<1x256xf32>
      %130 = arith.mulf %129, %arg12 : vector<1x256xf32>
      %cst_56 = arith.constant 1.000000e+00 : f32
      %131 = vector.broadcast %cst_56 : f32 to vector<1x256xf32>
      %132 = arith.subf %131, %129 : vector<1x256xf32>
      %cst_57 = arith.constant 1.000000e-10 : f32
      %133 = vector.broadcast %cst_57 : f32 to vector<1x256xf32>
      %134 = arith.addf %132, %133 : vector<1x256xf32>
      %135 = arith.mulf %arg12, %134 : vector<1x256xf32>
      %136 = arith.addf %arg13, %130 : vector<1x256xf32>
      %137 = vector.extract_strided_slice %39 {offsets = [0, 0], sizes = [1, 256], strides = [1, 1]} : vector<1x1024xf32> to vector<1x256xf32>
      %138 = arith.mulf %130, %137 : vector<1x256xf32>
      %139 = arith.addf %arg14, %138 : vector<1x256xf32>
      %140 = vector.extract_strided_slice %122 {offsets = [0, 0], sizes = [3, 256], strides = [1, 1]} : vector<3x1024xf32> to vector<3x256xf32>
      %141 = vector.broadcast %130 : vector<1x256xf32> to vector<3x256xf32>
      %142 = arith.mulf %141, %140 : vector<3x256xf32>
      %143 = arith.addf %arg15, %142 : vector<3x256xf32>
      %144 = vector.extract_strided_slice %116 {offsets = [0, 256], sizes = [1, 256], strides = [1, 1]} : vector<1x1024xf32> to vector<1x256xf32>
      %cst_58 = arith.constant 0.000000e+00 : f32
      %145 = vector.broadcast %cst_58 : f32 to vector<1x256xf32>
      %146 = arith.subf %145, %144 : vector<1x256xf32>
      %147 = arith.mulf %146, %6 : vector<1x256xf32>
      %148 = math.exp %147 : vector<1x256xf32>
      %cst_59 = arith.constant 1.000000e+00 : f32
      %149 = vector.broadcast %cst_59 : f32 to vector<1x256xf32>
      %150 = arith.subf %149, %148 : vector<1x256xf32>
      %151 = arith.mulf %150, %135 : vector<1x256xf32>
      %cst_60 = arith.constant 1.000000e+00 : f32
      %152 = vector.broadcast %cst_60 : f32 to vector<1x256xf32>
      %153 = arith.subf %152, %150 : vector<1x256xf32>
      %cst_61 = arith.constant 1.000000e-10 : f32
      %154 = vector.broadcast %cst_61 : f32 to vector<1x256xf32>
      %155 = arith.addf %153, %154 : vector<1x256xf32>
      %156 = arith.mulf %135, %155 : vector<1x256xf32>
      %157 = arith.addf %136, %151 : vector<1x256xf32>
      %158 = vector.extract_strided_slice %39 {offsets = [0, 256], sizes = [1, 256], strides = [1, 1]} : vector<1x1024xf32> to vector<1x256xf32>
      %159 = arith.mulf %151, %158 : vector<1x256xf32>
      %160 = arith.addf %139, %159 : vector<1x256xf32>
      %161 = vector.extract_strided_slice %122 {offsets = [0, 256], sizes = [3, 256], strides = [1, 1]} : vector<3x1024xf32> to vector<3x256xf32>
      %162 = vector.broadcast %151 : vector<1x256xf32> to vector<3x256xf32>
      %163 = arith.mulf %162, %161 : vector<3x256xf32>
      %164 = arith.addf %143, %163 : vector<3x256xf32>
      %165 = vector.extract_strided_slice %116 {offsets = [0, 512], sizes = [1, 256], strides = [1, 1]} : vector<1x1024xf32> to vector<1x256xf32>
      %cst_62 = arith.constant 0.000000e+00 : f32
      %166 = vector.broadcast %cst_62 : f32 to vector<1x256xf32>
      %167 = arith.subf %166, %165 : vector<1x256xf32>
      %168 = arith.mulf %167, %6 : vector<1x256xf32>
      %169 = math.exp %168 : vector<1x256xf32>
      %cst_63 = arith.constant 1.000000e+00 : f32
      %170 = vector.broadcast %cst_63 : f32 to vector<1x256xf32>
      %171 = arith.subf %170, %169 : vector<1x256xf32>
      %172 = arith.mulf %171, %156 : vector<1x256xf32>
      %cst_64 = arith.constant 1.000000e+00 : f32
      %173 = vector.broadcast %cst_64 : f32 to vector<1x256xf32>
      %174 = arith.subf %173, %171 : vector<1x256xf32>
      %cst_65 = arith.constant 1.000000e-10 : f32
      %175 = vector.broadcast %cst_65 : f32 to vector<1x256xf32>
      %176 = arith.addf %174, %175 : vector<1x256xf32>
      %177 = arith.mulf %156, %176 : vector<1x256xf32>
      %178 = arith.addf %157, %172 : vector<1x256xf32>
      %179 = vector.extract_strided_slice %39 {offsets = [0, 512], sizes = [1, 256], strides = [1, 1]} : vector<1x1024xf32> to vector<1x256xf32>
      %180 = arith.mulf %172, %179 : vector<1x256xf32>
      %181 = arith.addf %160, %180 : vector<1x256xf32>
      %182 = vector.extract_strided_slice %122 {offsets = [0, 512], sizes = [3, 256], strides = [1, 1]} : vector<3x1024xf32> to vector<3x256xf32>
      %183 = vector.broadcast %172 : vector<1x256xf32> to vector<3x256xf32>
      %184 = arith.mulf %183, %182 : vector<3x256xf32>
      %185 = arith.addf %164, %184 : vector<3x256xf32>
      %186 = vector.extract_strided_slice %116 {offsets = [0, 768], sizes = [1, 256], strides = [1, 1]} : vector<1x1024xf32> to vector<1x256xf32>
      %cst_66 = arith.constant 0.000000e+00 : f32
      %187 = vector.broadcast %cst_66 : f32 to vector<1x256xf32>
      %188 = arith.subf %187, %186 : vector<1x256xf32>
      %189 = arith.mulf %188, %6 : vector<1x256xf32>
      %190 = math.exp %189 : vector<1x256xf32>
      %cst_67 = arith.constant 1.000000e+00 : f32
      %191 = vector.broadcast %cst_67 : f32 to vector<1x256xf32>
      %192 = arith.subf %191, %190 : vector<1x256xf32>
      %193 = arith.mulf %192, %177 : vector<1x256xf32>
      %cst_68 = arith.constant 1.000000e+00 : f32
      %194 = vector.broadcast %cst_68 : f32 to vector<1x256xf32>
      %195 = arith.subf %194, %192 : vector<1x256xf32>
      %cst_69 = arith.constant 1.000000e-10 : f32
      %196 = vector.broadcast %cst_69 : f32 to vector<1x256xf32>
      %197 = arith.addf %195, %196 : vector<1x256xf32>
      %198 = arith.mulf %177, %197 : vector<1x256xf32>
      %199 = arith.addf %178, %193 : vector<1x256xf32>
      %200 = vector.extract_strided_slice %39 {offsets = [0, 768], sizes = [1, 256], strides = [1, 1]} : vector<1x1024xf32> to vector<1x256xf32>
      %201 = arith.mulf %193, %200 : vector<1x256xf32>
      %202 = arith.addf %181, %201 : vector<1x256xf32>
      %203 = vector.extract_strided_slice %122 {offsets = [0, 768], sizes = [3, 256], strides = [1, 1]} : vector<3x1024xf32> to vector<3x256xf32>
      %204 = vector.broadcast %193 : vector<1x256xf32> to vector<3x256xf32>
      %205 = arith.mulf %204, %203 : vector<3x256xf32>
      %206 = arith.addf %185, %205 : vector<3x256xf32>
      scf.yield %198, %199, %202, %206 : vector<1x256xf32>, vector<1x256xf32>, vector<1x256xf32>, vector<3x256xf32>
    }
    %c16_i32_25 = arith.constant 16 : i32
    %cst_26 = arith.constant 0.000000e+00 : f32
    %31 = vector.broadcast %cst_26 : f32 to vector<3x256xf32>
    %32 = tpu.concatenate %30#3, %30#2, %30#1, %31 in 0 : vector<3x256xf32>, vector<1x256xf32>, vector<1x256xf32>, vector<3x256xf32> -> vector<8x256xf32>
    %c0_27 = arith.constant 0 : index
    %c0_28 = arith.constant 0 : index
    %33 = vector.load %arg10[%c0_27, %c0_28] : memref<8x256xf32, #tpu.memory_space<vmem>>, vector<8x256xf32>
    tpu.vector_store %arg10[%c0_27, %c0_28], %32 {strides = array<i32>} : memref<8x256xf32, #tpu.memory_space<vmem>>, vector<8x256xf32>,
    return
  }
  func.func @transform_0(%arg0: i32) -> (i32, i32) {
    %c0_i32 = arith.constant 0 : i32
    %c0_i32_0 = arith.constant 0 : i32
    return %c0_i32, %arg0 : i32, i32
  }
  func.func @transform_1(%arg0: i32) -> (i32, i32) {
    %c0_i32 = arith.constant 0 : i32
    %c0_i32_0 = arith.constant 0 : i32
    return %c0_i32, %arg0 : i32, i32
  }
  func.func @transform_2(%arg0: i32) -> (i32, i32) {
    %c0_i32 = arith.constant 0 : i32
    %c0_i32_0 = arith.constant 0 : i32
    return %c0_i32, %arg0 : i32, i32
  }
  func.func @transform_3(%arg0: i32) -> (i32, i32) {
    %c0_i32 = arith.constant 0 : i32
    %c0_i32_0 = arith.constant 0 : i32
    return %c0_i32, %arg0 : i32, i32
  }
  func.func @transform_4(%arg0: i32) -> (i32, i32) {
    %c0_i32 = arith.constant 0 : i32
    %c0_i32_0 = arith.constant 0 : i32
    %c0_i32_1 = arith.constant 0 : i32
    return %c0_i32, %c0_i32_0 : i32, i32
  }
  func.func @transform_5(%arg0: i32) -> (i32, i32) {
    %c0_i32 = arith.constant 0 : i32
    %c0_i32_0 = arith.constant 0 : i32
    %c0_i32_1 = arith.constant 0 : i32
    return %c0_i32, %c0_i32_0 : i32, i32
  }
  func.func @transform_6(%arg0: i32) -> (i32, i32) {
    %c0_i32 = arith.constant 0 : i32
    %c0_i32_0 = arith.constant 0 : i32
    %c0_i32_1 = arith.constant 0 : i32
    return %c0_i32, %c0_i32_0 : i32, i32
  }
  func.func @transform_7(%arg0: i32) -> (i32, i32) {
    %c0_i32 = arith.constant 0 : i32
    %c0_i32_0 = arith.constant 0 : i32
    %c0_i32_1 = arith.constant 0 : i32
    return %c0_i32, %c0_i32_0 : i32, i32
  }
  func.func @transform_8(%arg0: i32) -> (i32, i32) {
    %c0_i32 = arith.constant 0 : i32
    %c0_i32_0 = arith.constant 0 : i32
    %c0_i32_1 = arith.constant 0 : i32
    return %c0_i32, %c0_i32_0 : i32, i32
  }
  func.func @transform_9(%arg0: i32) -> (i32, i32) {
    %c0_i32 = arith.constant 0 : i32
    %c0_i32_0 = arith.constant 0 : i32
    return %c0_i32, %arg0 : i32, i32
  }
}

</mosaic_0001>

<bundles_post_ra>
// kernel: squeeze.4
= control target key start
LH: loop header
LB: loop body
LE: loop exit
PB: predicated region body
PF: predicated region fallthrough
CT: control target
= control target key end

     0   :  { %s85_s0 = inlined_call_operand.vmem [shape: f32[64], index: 0, kind: input, shape index: {}]   ;;  %s86_s1 = inlined_call_operand.hbm [shape: f32[2,32], index: 1, kind: output, shape index: {}]  }
   0x1   :  { %v5_v0 = vld [vmem:[%s85_s0] sm:$0x1] }
   0x2   :  { %2 = vsyncpa [#allocation1], 0  ;;  %6 = vst [vmem:[#allocation3] sm:$0x1] %v5_v0  ;;  %vm8_vm0 = vcmask 261120   ;;  %s58_s0 = smov 96  }
   0x3   :  { %s59_s8 = smov [#allocation0]  }
   0x4   :  { %s26_s9 = sshll.u32 %s59_s8, 4  ;;  %s27_s9 = int_to_ptr.vmem [resolvable:$true] %s26_s9 }
   0x5   :  { %s34_s10 = scalar_lea.vmem %s27_s9, 32  ;;  %p39_p1 = scmp.lt.s32.totalorder %s27_s9, %s27_s9 }
   0x6   :  { %p35_p0 = scmp.ne.s32.totalorder %s27_s9, %s34_s10  ;;  %p40_p2 = scmp.lt.s32.totalorder %s34_s10, %s34_s10 }
   0x8   :  { %p41_p3 = por %p40_p2, %p39_p1 }
   0x9   :  { %v10_v1 = vld [vmem:[#allocation3] sm:$0x1]  }
   0xa   :  { %v7_v2 = vld [vmem:[#allocation3] sm:$0x1]   ;;  %11 = vrot.lane.b32.xlu0 %v10_v1, %s58_s0  ;;  %p42_p4 = pnand %p41_p3, %p35_p0 }
   0xb   :  { %9 = vst.msk [vmem:[#allocation2] sm:$0x1] %vm8_vm0, %v7_v2  }
  0x7c   :  { %v12_v3 = vpop.permute.xlu0 %11  }
  0x7d   :  { %15 = vst.msk [vmem:[#allocation2 + $0x1] sm:$0x1] %vm8_vm0, %v12_v3  }
  0x84   :  { %v19_v4 = vld [vmem:[#allocation2] sm:$0x3] }
  0x85   :  { %21 = vst [vmem:[#allocation0] sm:$0x3] %v19_v4 }
  0x86   :  { %45 = shalt.err (!%p42_p4)
}
  0x87   :  { %s46_s13 = scalar_lea.hbm %s86_s1, 32 }
  0x88   :  { %p47_p5 = scmp.ne.s32.totalorder %s86_s1, %s46_s13  ;;  %p50_p6 = scmp.lt.u32.totalorder %s46_s13, %s86_s1 }
  0x8a   :  { %p52_p7 = pnand %p50_p6, %p47_p5 }
  0x8c   :  { %55 = shalt.err (!%p52_p7)
}
  0x8d   :  { %29 = dma.vmem_to_hbm [thread:$0]  %s27_s9, 32, %s86_s1, [#allocation1]  }
  0x8e   :  { %56 = dma.done.wait [#allocation1], 32  }
  0x8f   :  { %57 = vsyncadd [#allocation1], 4294967264 }
  0x90   :  { %31 = vsyncpa [#allocation1], 1 }

// kernel: instant_ngp_forward.3
= control target key start
LH: loop header
LB: loop body
LE: loop exit
PB: predicated region body
PF: predicated region fallthrough
CT: control target
= control target key end

     0   :  { %v516_v6 = vmov 0   ;;  %v517_v13 = vmov 683565275   ;;  %v518_v15 = vmov 2475754826   ;;  %s612_s0 = inlined_call_operand.vmem [shape: f32[3,256], index: 0, kind: input, shape index: {}]   ;;  %s613_s1 = inlined_call_operand.vmem [shape: bf16[32,32], index: 1, kind: input, shape index: {}]   ;;  %s614_s3 = inlined_call_operand.vmem [shape: f32[8,1], index: 3, kind: input, shape index: {}]   ;;  %s615_s2 = inlined_call_operand.vmem [shape: bf16[8,32], index: 2, kind: input, shape index: {}]   ;;  %s616_s4 = inlined_call_operand.vmem [shape: f32[8,256], index: 4, kind: output, shape index: {}]  }
   0x1   :  { %v552_v0 = vld [vmem:[%s612_s0] sm:$0x77]  ;;  %365 = vmatprep.mubr.bf16.mxu0 %v516_v6  ;;  %440 = vmatprep.mubr.bf16.mxu1 %v516_v6  ;;  %v519_v17 = vmov 2131351028   ;;  %v520_v19 = vmov 2102212464  }
   0x2   :  { %v22_v1 = vand.u32 2139095040, %v552_v0  ;;  %v19_v3 = vand.u32 2147483647, %v552_v0  ;;  %500 = vset.pattern.permute.xlu0 %v516_v6  ;;  %v521_v21 = vmov 920167782   ;;  %vm21_vm7 = vcmp.lt.s32.totalorder %v552_v0, 0 }
   0x3   :  { %v522_v28 = vmov 1326507024   ;;  %vm111_vm15 = vweird.f32 %v552_v0 }
   0x4   :  { %v23_v2 = vshrl.u32 %v22_v1, 23  ;;  %v26_v7 = vand.u32 8388607, %v19_v3  ;;  %vm20_vm8 = vcmp.le.f32.partialorder %v19_v3, 0.7853982 }
   0x6   :  { %v467_v4 = vadd.s32 4294967169, %v23_v2  ;;  %v27_v10 = vor.u32 8388608, %v26_v7 }
   0x8   :  { %v29_v5 = vadd.s32 1, %v467_v4  ;;  %v67_v30 = vshll.u32 %v27_v10, 8 }
   0xa   :  { %vm30_vm0 = vcmp.gt.s32.totalorder %v29_v5, 0 }
   0xb   :  { %v31_v8 = vsel %vm30_vm0, %v29_v5, 0  ;;  %vm283_vm0 = vcmask 1042432  }
   0xc   :  { %v33_v9 = vand.u32 31, %v31_v8  ;;  %v32_v11 = vshrl.u32 %v31_v8, 5 }
   0xe   :  { %v34_v12 = vsub.s32 32, %v33_v9  ;;  %v36_v14 = vshll.u32 %v517_v13, %v33_v9  ;;  %v39_v16 = vshll.u32 %v518_v15, %v33_v9  ;;  %v42_v18 = vshll.u32 %v519_v17, %v33_v9 }
   0xf   :  { %v45_v20 = vshll.u32 %v520_v19, %v33_v9  ;;  %v48_v22 = vshll.u32 %v521_v21, %v33_v9  ;;  %vm51_vm1 = vcmp.lt.s32.totalorder %v32_v11, 1  ;;  %vm54_vm2 = vcmp.lt.s32.totalorder %v32_v11, 4 }
  0x10   :  { %v35_v23 = vshrl.u32 %v517_v13, %v34_v12  ;;  %v37_v24 = vshrl.u32 %v518_v15, %v34_v12  ;;  %v40_v25 = vshrl.u32 %v519_v17, %v34_v12  ;;  %v43_v26 = vshrl.u32 %v520_v19, %v34_v12 }
  0x11   :  { %v46_v27 = vshrl.u32 %v521_v21, %v34_v12  ;;  %v49_v29 = vshrl.u32 %v522_v28, %v34_v12  ;;  %vm52_vm3 = vcmp.lt.s32.totalorder %v32_v11, 2  ;;  %vm53_vm4 = vcmp.lt.s32.totalorder %v32_v11, 3 }
  0x12   :  { %v38_v31 = vor.u32 %v37_v24, %v36_v14  ;;  %v41_v32 = vor.u32 %v40_v25, %v39_v16  ;;  %v44_v33 = vor.u32 %v43_v26, %v42_v18 }
  0x13   :  { %v47_v34 = vor.u32 %v46_v27, %v45_v20  ;;  %v50_v35 = vor.u32 %v49_v29, %v48_v22 }
  0x14   :  { %v55_v36 = vsel %vm51_vm1, %v35_v23, %v38_v31  ;;  %v56_v37 = vsel %vm54_vm2, %v44_v33, 2102212464  ;;  %v59_v38 = vsel %vm51_vm1, %v38_v31, %v41_v32  ;;  %v63_v39 = vsel %vm51_vm1, %v41_v32, %v44_v33 }
  0x15   :  { %v57_v40 = vsel %vm53_vm4, %v41_v32, %v56_v37  ;;  %v60_v41 = vsel %vm54_vm2, %v47_v34, 920167782  ;;  %v64_v42 = vsel %vm54_vm2, %v50_v35, 1326507024  ;;  %vm286_vm1 = vcmask 1043456  }
  0x16   :  { %v61_v43 = vsel %vm53_vm4, %v44_v33, %v60_v41  ;;  %v65_v44 = vsel %vm53_vm4, %v47_v34, %v64_v42  ;;  %v58_v45 = vsel %vm52_vm3, %v55_v36, %v57_v40  ;;  %v284_v41 = vsel %vm283_vm0, %v552_v0, 1.0 }
  0x17   :  { %v62_v46 = vsel %vm52_vm3, %v59_v38, %v61_v43  ;;  %v66_v47 = vsel %vm52_vm3, %v63_v39, %v65_v44  ;;  %v74_v52 = vmul.u32 %v67_v30, %v58_v45  ;;  %vm289_vm2 = vcmask 1046528  }
  0x18   :  { %v561_v48 = vmul.u32.u64.low %v67_v30, %v66_v47  ;;  %v562_v49 = vmul.u32.u64.high %v67_v30, %v66_v47, %v561_v48  ;;  %v564_v50 = vmul.u32.u64.low %v67_v30, %v62_v46  ;;  %v565_v51 = vmul.u32.u64.high %v67_v30, %v62_v46, %v564_v50 }
  0x19   :  { %v239_v30 = vcombine.high %v552_v0, %v552_v0  ;;  %vm292_vm3 = vcmask 1041408   ;;  %vm295_vm4 = vcmask 1044480  }
  0x1a   :  { %vm76_vm5 = vc.u32 %v562_v49, %v564_v50  ;;  %v77_v53 = vadd.s32 1, %v565_v51  ;;  %v75_v1 = vadd.s32 %v564_v50, %v562_v49 }
  0x1b   :  { %v285_v39 = vsel %vm283_vm0, %v239_v30, 1.0 }
  0x1c   :  { %v78_v54 = vsel %vm76_vm5, %v77_v53, %v565_v51  ;;  %vm300_vm5 = vcmask 1045504  }
  0x1d   :  { %v79_v55 = vadd.s32 %v78_v54, %v74_v52 }
  0x1f   :  { %v80_v56 = vadd.s32 536870912, %v79_v55 }
  0x21   :  { %v81_v57 = vshrl.u32 %v80_v56, 30 }
  0x23   :  { %v82_v58 = vshll.u32 %v81_v57, 30  ;;  %v105_v15 = vsub.s32 4, %v81_v57 }
  0x25   :  { %v83_v59 = vsub.s32 %v79_v55, %v82_v58  ;;  %v106_v18 = vsel %vm21_vm7, %v105_v15, %v81_v57 }
  0x26   :  { %v108_v21 = vsel %vm20_vm8, 0, %v106_v18 }
  0x27   :  { %v85_v60 = vsub.s32 0, %v83_v59  ;;  %v112_v22 = vadd.s32 3, %v108_v21  ;;  %v216_v24 = vand.u32 3, %v108_v21 }
  0x29   :  { %v468_v61 = vmin.u32 %v85_v60, %v83_v59  ;;  %v113_v23 = vand.u32 3, %v112_v22  ;;  %vm221_vm10 = vcmp.eq.s32.totalorder %v216_v24, 2  ;;  %vm218_vm12 = vcmp.eq.s32.totalorder %v216_v24, 0 }
  0x2a   :  { %vm217_vm14 = vcmp.lt.s32.totalorder %v216_v24, 2 }
  0x2b   :  { %v87_v62 = vclz %v468_v61  ;;  %vm118_vm9 = vcmp.eq.s32.totalorder %v113_v23, 2  ;;  %vm115_vm11 = vcmp.eq.s32.totalorder %v113_v23, 0  ;;  %vm114_vm13 = vcmp.lt.s32.totalorder %v113_v23, 2 }
  0x2d   :  { %v469_v63 = vadd.s32 4294967294, %v87_v62 }
  0x2f   :  { %vm470_vm6 = vcmp.lt.s32.totalorder %v469_v63, 0 }
  0x30   :  { %v90_v2 = vsel %vm470_vm6, 0, %v469_v63  ;;  %vm303_vm6 = vcmask 1040384  }
  0x31   :  { %v91_v4 = vsub.s32 32, %v90_v2  ;;  %v92_v5 = vshll.u32 %v83_v59, %v90_v2  ;;  %v95_v7 = vsub.s32 4294967266, %v90_v2 }
  0x33   :  { %v93_v8 = vshrl.u32 %v75_v1, %v91_v4  ;;  %v96_v9 = vadd.s32 127, %v95_v7 }
  0x35   :  { %v94_v10 = vor.u32 %v93_v8, %v92_v5  ;;  %v97_v11 = vshll.u32 %v96_v9, 23 }
  0x37   :  { %v98_v12 = vor.u32 4788187, %v97_v11  ;;  %v101_v13 = vcvt.s32.f32 %v94_v10 }
  0x39   :  { %v99_v14 = vand.u32 2147483647, %v98_v12 }
  0x3b   :  { %v102_v16 = vmul.f32 %v101_v13, %v99_v14 }
  0x3d   :  { %v103_v17 = vxor.u32 2147483648, %v102_v16 }
  0x3f   :  { %v104_v19 = vsel %vm21_vm7, %v103_v17, %v102_v16  ;;  %vm523_vm7 = vmmov 1  }
  0x40   :  { %v107_v20 = vsel %vm20_vm8, %v552_v0, %v104_v19  ;;  %vm477_vm8 = vmpackc.low %vm286_vm1, %vm523_vm7 }
  0x41   :  { %504 = vcosq.f32 %v107_v20 }
  0x42   :  { %506 = vsinq.f32 %v107_v20 }
  0x4b   :  { %v505_v25 = vpop.eup %504 }
  0x4c   :  { %v507_v26 = vpop.eup %506  ;;  %v119_v27 = vxor.u32 2147483648, %v505_v25 }
  0x4d   :  { %v116_v3 = vxor.u32 2147483648, %v507_v26 }
  0x4e   :  { %v120_v28 = vsel %vm118_vm9, %v119_v27, %v507_v26  ;;  %v223_v29 = vsel %vm221_vm10, %v119_v27, %v507_v26  ;;  %v502_v27 = vld [vmem:[%s613_s1] sm:$0xff]   ;;  %vm326_vm9 = vcmask 261120  }
  0x4f   :  { %v117_v31 = vsel %vm115_vm11, %v505_v25, %v116_v3  ;;  %v220_v32 = vsel %vm218_vm12, %v505_v25, %v116_v3  ;;  %v503_v3 = vld [vmem:[%s613_s1 + $0x8] sm:$0xff]  }
  0x50   :  { %v121_v33 = vsel %vm114_vm13, %v117_v31, %v120_v28  ;;  %v224_v34 = vsel %vm217_vm14, %v220_v32, %v223_v29  ;;  %v399_v28 = vld [vmem:[%s614_s3] sm:$0xff] }
  0x51   :  { %v122_v35 = vsel %vm111_vm15, nan, %v121_v33  ;;  %v225_v36 = vsel %vm111_vm15, nan, %v224_v34  ;;  %402 = vperm.xlu0 %500, %v399_v28  }
  0x52   :  { %v226_v37 = vmul.f32 2.0, %v122_v35  ;;  %v245_v38 = vcombine.high %v225_v36, %v225_v36  ;;  %v242_v40 = vcombine.low %v122_v35, %v122_v35  ;;  %v288_v45 = vsel %vm286_vm1, %v285_v39, %v122_v35 }
  0x53   :  { %v246_v46 = vrot.slane %v225_v36, 1 }
  0x54   :  { %v227_v42 = vmul.f32 %v226_v37, %v225_v36  ;;  %v228_v43 = vmul.f32 %v226_v37, %v122_v35  ;;  %v247_v44 = vrot.slane %v245_v38, 1  ;;  %v287_v50 = vsel %vm286_vm1, %v284_v41, %v242_v40 }
  0x55   :  { %v290_v57 = vsel %vm289_vm2, %v287_v50, %v246_v46 }
  0x56   :  { %v229_v47 = vsub.f32 1.0, %v228_v43  ;;  %v230_v48 = vmul.f32 2.0, %v227_v42  ;;  %v251_v49 = vcombine.high %v227_v42, %v227_v42  ;;  %v252_v51 = vrot.slane %v227_v42, 6 }
  0x57   :  { %v291_v0 = vsel %vm289_vm2, %v288_v45, %v247_v44 }
  0x58   :  { %v231_v52 = vmul.f32 %v230_v48, %v229_v47  ;;  %v232_v53 = vmul.f32 %v230_v48, %v227_v42  ;;  %v253_v54 = vrot.slane %v251_v49, 6  ;;  %v257_v55 = vcombine.high %v229_v47, %v229_v47  ;;  %v398_v48 = vld [vmem:[%s615_s2] sm:$0xf] }
  0x59   :  { %v258_v56 = vrot.slane %v229_v47, 3  ;;  %v293_v58 = vsel %vm292_vm3, %v246_v46, %v252_v51 }
  0x5a   :  { %v233_v59 = vsub.f32 1.0, %v232_v53  ;;  %v259_v60 = vrot.slane %v257_v55, 3  ;;  %v294_v61 = vsel %vm292_vm3, %v247_v44, %v253_v54  ;;  %v234_v62 = vmul.f32 2.0, %v231_v52 }
  0x5b   :  { %v296_v63 = vsel %vm295_vm4, %v293_v58, %v258_v56  ;;  %v263_v8 = vcombine.high %v231_v52, %v231_v52 }
  0x5c   :  { %v297_v1 = vsel %vm295_vm4, %v294_v61, %v259_v60  ;;  %v308_v2 = vpack.c.bf16 %v296_v63, %v290_v57  ;;  %v235_v4 = vmul.f32 %v234_v62, %v233_v59  ;;  %v236_v5 = vmul.f32 %v234_v62, %v231_v52 }
  0x5d   :  { %v309_v7 = vpack.c.bf16 %v297_v1, %v291_v0  ;;  %v266_v9 = vcombine.high %v233_v59, %v233_v59  ;;  %v267_v10 = vrot.slane %v233_v59, 5 }
  0x5e   :  { %v237_v11 = vsub.f32 1.0, %v236_v5  ;;  %v272_v12 = vcombine.high %v235_v4, %v235_v4  ;;  %v273_v13 = vrot.slane %v235_v4, 2 }
  0x5f   :  { %333 = vmatprep.subr.bf16.mxu0 %v309_v7  ;;  %v268_v14 = vrot.slane %v266_v9, 5  ;;  %v298_v15 = vsel %vm283_vm0, %v231_v52, %v267_v10 }
  0x60   :  { %334 = vmatpush1.bf16.msra.mxu0 %v308_v2  ;;  %v274_v16 = vrot.slane %v272_v12, 2  ;;  %v278_v17 = vcombine.high %v237_v11, %v237_v11  ;;  %v279_v18 = vrot.slane %v237_v11, 7  ;;  %v301_v20 = vsel %vm300_vm5, %v298_v15, %v273_v13 }
  0x61   :  { %v299_v19 = vsel %vm283_vm0, %v263_v8, %v268_v14 }
  0x62   :  { %v280_v21 = vrot.slane %v278_v17, 7  ;;  %v302_v22 = vsel %vm300_vm5, %v299_v19, %v274_v16  ;;  %v304_v23 = vsel %vm303_vm6, %v273_v13, %v279_v18 }
  0x63   :  { %v481_v25 = vpack.c.bf16 %v304_v23, %v301_v20 }
  0x64   :  { %v305_v24 = vsel %vm303_vm6, %v274_v16, %v280_v21 }
  0x65   :  { %v478_v26 = vpack.c.bf16 %v305_v24, %v302_v22 }
  0x67   :  { %479 = vmatprep.subr.msk.bf16.mxu0 %vm477_vm8, %v478_v26 }
  0x68   :  { %482 = vmatpush1.bf16.msk.msra.mxu0 %vm477_vm8, %v481_v25 }
  0x6b   :  { %483 = vmatmul.mubr.msk.bf16.vlgmr.msra.gmra.mrb[0].mxu0 %vm326_vm9, %v502_v27 }
  0x6c   :  { %375 = vmatprep.mubr.bf16.mxu0 %v516_v6 }
  0x73   :  { %484 = vmatmul.mubr.msk.bf16.gmra.mrb[4].mxu0 %vm326_vm9, %v503_v3 }
  0xd0   :  { %v403_v49 = vpop.permute.xlu0 %402 }
 0x13e   :  { %v367_v29 = vpop.f32.mrb[0].mxu0 }
 0x13f   :  { %v369_v30 = vpop.f32.mrb[1].mxu0  ;;  %v386_v32 = vmax.f32 %v367_v29, 0.0 }
 0x140   :  { %v371_v31 = vpop.f32.mrb[2].mxu0  ;;  %v387_v35 = vmax.f32 %v369_v30, 0.0 }
 0x141   :  { %v388_v33 = vmax.f32 %v371_v31, 0.0  ;;  %v373_v34 = vpop.f32.mrb[3].mxu0 }
 0x142   :  { %v389_v36 = vmax.f32 %v373_v34, 0.0 }
 0x143   :  { %v394_v6 = vpack.c.bf16 %v388_v33, %v386_v32 }
 0x144   :  { %v395_v37 = vpack.c.bf16 %v389_v36, %v387_v35 }
 0x146   :  { %v377_v38 = vpop.f32.mrb[4].mxu0  ;;  %408 = vmatprep.subr.bf16.mxu1 %v395_v37 }
 0x147   :  { %v379_v39 = vpop.f32.mrb[5].mxu0  ;;  %409 = vmatpush1.bf16.msra.mxu1 %v394_v6  ;;  %v390_v41 = vmax.f32 %v377_v38, 0.0 }
 0x148   :  { %v381_v40 = vpop.f32.mrb[6].mxu0  ;;  %v391_v44 = vmax.f32 %v379_v39, 0.0 }
 0x149   :  { %v392_v42 = vmax.f32 %v381_v40, 0.0  ;;  %v383_v43 = vpop.f32.mrb[7].mxu0 }
 0x14a   :  { %v393_v45 = vmax.f32 %v383_v43, 0.0 }
 0x14b   :  { %v396_v46 = vpack.c.bf16 %v392_v42, %v390_v41 }
 0x14c   :  { %v397_v47 = vpack.c.bf16 %v393_v45, %v391_v44 }
 0x14e   :  { %410 = vmatprep.subr.bf16.mxu1 %v397_v47 }
 0x14f   :  { %411 = vmatpush1.bf16.msra.mxu1 %v396_v46 }
 0x152   :  { %485 = vmatmul.mubr.msk.bf16.vlgmr.msra.gmra.mrb[0].mxu1 %vm326_vm9, %v398_v48 }
 0x225   :  { %v442_v50 = vpop.f32.mrb[0].mxu1 }
 0x226   :  { %v443_v51 = vadd.f32 %v442_v50, %v403_v49  ;;  %v444_v52 = vpop.f32.mrb[1].mxu1 }
 0x227   :  { %v445_v53 = vadd.f32 %v444_v52, %v403_v49  ;;  %v446_v54 = vpop.f32.mrb[2].mxu1 }
 0x228   :  { %v486_v55 = vmul.f32 -1.442695, %v443_v51  ;;  %v447_v0 = vpop.f32.mrb[3].mxu1 }
 0x229   :  { %v487_v56 = vmul.f32 -1.442695, %v445_v53 }
 0x22a   :  { %508 = vpow2.f32 %v486_v55 }
 0x22b   :  { %510 = vpow2.f32 %v487_v56 }
 0x234   :  { %v509_v57 = vpop.eup %508 }
 0x235   :  { %v511_v58 = vpop.eup %510  ;;  %v455_v59 = vadd.f32 1.0, %v509_v57 }
 0x236   :  { %v456_v60 = vadd.f32 1.0, %v511_v58 }
 0x237   :  { %512 = vrcp.f32 %v455_v59 }
 0x238   :  { %514 = vrcp.f32 %v456_v60 }
 0x241   :  { %v513_v61 = vpop.eup %512 }
 0x242   :  { %v515_v62 = vpop.eup %514  ;;  %461 = vst [vmem:[%s616_s4] sm:$0xff] %v513_v61 }
 0x243   :  { %462 = vst [vmem:[%s616_s4 + $0x8] sm:$0xff] %v515_v62 }

// kernel: instant_ngp_forward.2
= control target key start
LH: loop header
LB: loop body
LE: loop exit
PB: predicated region body
PF: predicated region fallthrough
CT: control target
= control target key end

     0   :  { %s4737_s30 = smov 0   ;;  %s6332_s0 = inlined_call_operand.vmem [shape: f32[3,512], index: 0, kind: input, shape index: {}]   ;;  %s6333_s1 = inlined_call_operand.vmem [shape: f32[3,512], index: 1, kind: input, shape index: {}]   ;;  %s6334_s2 = inlined_call_operand.vmem [shape: f32[1,512], index: 2, kind: input, shape index: {}]   ;;  %s6335_s3 = inlined_call_operand.vmem [shape: f32[1,512], index: 3, kind: input, shape index: {}]   ;;  %s6336_s4 = inlined_call_operand.vmem [shape: bf16[64,48], index: 4, kind: input, shape index: {}]   ;;  %s6337_s5 = inlined_call_operand.vmem [shape: bf16[64,64], index: 5, kind: input, shape index: {}]   ;;  %s6338_s6 = inlined_call_operand.vmem [shape: f32[64,1], index: 6, kind: input, shape index: {}]   ;;  %s6339_s7 = inlined_call_operand.vmem [shape: bf16[8,64], index: 7, kind: input, shape index: {}]   ;;  %s6340_s8 = inlined_call_operand.vmem [shape: f32[8,1], index: 8, kind: input, shape index: {}]   ;;  %s6341_s9 = inlined_call_operand.vmem [shape: f32[8,512], index: 9, kind: output, shape index: {}]  }
   0x1 LB: > { %s4195_s10 = sadd.s32 4294967295, %s4639_s30   ;;  %p4199_p0 = scmp.ge.s32.totalorder %s4639_s30, 1  ;;  %s4639_s30 = sphi %s4737_s30, %s19_s30  }
   0x2   : > { %p319_p1 = scmp.lt.s32.totalorder %s4639_s30, 3 }
   0x4   : > { %p320_p2 = pnand %p4199_p0, %p319_p1 }
   0x6   : > { %323 = sbr.rel (%p320_p2) target bundleno = 1288 (0x508), region = 56 }
   0xd   : > { %v422_v0 = vld [vmem:[%s6338_s6 + $0x10] sm:$0xff]  ;;  %v420_v1 = vld [vmem:[%s6338_s6] sm:$0xff]  ;;  %v4677_v2 = vmov 0   ;;  %v423_v3 = vld [vmem:[%s6338_s6 + $0x18] sm:$0xff]  ;;  %s4200_s19 = sshll.u32 %s4195_s10, 1  ;;  %v481_v9 = vlaneseq  ;;  %v4916_v52 = vmov 0.0  }
   0xe   : > { %4482 = vset.pattern.permute.xlu1 %v4677_v2  ;;  %4481 = vset.pattern.permute.xlu0 %v4677_v2  ;;  %v421_v4 = vld [vmem:[%s6338_s6 + $0x8] sm:$0xff]  ;;  %v424_v6 = vld [vmem:[%s6338_s6 + $0x20] sm:$0xff]  ;;  %p369_p3 = scmp.lt.s32.totalorder %s4200_s19, 3  ;;  %v427_v7 = vld [vmem:[%s6338_s6 + $0x38] sm:$0xff]  ;;  %v4918_v53 = vmov 0.0   ;;  %v4920_v54 = vmov 0.0  }
   0xf   : > { %440 = vperm.xlu1 %4482, %v422_v0   ;;  %430 = vperm.xlu0 %4481, %v420_v1   ;;  %v425_v5 = vld [vmem:[%s6338_s6 + $0x28] sm:$0xff]  ;;  %v426_v8 = vld [vmem:[%s6338_s6 + $0x30] sm:$0xff]  ;;  %v482_v13 = vshrl.u32 %v481_v9, 7  ;;  %v468_v14 = vld [vmem:[%s6340_s8] sm:$0xff]  ;;  %v4922_v55 = vmov 0.0   ;;  %v4924_v56 = vmov 0.0  }
  0x10   : > { %s6568_s19 = smov (!%p369_p3, %s4200_s19), 3  ;;  %v4798_v20 = vld [vmem:[%s6336_s4] sm:$0xf]  ;;  %v4803_v21 = vld [vmem:[%s6336_s4 + $0x4] sm:$0xf]  ;;  %v4926_v57 = vmov 0.0  }
  0x11   : > { %s383_s10 = scalar_lea.vmem %s6334_s2, %s6568_s19  ;;  %s388_s13 = scalar_lea.vmem %s6335_s3, %s6568_s19  ;;  %v4784_v16 = vsub.s32 0, %v482_v13  ;;  %v487_v17 = vsub.s32 1, %v482_v13  ;;  %6392 = vst [vmem:[#allocation4_spill] sm:$0xff] %v4798_v20  ;;  %6393 = vst [vmem:[#allocation5_spill] sm:$0xff] %v4803_v21  ;;  %v4808_v22 = vld [vmem:[%s6336_s4 + $0x8] sm:$0xf] }
  0x12   : > { %v399_v10 = vld [vmem:[%s383_s10] sm:$0x3]  ;;  %s4201_s14 = sshll.u32 %s6568_s19, 2  ;;  %s4207_s24 = sshll.u32 %s6568_s19, 3  ;;  %6394 = vst [vmem:[#allocation6_spill] sm:$0xff] %v4808_v22  ;;  %v4928_v58 = vmov 1.0  }
  0x13   : > { %445 = vperm.xlu1 %4482, %v423_v3   ;;  %435 = vperm.xlu0 %4481, %v421_v4   ;;  %v400_v11 = vld [vmem:[%s388_s13] sm:$0x3]  ;;  %s372_s20 = scalar_lea.vmem %s6332_s0, %s4201_s14  ;;  %s378_s23 = scalar_lea.vmem %s6333_s1, %s4201_s14  ;;  %v4819_v25 = vrot.slane %v399_v10, %v4784_v16  ;;  %v4821_v26 = vrot.slane %v399_v10, %v487_v17  ;;  %v4826_v27 = vld [vmem:[%s6336_s4 + $0xc] sm:$0xf]  ;;  %v4831_v28 = vld [vmem:[%s6336_s4 + $0x10] sm:$0xf] }
  0x14   : > { %v401_v12 = vsub.f32 %v400_v11, %v399_v10  ;;  %v4786_v18 = vld [vmem:[%s372_s20] sm:$0x77]  ;;  %s4793_s27 = scalar_lea.vmem %s6341_s9, %s4207_s24  ;;  %6399 = vst [vmem:[#allocation11_spill] sm:$0xff] %v4826_v27  ;;  %6400 = vst [vmem:[#allocation12_spill] sm:$0xff] %v4831_v28  ;;  %v4836_v29 = vld [vmem:[%s6336_s4 + $0x14] sm:$0xf] }
  0x15   : > { %6390 = vst [vmem:[#allocation2_spill] sm:$0xff] %v4786_v18  ;;  %v4788_v19 = vld [vmem:[%s378_s23] sm:$0x77]  ;;  %v4812_v23 = vcombine.high %v4786_v18, %v4786_v18  ;;  %6397 = vst [vmem:[#allocation9_spill] sm:$0xff] %v4819_v25  ;;  %v4846_v32 = vld [vmem:[%s6336_s4 + $0x18] sm:$0xf] }
  0x16   : > { %v402_v15 = vmul.f32 0.015625, %v401_v12  ;;  %6391 = vst [vmem:[#allocation3_spill] sm:$0xff] %v4788_v19  ;;  %v4816_v24 = vcombine.high %v4788_v19, %v4788_v19  ;;  %6398 = vst [vmem:[#allocation10_spill] sm:$0xff] %v4821_v26  ;;  %v4851_v33 = vld [vmem:[%s6336_s4 + $0x1c] sm:$0xf]  ;;  %v4930_v59 = vmov 1.0  }
  0x17   : > { %455 = vperm.xlu1 %4482, %v425_v5   ;;  %450 = vperm.xlu0 %4481, %v424_v6   ;;  %6395 = vst [vmem:[#allocation7_spill] sm:$0xff] %v4812_v23  ;;  %6401 = vst [vmem:[#allocation13_spill] sm:$0xff] %v4846_v32  ;;  %v4856_v34 = vld [vmem:[%s6337_s5] sm:$0xf]  ;;  %v4861_v35 = vld [vmem:[%s6337_s5 + $0x4] sm:$0xf] }
  0x18   : > { %6396 = vst [vmem:[#allocation8_spill] sm:$0xff] %v4816_v24  ;;  %v4839_v30 = vrot.slane %v402_v15, %v4784_v16  ;;  %v4841_v31 = vrot.slane %v402_v15, %v487_v17  ;;  %6402 = vst [vmem:[#allocation14_spill] sm:$0xff] %v4851_v33  ;;  %v4866_v36 = vld [vmem:[%s6337_s5 + $0x8] sm:$0xf]  ;;  %v4871_v37 = vld [vmem:[%s6337_s5 + $0xc] sm:$0xf] }
  0x19   : > { %6403 = vst [vmem:[#allocation15_spill] sm:$0xff] %v4856_v34  ;;  %6404 = vst [vmem:[#allocation16_spill] sm:$0xff] %v4861_v35  ;;  %v4876_v38 = vld [vmem:[%s6337_s5 + $0x10] sm:$0xf]  ;;  %v4881_v39 = vld [vmem:[%s6337_s5 + $0x14] sm:$0xf] }
  0x1a   : > { %6405 = vst [vmem:[#allocation17_spill] sm:$0xff] %v4866_v36  ;;  %6406 = vst [vmem:[#allocation18_spill] sm:$0xff] %v4871_v37  ;;  %v4886_v40 = vld [vmem:[%s6337_s5 + $0x18] sm:$0xf]  ;;  %v4891_v41 = vld [vmem:[%s6337_s5 + $0x1c] sm:$0xf] }
  0x1b   : > { %465 = vperm.xlu1 %4482, %v427_v7   ;;  %460 = vperm.xlu0 %4481, %v426_v8   ;;  %6407 = vst [vmem:[#allocation19_spill] sm:$0xff] %v4876_v38  ;;  %6408 = vst [vmem:[#allocation20_spill] sm:$0xff] %v4881_v39  ;;  %v4896_v42 = vld [vmem:[%s6339_s7] sm:$0xf]  ;;  %s4932_s23 = smov 0  }
  0x1c   : > { %6409 = vst [vmem:[#allocation21_spill] sm:$0xff] %v4886_v40  ;;  %6410 = vst [vmem:[#allocation22_spill] sm:$0xff] %v4891_v41 }
  0x1d   : > { %6411 = vst [vmem:[#allocation23_spill] sm:$0xff] %v4896_v42 }
  0x1f   : > { %471 = vperm.xlu0 %4481, %v468_v14  }
  0x8e   : > { %v4898_v43 = vpop.permute.xlu1 %440  ;;  %v4900_v44 = vpop.permute.xlu0 %430 }
  0x8f   : > { %6412 = vst [vmem:[#allocation24_spill] sm:$0xff] %v4898_v43  ;;  %6413 = vst [vmem:[#allocation25_spill] sm:$0xff] %v4900_v44 }
  0x92   : > { %v4902_v45 = vpop.permute.xlu1 %445  ;;  %v4904_v46 = vpop.permute.xlu0 %435 }
  0x93   : > { %6414 = vst [vmem:[#allocation26_spill] sm:$0xff] %v4902_v45  ;;  %6415 = vst [vmem:[#allocation27_spill] sm:$0xff] %v4904_v46 }
  0x96   : > { %v4906_v47 = vpop.permute.xlu1 %455  ;;  %v4908_v48 = vpop.permute.xlu0 %450 }
  0x97   : > { %6416 = vst [vmem:[#allocation28_spill] sm:$0xff] %v4906_v47  ;;  %6417 = vst [vmem:[#allocation29_spill] sm:$0xff] %v4908_v48 }
  0x9a   : > { %v4910_v49 = vpop.permute.xlu1 %465  ;;  %v4912_v50 = vpop.permute.xlu0 %460 }
  0x9b   : > { %6418 = vst [vmem:[#allocation30_spill] sm:$0xff] %v4910_v49  ;;  %6419 = vst [vmem:[#allocation31_spill] sm:$0xff] %v4912_v50 }
  0x9e   : > { %v4914_v51 = vpop.permute.xlu0 %471 }
  0x9f   : > { %6420 = vst [vmem:[#allocation32_spill] sm:$0xff] %v4914_v51 }
  0xa0 LB: >> { %v6421_v23 = vld [vmem:[#allocation7_spill] sm:$0xff]  ;;  %v6423_v18 = vld [vmem:[#allocation2_spill] sm:$0xff]  ;;  %v6425_v25 = vld [vmem:[#allocation9_spill] sm:$0xff]  ;;  %6427 = vst [vmem:[#allocation33_spill] sm:$0xff] %v4643_v52  ;;  %s4208_s24 = sshll.u32 %s4675_s23, 2  ;;  %s507_s23 = sadd.s32 1, %s4675_s23   ;;  %v4663_v57 = vphi %v4926_v57, %v6564_v57   ;;  %v4659_v56 = vphi %v4924_v56, %v6563_v56   ;;  %v4655_v55 = vphi %v4922_v55, %v6562_v55   ;;  %v4651_v54 = vphi %v4920_v54, %v6561_v54   ;;  %v4647_v53 = vphi %v4918_v53, %v6560_v53   ;;  %v4643_v52 = vphi %v4916_v52, %v6559_v52   ;;  %s4675_s23 = sphi %s4932_s23, %s507_s23   ;;  %v4671_v59 = vphi %v4930_v59, %v4031_v59   ;;  %v4667_v58 = vphi %v4928_v58, %v4032_v58  }
  0xa1   : >> { %v6422_v19 = vld [vmem:[#allocation3_spill] sm:$0xff]  ;;  %v6424_v26 = vld [vmem:[#allocation10_spill] sm:$0xff]  ;;  %v6426_v24 = vld [vmem:[#allocation8_spill] sm:$0xff]  ;;  %6428 = vst [vmem:[#allocation34_spill] sm:$0xff] %v4647_v53  ;;  %s517_s25 = scvt.s32.f32 %s4208_s24  ;;  %v6368_v49 = vmov 1326507024  }
  0xa2   : >> { %6429 = vst [vmem:[#allocation35_spill] sm:$0xff] %v4651_v54  ;;  %6430 = vst [vmem:[#allocation36_spill] sm:$0xff] %v4655_v55  ;;  %v6440_v40 = vmov 2475754826   ;;  %v6472_v21 = vld [vmem:[#allocation5_spill] sm:$0xff]  ;;  %v6473_v20 = vld [vmem:[#allocation4_spill] sm:$0xff] }
  0xa3   : >> { %6431 = vst [vmem:[#allocation37_spill] sm:$0xff] %v4659_v56  ;;  %6432 = vst [vmem:[#allocation38_spill] sm:$0xff] %v4663_v57  ;;  %v4962_v60 = vstv %s517_s25  ;;  %v6477_v27 = vld [vmem:[#allocation11_spill] sm:$0xff]  ;;  %v6478_v22 = vld [vmem:[#allocation6_spill] sm:$0xff]  ;;  %p504_p4 = scmp.ge.s32.totalorder %s507_s23, 16  }
  0xa4   : >> { %6433 = vst [vmem:[#allocation39_spill] sm:$0xff] %v4667_v58  ;;  %6434 = vst [vmem:[#allocation40_spill] sm:$0xff] %v4671_v59  ;;  %v519_v61 = vadd.f32 0.5, %v4962_v60  ;;  %v520_v62 = vadd.f32 1.5, %v4962_v60 }
  0xa6   : >> { %v524_v63 = vmul.f32 %v519_v61, %v4841_v31  ;;  %v523_v0 = vmul.f32 %v519_v61, %v4839_v30  ;;  %v526_v1 = vmul.f32 %v520_v62, %v4841_v31  ;;  %v525_v8 = vmul.f32 %v520_v62, %v4839_v30 }
  0xa8   : >> { %v4970_v2 = vadd.f32 %v524_v63, %v6424_v26  ;;  %v4973_v3 = vadd.f32 %v523_v0, %v6425_v25  ;;  %v4976_v4 = vadd.f32 %v526_v1, %v6424_v26  ;;  %v4992_v15 = vadd.f32 %v525_v8, %v6425_v25 }
  0xa9   : >> { %v5001_v0 = vadd.f32 2.5, %v4962_v60 }
  0xaa   : >> { %6435 = vst [vmem:[#allocation41_spill] sm:$0xff] %v4970_v2  ;;  %6436 = vst [vmem:[#allocation42_spill] sm:$0xff] %v4973_v3  ;;  %v546_v5 = vrot.slane %v4970_v2, %v4784_v16  ;;  %v542_v6 = vrot.slane %v4973_v3, %v4784_v16  ;;  %v554_v7 = vrot.slane %v4976_v4, %v4784_v16  ;;  %v6360_v2 = vmov 2131351028  }
  0xab   : >> { %6437 = vst [vmem:[#allocation43_spill] sm:$0xff] %v4976_v4  ;;  %6438 = vst [vmem:[#allocation44_spill] sm:$0xff] %v4992_v15 }
  0xac   : >> { %v572_v9 = vmul.f32 %v546_v5, %v6426_v24  ;;  %v571_v10 = vmul.f32 %v542_v6, %v6422_v19  ;;  %v574_v11 = vmul.f32 %v554_v7, %v6426_v24  ;;  %v550_v7 = vrot.slane %v4992_v15, %v4784_v16 }
  0xae   : >> { %v580_v12 = vadd.f32 %v572_v9, %v6421_v23  ;;  %v579_v13 = vadd.f32 %v571_v10, %v6423_v18  ;;  %v582_v14 = vadd.f32 %v574_v11, %v6421_v23 }
  0xb0   : >> { %v4994_v17 = vclamps-f32 %v580_v12, 1.0  ;;  %v4996_v61 = vclamps-f32 %v579_v13, 1.0  ;;  %v5005_v6 = vclamps-f32 %v582_v14, 1.0  ;;  %v528_v13 = vmul.f32 %v5001_v0, %v4841_v31 }
  0xb1   : >> { %v573_v14 = vmul.f32 %v550_v7, %v6422_v19 }
  0xb2   : >> { %v6344_v62 = vand.u32 2147483647, %v4994_v17  ;;  %v710_v63 = vand.u32 2139095040, %v4994_v17  ;;  %v6345_v1 = vand.u32 2147483647, %v4996_v61  ;;  %v606_v5 = vand.u32 2139095040, %v4996_v61 }
  0xb3   : >> { %v918_v4 = vand.u32 2139095040, %v5005_v6  ;;  %vm709_vm13 = vcmp.lt.s32.totalorder %v4994_v17, 0 }
  0xb4   : >> { %v711_v8 = vshrl.u32 %v710_v63, 23  ;;  %v714_v9 = vand.u32 8388607, %v6344_v62  ;;  %v607_v10 = vshrl.u32 %v606_v5, 23  ;;  %v610_v11 = vand.u32 8388607, %v6345_v1 }
  0xb5   : >> { %v919_v55 = vshrl.u32 %v918_v4, 23  ;;  %v5018_v5 = vadd.f32 %v528_v13, %v6424_v26  ;;  %v5021_v1 = vadd.f32 %v573_v14, %v6423_v18  ;;  %v6370_v13 = vmov 683565275  }
  0xb6   : >> { %v4221_v12 = vadd.s32 4294967169, %v711_v8  ;;  %v4217_v52 = vadd.s32 4294967169, %v607_v10  ;;  %v715_v54 = vor.u32 8388608, %v714_v9  ;;  %v611_v15 = vor.u32 8388608, %v610_v11 }
  0xb7   : >> { %6439 = vst [vmem:[#allocation45_spill] sm:$0xff] %v5018_v5  ;;  %v4229_v8 = vadd.s32 4294967169, %v919_v55  ;;  %v6358_v55 = vmov 2475754826  }
  0xb8   : >> { %v717_v53 = vadd.s32 1, %v4221_v12  ;;  %v613_v63 = vadd.s32 1, %v4217_v52  ;;  %v5024_v12 = vshll.u32 %v715_v54, 8  ;;  %v5028_v4 = vshll.u32 %v611_v15, 8 }
  0xb9   : >> { %v6365_v54 = vmov 920167782  }
  0xba   : >> { %vm718_vm0 = vcmp.gt.s32.totalorder %v717_v53, 0  ;;  %vm614_vm1 = vcmp.gt.s32.totalorder %v613_v63, 0 }
  0xbb   : >> { %v719_v62 = vsel %vm718_vm0, %v717_v53, 0  ;;  %v615_v57 = vsel %vm614_vm1, %v613_v63, 0  ;;  %v6363_v63 = vmov 2102212464   ;;  %vm605_vm0 = vcmp.lt.s32.totalorder %v4996_v61, 0 }
  0xbc   : >> { %v720_v10 = vshrl.u32 %v719_v62, 5  ;;  %v721_v56 = vand.u32 31, %v719_v62  ;;  %v5026_v9 = vshrl.u32 %v615_v57, 5  ;;  %v617_v52 = vand.u32 31, %v615_v57 }
  0xbd   : >> { %v5035_v57 = vadd.s32 1, %v4229_v8 }
  0xbe   : >> { %v722_v11 = vsub.s32 32, %v721_v56  ;;  %v724_v53 = vshll.u32 %v6370_v13, %v721_v56  ;;  %v727_v14 = vshll.u32 %v6358_v55, %v721_v56  ;;  %v730_v62 = vshll.u32 %v6360_v2, %v721_v56 }
  0xbf   : >> { %v733_v7 = vshll.u32 %v6363_v63, %v721_v56  ;;  %v736_v3 = vshll.u32 %v6365_v54, %v721_v56  ;;  %vm739_vm2 = vcmp.lt.s32.totalorder %v720_v10, 1  ;;  %vm740_vm3 = vcmp.lt.s32.totalorder %v720_v10, 2 }
  0xc0   : >> { %v723_v15 = vshrl.u32 %v6370_v13, %v722_v11  ;;  %v725_v58 = vshrl.u32 %v6358_v55, %v722_v11  ;;  %v728_v59 = vshrl.u32 %v6360_v2, %v722_v11  ;;  %v731_v51 = vshrl.u32 %v6363_v63, %v722_v11 }
  0xc1   : >> { %v734_v42 = vshrl.u32 %v6365_v54, %v722_v11  ;;  %v737_v50 = vshrl.u32 %v6368_v49, %v722_v11  ;;  %vm742_vm4 = vcmp.lt.s32.totalorder %v720_v10, 4  ;;  %v618_v8 = vsub.s32 32, %v617_v52 }
  0xc2   : >> { %v726_v47 = vor.u32 %v725_v58, %v724_v53  ;;  %v729_v56 = vor.u32 %v728_v59, %v727_v14  ;;  %v732_v48 = vor.u32 %v731_v51, %v730_v62  ;;  %vm741_vm5 = vcmp.lt.s32.totalorder %v720_v10, 3 }
  0xc3   : >> { %v735_v45 = vor.u32 %v734_v42, %v733_v7  ;;  %v738_v43 = vor.u32 %v737_v50, %v736_v3  ;;  %v620_v55 = vshll.u32 %v6370_v13, %v617_v52  ;;  %v623_v58 = vshll.u32 %v6440_v40, %v617_v52 }
  0xc4   : >> { %v743_v2 = vsel %vm739_vm2, %v723_v15, %v726_v47  ;;  %v744_v46 = vsel %vm742_vm4, %v732_v48, 2102212464  ;;  %v747_v63 = vsel %vm739_vm2, %v726_v47, %v729_v56  ;;  %v751_v54 = vsel %vm739_vm2, %v729_v56, %v732_v48 }
  0xc5   : >> { %v745_v44 = vsel %vm741_vm5, %v729_v56, %v744_v46  ;;  %v748_v11 = vsel %vm742_vm4, %v735_v45, 920167782  ;;  %v752_v49 = vsel %vm742_vm4, %v738_v43, 1326507024  ;;  %v619_v42 = vshrl.u32 %v6370_v13, %v618_v8 }
  0xc6   : >> { %v749_v59 = vsel %vm741_vm5, %v732_v48, %v748_v11  ;;  %v753_v51 = vsel %vm741_vm5, %v735_v45, %v752_v49  ;;  %v621_v50 = vshrl.u32 %v6440_v40, %v618_v8  ;;  %v746_v3 = vsel %vm740_vm3, %v743_v2, %v745_v44 }
  0xc7   : >> { %v750_v7 = vsel %vm740_vm3, %v747_v63, %v749_v59  ;;  %v754_v53 = vsel %vm740_vm3, %v751_v54, %v753_v51  ;;  %v6441_v47 = vmov 2131351028   ;;  %v6442_v44 = vmov 2102212464  }
  0xc8   : >> { %v624_v14 = vshrl.u32 %v6441_v47, %v618_v8  ;;  %v5055_v46 = vmul.u32.u64.low %v5024_v12, %v754_v53  ;;  %v5056_v62 = vmul.u32.u64.high %v5024_v12, %v754_v53, %v5055_v46  ;;  %v622_v45 = vor.u32 %v621_v50, %v620_v55 }
  0xc9   : >> { %v5059_v43 = vmul.u32.u64.low %v5024_v12, %v750_v7  ;;  %v5060_v48 = vmul.u32.u64.high %v5024_v12, %v750_v7, %v5059_v43  ;;  %v626_v15 = vshll.u32 %v6441_v47, %v617_v52  ;;  %v627_v2 = vshrl.u32 %v6442_v44, %v618_v8 }
  0xca   : >> { %v625_v49 = vor.u32 %v624_v14, %v623_v58  ;;  %v629_v10 = vshll.u32 %v6442_v44, %v617_v52  ;;  %v6443_v63 = vmov 920167782   ;;  %v6444_v11 = vmov 1326507024  }
  0xcb   : >> { %v630_v54 = vshrl.u32 %v6443_v63, %v618_v8  ;;  %v632_v56 = vshll.u32 %v6443_v63, %v617_v52  ;;  %v633_v59 = vshrl.u32 %v6444_v11, %v618_v8  ;;  %v762_v51 = vmul.u32 %v5024_v12, %v746_v3 }
  0xcc   : >> { %v628_v53 = vor.u32 %v627_v2, %v626_v15  ;;  %vm635_vm6 = vcmp.lt.s32.totalorder %v5026_v9, 1  ;;  %vm636_vm7 = vcmp.lt.s32.totalorder %v5026_v9, 2  ;;  %vm764_vm8 = vc.u32 %v5056_v62, %v5059_v43 }
  0xcd   : >> { %v765_v55 = vadd.s32 1, %v5060_v48  ;;  %v631_v58 = vor.u32 %v630_v54, %v629_v10  ;;  %vm637_vm9 = vcmp.lt.s32.totalorder %v5026_v9, 3  ;;  %v634_v50 = vor.u32 %v633_v59, %v632_v56 }
  0xce   : >> { %vm638_vm10 = vcmp.lt.s32.totalorder %v5026_v9, 4  ;;  %v639_v52 = vsel %vm635_vm6, %v619_v42, %v622_v45  ;;  %v643_v8 = vsel %vm635_vm6, %v622_v45, %v625_v49  ;;  %v647_v14 = vsel %vm635_vm6, %v625_v49, %v628_v53 }
  0xcf   : >> { %v766_v12 = vsel %vm764_vm8, %v765_v55, %v5060_v48  ;;  %v640_v3 = vsel %vm638_vm10, %v628_v53, 2102212464  ;;  %v644_v7 = vsel %vm638_vm10, %v631_v58, 920167782  ;;  %v648_v13 = vsel %vm638_vm10, %v634_v50, 1326507024 }
  0xd0   : >> { %v767_v46 = vadd.s32 %v766_v12, %v762_v51  ;;  %v641_v15 = vsel %vm637_vm9, %v625_v49, %v640_v3  ;;  %v645_v2 = vsel %vm637_vm9, %v628_v53, %v644_v7  ;;  %v649_v54 = vsel %vm637_vm9, %v631_v58, %v648_v13 }
  0xd1   : >> { %v642_v41 = vsel %vm636_vm7, %v639_v52, %v641_v15  ;;  %v646_v10 = vsel %vm636_vm7, %v643_v8, %v645_v2  ;;  %vm926_vm11 = vcmp.gt.s32.totalorder %v5035_v57, 0  ;;  %v650_v48 = vsel %vm636_vm7, %v647_v14, %v649_v54 }
  0xd2   : >> { %v768_v42 = vadd.s32 536870912, %v767_v46  ;;  %v5086_v45 = vmul.u32.u64.low %v5028_v4, %v646_v10  ;;  %v5087_v56 = vmul.u32.u64.high %v5028_v4, %v646_v10, %v5086_v45  ;;  %v562_v51 = vrot.slane %v5018_v5, %v4784_v16 }
  0xd3   : >> { %v5090_v49 = vmul.u32.u64.low %v5028_v4, %v650_v48  ;;  %v5091_v59 = vmul.u32.u64.high %v5028_v4, %v650_v48, %v5090_v49  ;;  %v927_v13 = vsel %vm926_vm11, %v5035_v57, 0  ;;  %v658_v55 = vmul.u32 %v5028_v4, %v642_v41 }
  0xd4   : >> { %v769_v53 = vshrl.u32 %v768_v42, 30  ;;  %v6445_v58 = vand.u32 2147483647, %v5005_v6  ;;  %v661_v52 = vadd.s32 1, %v5087_v56  ;;  %v5101_v8 = vclamps-f32 %v5021_v1, 1.0 }
  0xd5   : >> { %v527_v12 = vmul.f32 %v5001_v0, %v4839_v30  ;;  %vm660_vm12 = vc.u32 %v5091_v59, %v5086_v45  ;;  %v929_v3 = vand.u32 31, %v927_v13  ;;  %v576_v7 = vmul.f32 %v562_v51, %v6426_v24 }
  0xd6   : >> { %v922_v9 = vand.u32 8388607, %v6445_v58  ;;  %v770_v50 = vshll.u32 %v769_v53, 30  ;;  %v793_v14 = vsub.s32 4, %v769_v53  ;;  %v662_v41 = vsel %vm660_vm12, %v661_v52, %v5087_v56 }
  0xd7   : >> { %v663_v4 = vadd.s32 %v662_v41, %v658_v55  ;;  %v814_v10 = vand.u32 2139095040, %v5101_v8  ;;  %v5110_v1 = vadd.f32 %v527_v12, %v6425_v25  ;;  %v930_v54 = vsub.s32 32, %v929_v3 }
  0xd8   : >> { %v771_v57 = vsub.s32 %v767_v46, %v770_v50  ;;  %v923_v15 = vor.u32 8388608, %v922_v9  ;;  %v5114_v42 = vadd.f32 %v576_v7, %v6421_v23  ;;  %v6446_v46 = vand.u32 2147483647, %v4994_v17 }
  0xd9   : >> { %v664_v0 = vadd.s32 536870912, %v663_v4  ;;  %v794_v49 = vsel %vm709_vm13, %v793_v14, %v769_v53  ;;  %v763_v55 = vadd.s32 %v5059_v43, %v5056_v62  ;;  %v5127_v9 = vshrl.u32 %v927_v13, 5 }
  0xda   : >> { %v773_v2 = vsub.s32 0, %v771_v57  ;;  %vm5118_vm14 = vcmp.le.f32.partialorder %v6446_v46, 0.7853982  ;;  %v5129_v50 = vshll.u32 %v923_v15, 8  ;;  %v6449_v12 = vmov 683565275  }
  0xdb   : >> { %v665_v58 = vshrl.u32 %v664_v0, 30  ;;  %v932_v7 = vshll.u32 %v6449_v12, %v929_v3  ;;  %v935_v41 = vshll.u32 %v6440_v40, %v929_v3  ;;  %v815_v46 = vshrl.u32 %v814_v10, 23 }
  0xdc   : >> { %v4222_v56 = vmin.u32 %v773_v2, %v771_v57  ;;  %v5135_v2 = vsel %vm5118_vm14, 0, %v794_v49  ;;  %v933_v14 = vshrl.u32 %v6440_v40, %v930_v54  ;;  %v936_v62 = vshrl.u32 %v6441_v47, %v930_v54 }
  0xdd   : >> { %v666_v53 = vshll.u32 %v665_v58, 30  ;;  %v659_v13 = vadd.s32 %v5086_v45, %v5091_v59  ;;  %v938_v15 = vshll.u32 %v6441_v47, %v929_v3  ;;  %v939_v0 = vshrl.u32 %v6442_v44, %v930_v54 }
  0xde   : >> { %v775_v52 = vclz %v4222_v56  ;;  %v931_v10 = vshrl.u32 %v6449_v12, %v930_v54  ;;  %v941_v51 = vshll.u32 %v6442_v44, %v929_v3  ;;  %v942_v49 = vshrl.u32 %v6443_v63, %v930_v54 }
  0xdf   : >> { %v5142_v56 = vsub.s32 %v663_v4, %v666_v53  ;;  %v5148_v5 = vadd.s32 3, %v5135_v2  ;;  %v944_v45 = vshll.u32 %v6443_v63, %v929_v3  ;;  %v945_v59 = vshrl.u32 %v6444_v11, %v930_v54 }
  0xe0   : >> { %v4223_v43 = vadd.s32 4294967294, %v775_v52  ;;  %v934_v53 = vor.u32 %v933_v14, %v932_v7  ;;  %v937_v38 = vor.u32 %v936_v62, %v935_v41  ;;  %v940_v34 = vor.u32 %v939_v0, %v938_v15 }
  0xe1   : >> { %v669_v4 = vsub.s32 0, %v5142_v56  ;;  %v943_v32 = vor.u32 %v942_v49, %v941_v51  ;;  %vm947_vm1 = vcmp.lt.s32.totalorder %v5127_v9, 1  ;;  %vm950_vm2 = vcmp.lt.s32.totalorder %v5127_v9, 4 }
  0xe2   : >> { %vm4224_vm15 = vcmp.lt.s32.totalorder %v4223_v43, 0  ;;  %v946_v28 = vor.u32 %v945_v59, %v944_v45  ;;  %v952_v54 = vsel %vm950_vm2, %v940_v34, 2102212464  ;;  %v689_v7 = vsub.s32 4, %v665_v58 }
  0xe3   : >> { %v778_v52 = vsel %vm4224_vm15, 0, %v4223_v43  ;;  %v4218_v35 = vmin.u32 %v669_v4, %v5142_v56  ;;  %vm948_vm3 = vcmp.lt.s32.totalorder %v5127_v9, 2  ;;  %vm949_vm4 = vcmp.lt.s32.totalorder %v5127_v9, 3 }
  0xe4   : >> { %v779_v39 = vsub.s32 32, %v778_v52  ;;  %v780_v36 = vshll.u32 %v771_v57, %v778_v52  ;;  %v783_v37 = vsub.s32 4294967266, %v778_v52  ;;  %v6450_v51 = vand.u32 2147483647, %v4996_v61 }
  0xe5   : >> { %v671_v43 = vclz %v4218_v35  ;;  %vm6373_vm6 = vcmask 1042432   ;;  %v690_v49 = vsel %vm605_vm0, %v689_v7, %v665_v58 }
  0xe6   : >> { %v781_v33 = vshrl.u32 %v763_v55, %v779_v39  ;;  %v784_v3 = vadd.s32 127, %v783_v37  ;;  %vm5163_vm5 = vcmp.le.f32.partialorder %v6450_v51, 0.7853982  ;;  %v951_v37 = vsel %vm947_vm1, %v931_v10, %v934_v53 }
  0xe7   : >> { %v955_v39 = vsel %vm947_vm1, %v934_v53, %v937_v38  ;;  %v4219_v35 = vadd.s32 4294967294, %v671_v43  ;;  %v953_v55 = vsel %vm949_vm4, %v937_v38, %v952_v54  ;;  %v960_v10 = vsel %vm950_vm2, %v946_v28, 1326507024 }
  0xe8   : >> { %v782_v57 = vor.u32 %v781_v33, %v780_v36  ;;  %v785_v41 = vshll.u32 %v784_v3, 23  ;;  %v956_v33 = vsel %vm950_vm2, %v943_v32, 920167782  ;;  %v959_v36 = vsel %vm947_vm1, %v937_v38, %v940_v34 }
  0xe9   : >> { %v957_v0 = vsel %vm949_vm4, %v940_v34, %v956_v33  ;;  %vm4220_vm7 = vcmp.lt.s32.totalorder %v4219_v35, 0  ;;  %v961_v59 = vsel %vm949_vm4, %v943_v32, %v960_v10  ;;  %v4225_v53 = vadd.s32 4294967169, %v815_v46 }
  0xea   : >> { %v786_v62 = vor.u32 4788187, %v785_v41  ;;  %v789_v15 = vcvt.s32.f32 %v782_v57  ;;  %v958_v45 = vsel %vm948_vm3, %v955_v39, %v957_v0  ;;  %v674_v52 = vsel %vm4220_vm7, 0, %v4219_v35 }
  0xeb   : >> { %v962_v4 = vsel %vm948_vm3, %v959_v36, %v961_v59  ;;  %v675_v34 = vsub.s32 32, %v674_v52  ;;  %v676_v3 = vshll.u32 %v5142_v56, %v674_v52  ;;  %v679_v28 = vsub.s32 4294967266, %v674_v52 }
  0xec   : >> { %v787_v38 = vand.u32 2147483647, %v786_v62  ;;  %v954_v54 = vsel %vm948_vm3, %v951_v37, %v953_v55  ;;  %v5193_v43 = vmul.u32.u64.low %v5129_v50, %v962_v4  ;;  %v5194_v7 = vmul.u32.u64.high %v5129_v50, %v962_v4, %v5193_v43 }
  0xed   : >> { %v821_v57 = vadd.s32 1, %v4225_v53  ;;  %v677_v32 = vshrl.u32 %v659_v13, %v675_v34  ;;  %v680_v41 = vadd.s32 127, %v679_v28  ;;  %v5201_v35 = vand.u32 3, %v5135_v2 }
  0xee   : >> { %v790_v58 = vmul.f32 %v789_v15, %v787_v38  ;;  %v5197_v51 = vmul.u32.u64.low %v5129_v50, %v958_v45  ;;  %v5198_v39 = vmul.u32.u64.high %v5129_v50, %v958_v45, %v5197_v51  ;;  %v6453_v56 = vand.u32 2147483647, %v5101_v8 }
  0xef   : >> { %vm822_vm8 = vcmp.gt.s32.totalorder %v821_v57, 0  ;;  %v678_v37 = vor.u32 %v677_v32, %v676_v3  ;;  %v681_v55 = vshll.u32 %v680_v41, 23  ;;  %v692_v33 = vsel %vm5163_vm5, 0, %v690_v49 }
  0xf0   : >> { %v791_v46 = vxor.u32 2147483648, %v790_v58  ;;  %v818_v9 = vand.u32 8388607, %v6453_v56  ;;  %v823_v36 = vsel %vm822_vm8, %v821_v57, 0  ;;  %v5210_v62 = vand.u32 3, %v5148_v5 }
  0xf1   : >> { %v970_v15 = vmul.u32 %v5129_v50, %v954_v54  ;;  %vm972_vm9 = vc.u32 %v5194_v7, %v5197_v51  ;;  %v682_v0 = vor.u32 4788187, %v681_v55  ;;  %v685_v10 = vcvt.s32.f32 %v678_v37 }
  0xf2   : >> { %v792_v13 = vsel %vm709_vm13, %v791_v46, %v790_v58  ;;  %v973_v45 = vadd.s32 1, %v5198_v39  ;;  %v696_v49 = vadd.s32 3, %v692_v33  ;;  %v819_v59 = vor.u32 8388608, %v818_v9 }
  0xf3   : >> { %v795_v2 = vsel %vm5118_vm14, %v4994_v17, %v792_v13  ;;  %v825_v38 = vand.u32 31, %v823_v36  ;;  %v5220_v5 = vsel %vm6373_vm6, %v4994_v17, 1.0  ;;  %v683_v50 = vand.u32 2147483647, %v682_v0 }
  0xf4   : >> { %4485 = vcosq.f32 %v795_v2  ;;  %v974_v52 = vsel %vm972_vm9, %v973_v45, %v5198_v39  ;;  %vm1636_vm10 = vcmp.eq.s32.totalorder %v5201_v35, 2  ;;  %v5226_v48 = vsel %vm6373_vm6, %v4996_v61, 1.0 }
  0xf5   : >> { %4487 = vsinq.f32 %v795_v2  ;;  %v975_v4 = vadd.s32 %v974_v52, %v970_v15  ;;  %v826_v53 = vsub.s32 32, %v825_v38  ;;  %vm803_vm11 = vcmp.eq.s32.totalorder %v5210_v62, 0 }
  0xf6   : >> { %vm806_vm12 = vcmp.eq.s32.totalorder %v5210_v62, 2  ;;  %vm1633_vm13 = vcmp.eq.s32.totalorder %v5201_v35, 0  ;;  %v686_v34 = vmul.f32 %v685_v10, %v683_v50  ;;  %v5231_v3 = vand.u32 3, %v692_v33 }
  0xf7   : >> { %vm802_vm14 = vcmp.lt.s32.totalorder %v5210_v62, 2  ;;  %vm1632_vm15 = vcmp.lt.s32.totalorder %v5201_v35, 2  ;;  %v5235_v28 = vand.u32 3, %v696_v49  ;;  %v976_v54 = vadd.s32 536870912, %v975_v4 }
  0xf8   : >> { %v5237_v58 = vshrl.u32 %v823_v36, 5  ;;  %v5239_v43 = vshll.u32 %v819_v59, 8  ;;  %vm799_vm1 = vweird.f32 %v4994_v17  ;;  %v687_v57 = vxor.u32 2147483648, %v686_v34 }
  0xf9   : >> { %v5243_v32 = vadd.s32 %v5197_v51, %v5194_v7  ;;  %v828_v41 = vshll.u32 %v6449_v12, %v825_v38  ;;  %v834_v39 = vshll.u32 %v6441_v47, %v825_v38  ;;  %v977_v46 = vshrl.u32 %v976_v54, 30 }
  0xfa   : >> { %v835_v56 = vshrl.u32 %v6442_v44, %v826_v53  ;;  %v837_v9 = vshll.u32 %v6442_v44, %v825_v38  ;;  %v838_v37 = vshrl.u32 %v6443_v63, %v826_v53  ;;  %v688_v55 = vsel %vm605_vm0, %v687_v57, %v686_v34 }
  0xfb   : >> { %vm917_vm2 = vcmp.lt.s32.totalorder %v5005_v6, 0  ;;  %v829_v33 = vshrl.u32 %v6440_v40, %v826_v53  ;;  %v831_v7 = vshll.u32 %v6440_v40, %v825_v38  ;;  %v832_v51 = vshrl.u32 %v6441_v47, %v826_v53 }
  0xfc   : >> { %vm2612_vm3 = vcmask 1043456   ;;  %v691_v36 = vsel %vm5163_vm5, %v4996_v61, %v688_v55  ;;  %v978_v13 = vshll.u32 %v977_v46, 30  ;;  %vm843_vm4 = vcmp.lt.s32.totalorder %v5237_v58, 1 }
  0xfd   : >> { %vm845_vm7 = vcmp.lt.s32.totalorder %v5237_v58, 3  ;;  %4489 = vcosq.f32 %v691_v36  ;;  %v827_v15 = vshrl.u32 %v6449_v12, %v826_v53  ;;  %v840_v2 = vshll.u32 %v6443_v63, %v825_v38 }
  0xfe   : >> { %v841_v0 = vshrl.u32 %v6444_v11, %v826_v53  ;;  %vm844_vm0 = vcmp.lt.s32.totalorder %v5237_v58, 2  ;;  %v4486_v10 = vpop.eup %4485  ;;  %4491 = vsinq.f32 %v691_v36  ;;  %v5265_v45 = vsub.s32 %v975_v4, %v978_v13 }
  0xff   : >> { %v836_v14 = vor.u32 %v835_v56, %v834_v39  ;;  %v839_v49 = vor.u32 %v838_v37, %v837_v9  ;;  %v4488_v59 = vpop.eup %4487  ;;  %v807_v50 = vxor.u32 2147483648, %v4486_v10  ;;  %v830_v52 = vor.u32 %v829_v33, %v828_v41 }
 0x100   : >> { %v833_v34 = vor.u32 %v832_v51, %v831_v7  ;;  %vm846_vm6 = vcmp.lt.s32.totalorder %v5237_v58, 4  ;;  %v804_v38 = vxor.u32 2147483648, %v4488_v59  ;;  %v981_v53 = vsub.s32 0, %v5265_v45 }
 0x101   : >> { %v1001_v54 = vsub.s32 4, %v977_v46  ;;  %v848_v4 = vsel %vm846_vm6, %v836_v14, 2102212464  ;;  %v808_v57 = vsel %vm806_vm12, %v807_v50, %v4488_v59  ;;  %v1638_v39 = vsel %vm1636_vm10, %v807_v50, %v4488_v59 }
 0x102   : >> { %vm699_vm9 = vcmp.eq.s32.totalorder %v5235_v28, 0  ;;  %vm1530_vm5 = vcmp.eq.s32.totalorder %v5231_v3, 0  ;;  %v842_v41 = vor.u32 %v841_v0, %v840_v2  ;;  %v847_v56 = vsel %vm843_vm4, %v827_v15, %v830_v52 }
 0x103   : >> { %v805_v9 = vsel %vm803_vm11, %v4486_v10, %v804_v38  ;;  %v1635_v37 = vsel %vm1633_vm13, %v4486_v10, %v804_v38  ;;  %vm2639_vm8 = vcmask 1044480   ;;  %vm698_vm12 = vcmp.lt.s32.totalorder %v5235_v28, 2 }
 0x104   : >> { %v4230_v55 = vmin.u32 %v981_v53, %v5265_v45  ;;  %v852_v33 = vsel %vm846_vm6, %v839_v49, 920167782  ;;  %v809_v7 = vsel %vm802_vm14, %v805_v9, %v808_v57  ;;  %v1639_v51 = vsel %vm1632_vm15, %v1635_v37, %v1638_v39 }
 0x105   : >> { %vm695_vm10 = vweird.f32 %v4996_v61  ;;  %vm1529_vm11 = vcmp.lt.s32.totalorder %v5231_v3, 2  ;;  %v849_v36 = vsel %vm845_vm7, %v833_v34, %v848_v4  ;;  %v851_v13 = vsel %vm843_vm4, %v830_v52, %v833_v34 }
 0x106   : >> { %v810_v15 = vsel %vm799_vm1, nan, %v809_v7  ;;  %v1640_v62 = vsel %vm799_vm1, nan, %v1639_v51  ;;  %v983_v2 = vclz %v4230_v55  ;;  %v5305_v35 = vsel %vm917_vm2, %v1001_v54, %v977_v46 }
 0x107   : >> { %v2260_v0 = vmul.f32 2.0, %v810_v15  ;;  %v2396_v10 = vrot.slane %v810_v15, 4  ;;  %v2420_v59 = vrot.slane %v1640_v62, 1  ;;  %v853_v50 = vsel %vm845_vm7, %v836_v14, %v852_v33  ;;  %v4490_v57 = vpop.eup %4489 }
 0x108   : >> { %v4231_v38 = vadd.s32 4294967294, %v983_v2  ;;  %v5311_v52 = vsel %vm844_vm0, %v847_v56, %v849_v36  ;;  %v855_v53 = vsel %vm843_vm4, %v833_v34, %v836_v14  ;;  %v856_v4 = vsel %vm846_vm6, %v842_v41, 1326507024  ;;  %v4492_v37 = vpop.eup %4491 }
 0x109   : >> { %v2268_v46 = vmul.f32 %v2260_v0, %v1640_v62  ;;  %v2276_v54 = vmul.f32 %v2260_v0, %v810_v15  ;;  %v2614_v39 = vsel %vm2612_vm3, %v5220_v5, %v2396_v10  ;;  %v857_v9 = vsel %vm845_vm7, %v839_v49, %v856_v4 }
 0x10a   : >> { %vm6454_vm13 = vcmask 1046528   ;;  %v703_v56 = vxor.u32 2147483648, %v4490_v57  ;;  %vm4232_vm14 = vcmp.lt.s32.totalorder %v4231_v38, 0  ;;  %v5324_v14 = vsel %vm844_vm0, %v851_v13, %v853_v50 }
 0x10b   : >> { %v2623_v55 = vsel %vm6454_vm13, %v2614_v39, %v2420_v59  ;;  %v2284_v34 = vsub.f32 1.0, %v2276_v54  ;;  %v2292_v41 = vmul.f32 2.0, %v2268_v46  ;;  %v2444_v33 = vrot.slane %v2268_v46, 6  ;;  %vm6458_vm7 = vmmov %vm6454_vm13 }
 0x10c   : >> { %v700_v7 = vxor.u32 2147483648, %v4492_v37  ;;  %vm6455_vm6 = vcmp.eq.s32.totalorder %v5235_v28, 2  ;;  %vm6456_vm15 = vcmp.eq.s32.totalorder %v5231_v3, 2  ;;  %v986_v49 = vsel %vm4232_vm14, 0, %v4231_v38  ;;  %vm6464_vm13 = vmmov %vm6458_vm7 }
 0x10d   : >> { %v704_v51 = vsel %vm6455_vm6, %v703_v56, %v4492_v37  ;;  %v1535_v5 = vsel %vm6456_vm15, %v703_v56, %v4492_v37  ;;  %v858_v36 = vsel %vm844_vm0, %v855_v53, %v857_v9  ;;  %v2300_v15 = vmul.f32 %v2292_v41, %v2284_v34 }
 0x10e   : >> { %v2308_v62 = vmul.f32 %v2292_v41, %v2268_v46  ;;  %v2468_v2 = vrot.slane %v2284_v34, 3  ;;  %vm6457_vm1 = vcmask 1041408   ;;  %v701_v0 = vsel %vm699_vm9, %v4490_v57, %v700_v7 }
 0x10f   : >> { %v2632_v13 = vsel %vm6457_vm1, %v2420_v59, %v2444_v33  ;;  %v1532_v10 = vsel %vm1530_vm5, %v4490_v57, %v700_v7  ;;  %v987_v50 = vsub.s32 32, %v986_v49  ;;  %v988_v4 = vshll.u32 %v5265_v45, %v986_v49  ;;  %vm6459_vm0 = vmmov %vm6457_vm1 }
 0x110   : >> { %v2316_v54 = vsub.f32 1.0, %v2308_v62  ;;  %v2324_v39 = vmul.f32 2.0, %v2300_v15  ;;  %v2641_v38 = vsel %vm2639_vm8, %v2632_v13, %v2468_v2  ;;  %v705_v58 = vsel %vm698_vm12, %v701_v0, %v704_v51  ;;  %vm6465_vm15 = vmmov %vm6459_vm0 }
 0x111   : >> { %v2699_v53 = vpack.c.bf16 %v2641_v38, %v2623_v55  ;;  %v706_v59 = vsel %vm695_vm10, nan, %v705_v58  ;;  %v1536_v46 = vsel %vm1529_vm11, %v1532_v10, %v1535_v5  ;;  %v989_v9 = vshrl.u32 %v5243_v32, %v987_v50  ;;  %vm6462_vm11 = vmmov %vm6458_vm7 }
 0x112   : >> { %v2340_v57 = vmul.f32 %v2324_v39, %v2300_v15  ;;  %v1537_v45 = vsel %vm695_vm10, nan, %v1536_v46  ;;  %v2259_v37 = vmul.f32 2.0, %v706_v59  ;;  %v2395_v56 = vrot.slane %v706_v59, 4 }
 0x113   : >> { %vm2656_vm4 = vcmask 1045504   ;;  %2755 = vmatprep.subr.bf16.mxu0 %v2699_v53  ;;  %v2419_v34 = vrot.slane %v1537_v45, 1  ;;  %v990_v28 = vor.u32 %v989_v9, %v988_v4  ;;  %v991_v41 = vsub.s32 4294967266, %v986_v49 }
 0x114   : >> { %v2332_v55 = vmul.f32 %v2324_v39, %v2316_v54  ;;  %v2267_v33 = vmul.f32 %v2259_v37, %v1537_v45  ;;  %v2275_v7 = vmul.f32 %v2259_v37, %v706_v59  ;;  %v2613_v3 = vsel %vm2612_vm3, %v5226_v48, %v2395_v56 }
 0x115   : >> { %v2348_v51 = vsub.f32 1.0, %v2340_v57  ;;  %v2622_v32 = vsel %vm6458_vm7, %v2613_v3, %v2419_v34  ;;  %v992_v5 = vadd.s32 127, %v991_v41  ;;  %v997_v62 = vcvt.s32.f32 %v990_v28 }
 0x116   : >> { %v2356_v2 = vmul.f32 2.0, %v2332_v55  ;;  %v2283_v13 = vsub.f32 1.0, %v2275_v7  ;;  %v2291_v0 = vmul.f32 2.0, %v2267_v33  ;;  %v2443_v10 = vrot.slane %v2267_v33, 6 }
 0x117   : >> { %v2492_v50 = vrot.slane %v2316_v54, 5  ;;  %v993_v38 = vshll.u32 %v992_v5, 23  ;;  %v5352_v4 = vmul.u32.u64.low %v5239_v43, %v858_v36  ;;  %v5353_v49 = vmul.u32.u64.high %v5239_v43, %v858_v36, %v5352_v4 }
 0x118   : >> { %v2364_v39 = vmul.f32 %v2356_v2, %v2348_v51  ;;  %v2299_v58 = vmul.f32 %v2291_v0, %v2283_v13  ;;  %v2307_v53 = vmul.f32 %v2291_v0, %v2267_v33  ;;  %v2467_v59 = vrot.slane %v2283_v13, 3 }
 0x119   : >> { %v2631_v48 = vsel %vm6459_vm0, %v2419_v34, %v2443_v10  ;;  %v994_v46 = vor.u32 4788187, %v993_v38  ;;  %v5358_v9 = vmul.u32.u64.low %v5239_v43, %v5324_v14  ;;  %v5359_v57 = vmul.u32.u64.high %v5239_v43, %v5324_v14, %v5358_v9 }
 0x11a   : >> { %v2372_v45 = vmul.f32 %v2356_v2, %v2332_v55  ;;  %v2323_v54 = vmul.f32 2.0, %v2299_v58  ;;  %v2640_v37 = vsel %vm2639_vm8, %v2631_v48, %v2467_v59  ;;  %v2516_v56 = vrot.slane %v2332_v55, 2 }
 0x11b   : >> { %v2540_v36 = vrot.slane %v2348_v51, 7  ;;  %v2698_v28 = vpack.c.bf16 %v2640_v37, %v2622_v32  ;;  %v995_v41 = vand.u32 2147483647, %v994_v46  ;;  %v866_v33 = vmul.u32 %v5239_v43, %v5311_v52 }
 0x11c   : >> { %vm868_vm5 = vc.u32 %v5353_v49, %v5358_v9  ;;  %v2380_v34 = vsub.f32 1.0, %v2372_v45  ;;  %v2564_v7 = vrot.slane %v2364_v39, 4  ;;  %vm6460_vm9 = vcmask 1042432  }
 0x11d   : >> { %v2649_v14 = vsel %vm6460_vm9, %v2300_v15, %v2492_v50  ;;  %vm2665_vm12 = vcmask 1040384   ;;  %2756 = vmatpush1.bf16.msra.mxu0 %v2698_v28  ;;  %v998_v3 = vmul.f32 %v997_v62, %v995_v41  ;;  %v869_v5 = vadd.s32 1, %v5359_v57 }
 0x11e   : >> { %v2658_v55 = vsel %vm2656_vm4, %v2649_v14, %v2516_v56  ;;  %v2667_v51 = vsel %vm2665_vm12, %v2516_v56, %v2540_v36  ;;  %v2588_v32 = vrot.slane %v2380_v34, 1  ;;  %v2315_v43 = vsub.f32 1.0, %v2307_v53 }
 0x11f   : >> { %v2675_v2 = vsel %vm2612_vm3, %v2667_v51, %v2564_v7  ;;  %v2339_v52 = vmul.f32 %v2323_v54, %v2299_v58  ;;  %v6461_v13 = vand.u32 2147483647, %v5005_v6  ;;  %v999_v0 = vxor.u32 2147483648, %v998_v3 }
 0x120   : >> { %v870_v15 = vsel %vm868_vm5, %v869_v5, %v5359_v57  ;;  %v5379_v62 = vclamps-f32 %v5114_v42, 1.0  ;;  %v2683_v50 = vsel %vm6462_vm11, %v2675_v2, %v2588_v32  ;;  %v2331_v38 = vmul.f32 %v2323_v54, %v2315_v43 }
 0x121   : >> { %vm916_vm10 = vcmp.le.f32.partialorder %v6461_v13, 0.7853982  ;;  %v871_v10 = vadd.s32 %v870_v15, %v866_v33  ;;  %v2347_v4 = vsub.f32 1.0, %v2339_v52  ;;  %v1000_v39 = vsel %vm917_vm2, %v999_v0, %v998_v3  ;;  %vm6463_vm2 = vmmov %vm6460_vm9 }
 0x122   : >> { %v1004_v53 = vsel %vm916_vm10, 0, %v5305_v35  ;;  %v2707_v59 = vpack.c.bf16 %v2683_v50, %v2658_v55  ;;  %v2491_v48 = vrot.slane %v2315_v43, 5  ;;  %v1003_v46 = vsel %vm916_vm10, %v5005_v6, %v1000_v39  ;;  %vm6468_vm0 = vmmov %vm6463_vm2 }
 0x123   : >> { %v872_v45 = vadd.s32 536870912, %v871_v10  ;;  %v2355_v37 = vmul.f32 2.0, %v2331_v38  ;;  %v2515_v57 = vrot.slane %v2331_v38, 2  ;;  %4493 = vcosq.f32 %v1003_v46 }
 0x124   : >> { %2757 = vmatprep.subr.bf16.mxu0 %v2707_v59  ;;  %v2539_v42 = vrot.slane %v2347_v4, 7  ;;  %v1126_v56 = vand.u32 2139095040, %v5379_v62  ;;  %4495 = vsinq.f32 %v1003_v46  ;;  %v6377_v41 = vmov 0  }
 0x125   : >> { %v5387_v54 = vshrl.u32 %v872_v45, 30  ;;  %v2363_v36 = vmul.f32 %v2355_v37, %v2347_v4  ;;  %v2371_v28 = vmul.f32 %v2355_v37, %v2331_v38  ;;  %2787 = vmatprep.mubr.bf16.mxu0 %v6377_v41  ;;  %2860 = vmatprep.mubr.bf16.mxu1 %v6377_v41  ;;  %v1008_v35 = vadd.s32 3, %v1004_v53 }
 0x126   : >> { %v2648_v33 = vsel %vm6463_vm2, %v2299_v58, %v2491_v48  ;;  %v2666_v34 = vsel %vm2665_vm12, %v2515_v57, %v2539_v42  ;;  %v558_v5 = vrot.slane %v5110_v1, %v4784_v16  ;;  %v1837_v55 = vand.u32 3, %v1004_v53 }
 0x127   : >> { %v874_v7 = vshll.u32 %v5387_v54, 30  ;;  %v2379_v14 = vsub.f32 1.0, %v2371_v28  ;;  %v2563_v3 = vrot.slane %v2363_v36, 4  ;;  %v1127_v51 = vshrl.u32 %v1126_v56, 23 }
 0x128   : >> { %v2657_v52 = vsel %vm2656_vm4, %v2648_v33, %v2515_v57  ;;  %v1009_v0 = vand.u32 3, %v1008_v35  ;;  %v6375_v38 = vmov 0.0   ;;  %vm1007_vm14 = vweird.f32 %v5005_v6 }
 0x129   : >> { %v5396_v2 = vsub.s32 %v871_v10, %v874_v7  ;;  %v2587_v43 = vrot.slane %v2379_v14, 1  ;;  %v2674_v13 = vsel %vm2612_vm3, %v2666_v34, %v2563_v3  ;;  %v4237_v58 = vadd.s32 4294967169, %v1127_v51 }
 0x12a   : >> { %v4286_v4 = vpack.c.bf16 %v6375_v38, %v2588_v32  ;;  %vm4686_vm6 = vmmov 1   ;;  %v5410_v59 = vmul.f32 %v558_v5, %v6422_v19  ;;  %vm1838_vm7 = vcmp.lt.s32.totalorder %v1837_v55, 2 }
 0x12b   : >> { %v877_v15 = vsub.s32 0, %v5396_v2  ;;  %v2682_v50 = vsel %vm6464_vm13, %v2674_v13, %v2587_v43  ;;  %vm5405_vm1 = vmpackc.low %vm4686_vm6, %vm6465_vm15  ;;  %v1133_v53 = vadd.s32 1, %v4237_v58  ;;  %v2607_v48 = vsel %vm6468_vm0, %v5005_v6, 1.0 }
 0x12c   : >> { %v2706_v39 = vpack.c.bf16 %v2682_v50, %v2657_v52  ;;  %vm813_vm5 = vcmp.lt.s32.totalorder %v5101_v8, 0  ;;  %vm1014_vm9 = vcmp.eq.s32.totalorder %v1009_v0, 2  ;;  %vm1842_vm10 = vcmp.eq.s32.totalorder %v1837_v55, 2 }
 0x12d   : >> { %v4226_v32 = vmin.u32 %v877_v15, %v5396_v2  ;;  %v4494_v46 = vpop.eup %4493  ;;  %v4289_v45 = vpack.c.bf16 %v6375_v38, %v2587_v43  ;;  %vm1134_vm11 = vcmp.gt.s32.totalorder %v1133_v53, 0  ;;  %vm1011_vm2 = vcmp.eq.s32.totalorder %v1009_v0, 0 }
 0x12e   : >> { %2758 = vmatpush1.bf16.msra.mxu0 %v2706_v39  ;;  %v4496_v37 = vpop.eup %4495  ;;  %v1015_v57 = vxor.u32 2147483648, %v4494_v46  ;;  %vm1839_vm13 = vcmp.eq.s32.totalorder %v1837_v55, 0  ;;  %v6469_v42 = vand.u32 2147483647, %v5101_v8  ;;  %vm1010_vm15 = vcmp.lt.s32.totalorder %v1009_v0, 2 }
 0x12f   : >> { %v879_v36 = vclz %v4226_v32  ;;  %4287 = vmatprep.subr.msk.bf16.mxu0 %vm5405_vm1, %v4286_v4  ;;  %v1012_v28 = vxor.u32 2147483648, %v4496_v37  ;;  %v5427_v35 = vcombine.low %v6473_v20, %v6472_v21  ;;  %v1135_v33 = vsel %vm1134_vm11, %v1133_v53, 0 }
 0x130   : >> { %vm5419_vm6 = vcmp.le.f32.partialorder %v6469_v42, 0.7853982  ;;  %v1016_v34 = vsel %vm1014_vm9, %v1015_v57, %v4496_v37  ;;  %v1844_v7 = vsel %vm1842_vm10, %v1015_v57, %v4496_v37  ;;  %v897_v3 = vsub.s32 4, %v5387_v54 }
 0x131   : >> { %v4227_v14 = vadd.s32 4294967294, %v879_v36  ;;  %v1013_v5 = vsel %vm1011_vm2, %v4494_v46, %v1012_v28  ;;  %v1841_v51 = vsel %vm1839_vm13, %v4494_v46, %v1012_v28  ;;  %vm6389_vm0 = vcmask 392192  }
 0x132   : >> { %4290 = vmatpush1.bf16.msk.msra.mxu0 %vm5405_vm1, %v4289_v45  ;;  %v1137_v43 = vand.u32 31, %v1135_v33  ;;  %v1017_v52 = vsel %vm1010_vm15, %v1013_v5, %v1016_v34  ;;  %v1845_v13 = vsel %vm1838_vm7, %v1841_v51, %v1844_v7  ;;  %v867_v58 = vadd.s32 %v5358_v9, %v5353_v49 }
 0x133   : >> { %vm4228_vm11 = vcmp.lt.s32.totalorder %v4227_v14, 0  ;;  %v1018_v0 = vsel %vm1007_vm14, nan, %v1017_v52  ;;  %v1846_v15 = vsel %vm1007_vm14, nan, %v1845_v13  ;;  %v6374_v4 = vand.u32 2147483647, %v5379_v62 }
 0x134   : >> { %v882_v50 = vsel %vm4228_vm11, 0, %v4227_v14  ;;  %v2262_v39 = vmul.f32 2.0, %v1018_v0  ;;  %v2398_v53 = vrot.slane %v1018_v0, 4  ;;  %v898_v55 = vsel %vm813_vm5, %v897_v3, %v5387_v54 }
 0x135   : >> { %v883_v32 = vsub.s32 32, %v882_v50  ;;  %4291 = vmatmul.mubr.msk.bf16.vlgmr.msra.gmra.mrb[0].mxu0 %vm6389_vm0, %v5427_v35  ;;  %v2422_v49 = vrot.slane %v1846_v15, 1  ;;  %v884_v9 = vshll.u32 %v5396_v2, %v882_v50  ;;  %v887_v46 = vsub.s32 4294967266, %v882_v50 }
 0x136   : >> { %v1138_v45 = vsub.s32 32, %v1137_v43  ;;  %2797 = vmatprep.mubr.bf16.mxu0 %v6377_v41  ;;  %v2270_v37 = vmul.f32 %v2262_v39, %v1846_v15  ;;  %v2278_v57 = vmul.f32 %v2262_v39, %v1018_v0  ;;  %v2616_v42 = vsel %vm2612_vm3, %v2607_v48, %v2398_v53 }
 0x137   : >> { %v885_v36 = vshrl.u32 %v867_v58, %v883_v32  ;;  %v888_v28 = vadd.s32 127, %v887_v46  ;;  %v900_v34 = vsel %vm5419_vm6, 0, %v898_v55  ;;  %v1130_v54 = vand.u32 8388607, %v6374_v4 }
 0x138   : >> { %v1140_v7 = vshll.u32 %v6449_v12, %v1137_v43  ;;  %v2286_v14 = vsub.f32 1.0, %v2278_v57  ;;  %v2294_v2 = vmul.f32 2.0, %v2270_v37  ;;  %v2446_v3 = vrot.slane %v2270_v37, 6 }
 0x139   : >> { %v886_v5 = vor.u32 %v885_v36, %v884_v9  ;;  %vm6474_vm14 = vcmask 1046528   ;;  %v889_v52 = vshll.u32 %v888_v28, 23  ;;  %v1141_v13 = vshrl.u32 %v6440_v40, %v1138_v45 }
 0x13a   : >> { %v2625_v51 = vsel %vm6474_vm14, %v2616_v42, %v2422_v49  ;;  %v1143_v48 = vshll.u32 %v6440_v40, %v1137_v43  ;;  %v5458_v58 = vmul.f32 %v2294_v2, %v2286_v14  ;;  %v5460_v0 = vmul.f32 %v2294_v2, %v2270_v37 }
 0x13b   : >> { %v2470_v15 = vrot.slane %v2286_v14, 3  ;;  %vm6475_vm7 = vcmask 1041408   ;;  %v890_v39 = vor.u32 4788187, %v889_v52  ;;  %v893_v53 = vcvt.s32.f32 %v886_v5 }
 0x13c   : >> { %v2634_v50 = vsel %vm6475_vm7, %v2422_v49, %v2446_v3  ;;  %v1144_v32 = vshrl.u32 %v6441_v47, %v1138_v45  ;;  %v1146_v55 = vshll.u32 %v6441_v47, %v1137_v43  ;;  %v2318_v9 = vsub.f32 1.0, %v5460_v0 }
 0x13d   : >> { %v2326_v46 = vmul.f32 2.0, %v5458_v58  ;;  %v2643_v57 = vsel %vm2639_vm8, %v2634_v50, %v2470_v15  ;;  %v1147_v42 = vshrl.u32 %v6442_v44, %v1138_v45  ;;  %v891_v37 = vand.u32 2147483647, %v890_v39 }
 0x13e   : >> { %v2701_v36 = vpack.c.bf16 %v2643_v57, %v2625_v51  ;;  %v1149_v28 = vshll.u32 %v6442_v44, %v1137_v43  ;;  %v1150_v49 = vshrl.u32 %v6443_v63, %v1138_v45  ;;  %vm6476_vm9 = vcmask 1042432  }
 0x13f   : >> { %v5473_v14 = vsel %vm6476_vm9, %v5101_v8, 1.0  ;;  %v1131_v2 = vor.u32 8388608, %v1130_v54  ;;  %v1136_v3 = vshrl.u32 %v1135_v33, 5  ;;  %v583_v5 = vadd.f32 %v5410_v59, %v6423_v18 }
 0x140   : >> { %2828 = vmatprep.subr.bf16.mxu1 %v2701_v36  ;;  %v894_v52 = vmul.f32 %v893_v53, %v891_v37  ;;  %v904_v0 = vadd.s32 3, %v900_v34  ;;  %v1152_v15 = vshll.u32 %v6443_v63, %v1137_v43  ;;  %v1153_v51 = vshrl.u32 %v6444_v11, %v1138_v45 }
 0x141   : >> { %v2342_v50 = vmul.f32 %v2326_v46, %v5458_v58  ;;  %v5480_v39 = vand.u32 3, %v900_v34  ;;  %v5482_v57 = vmul.f32 %v2326_v46, %v2318_v9  ;;  %v1142_v4 = vor.u32 %v1141_v13, %v1140_v7 }
 0x142   : >> { %v895_v38 = vxor.u32 2147483648, %v894_v52  ;;  %v1145_v54 = vor.u32 %v1144_v32, %v1143_v48  ;;  %v1148_v33 = vor.u32 %v1147_v42, %v1146_v55  ;;  %v1151_v41 = vor.u32 %v1150_v49, %v1149_v28 }
 0x143   : >> { %v1139_v59 = vshrl.u32 %v6449_v12, %v1138_v45  ;;  %vm1155_vm10 = vcmp.lt.s32.totalorder %v1136_v3, 1  ;;  %vm1158_vm2 = vcmp.lt.s32.totalorder %v1136_v3, 4  ;;  %v1171_v53 = vshll.u32 %v1131_v2, 8 }
 0x144   : >> { %v896_v43 = vsel %vm813_vm5, %v895_v38, %v894_v52  ;;  %v1154_v36 = vor.u32 %v1153_v51, %v1152_v15  ;;  %v1160_v37 = vsel %vm1158_vm2, %v1148_v33, 2102212464  ;;  %v5488_v34 = vclamps-f32 %v583_v5, 1.0 }
 0x145   : >> { %v899_v7 = vsel %vm5419_vm6, %v5101_v8, %v896_v43  ;;  %v2350_v13 = vsub.f32 1.0, %v2342_v50  ;;  %v2358_v48 = vmul.f32 2.0, %v5482_v57  ;;  %vm1157_vm13 = vcmp.lt.s32.totalorder %v1136_v3, 3 }
 0x146   : >> { %4497 = vcosq.f32 %v899_v7  ;;  %vm1156_vm15 = vcmp.lt.s32.totalorder %v1136_v3, 2  ;;  %v1163_v45 = vsel %vm1155_vm10, %v1142_v4, %v1145_v54  ;;  %v1164_v32 = vsel %vm1158_vm2, %v1151_v41, 920167782 }
 0x147   : >> { %4499 = vsinq.f32 %v899_v7  ;;  %v1159_v38 = vsel %vm1155_vm10, %v1139_v59, %v1142_v4  ;;  %v1161_v55 = vsel %vm1157_vm13, %v1145_v54, %v1160_v37  ;;  %v1167_v46 = vsel %vm1155_vm10, %v1145_v54, %v1148_v33 }
 0x148   : >> { %v905_v42 = vand.u32 3, %v904_v0  ;;  %v2518_v56 = vrot.slane %v5482_v57, 2  ;;  %v1165_v28 = vsel %vm1157_vm13, %v1148_v33, %v1164_v32  ;;  %v1168_v49 = vsel %vm1158_vm2, %v1154_v36, 1326507024 }
 0x149   : >> { %v2366_v2 = vmul.f32 %v2358_v48, %v2350_v13  ;;  %v2374_v5 = vmul.f32 %v2358_v48, %v5482_v57  ;;  %v1166_v52 = vsel %vm1156_vm15, %v1163_v45, %v1165_v28  ;;  %v1169_v15 = vsel %vm1157_vm13, %v1151_v41, %v1168_v49 }
 0x14a   : >> { %vm1735_vm5 = vcmp.lt.s32.totalorder %v5480_v39, 2  ;;  %v1162_v4 = vsel %vm1156_vm15, %v1159_v38, %v1161_v55  ;;  %v1170_v51 = vsel %vm1156_vm15, %v1167_v46, %v1169_v15  ;;  %vm903_vm6 = vweird.f32 %v5101_v8 }
 0x14b   : >> { %v5508_v0 = vmul.u32.u64.low %v1171_v53, %v1166_v52  ;;  %v5509_v50 = vmul.u32.u64.high %v1171_v53, %v1166_v52, %v5508_v0  ;;  %v2542_v54 = vrot.slane %v2350_v13, 7  ;;  %v1022_v57 = vand.u32 2139095040, %v5488_v34 }
 0x14c   : >> { %v5513_v33 = vmul.u32.u64.low %v1171_v53, %v1170_v51  ;;  %v5514_v59 = vmul.u32.u64.high %v1171_v53, %v1170_v51, %v5513_v33  ;;  %vm1736_vm11 = vcmp.eq.s32.totalorder %v5480_v39, 0  ;;  %v2494_v41 = vrot.slane %v2318_v9, 5 }
 0x14d   : >> { %v5520_v43 = vcombine.low %v6478_v22, %v6477_v27  ;;  %v522_v3 = vadd.f32 3.5, %v4962_v60  ;;  %vm1739_vm14 = vcmp.eq.s32.totalorder %v5480_v39, 2  ;;  %v2382_v36 = vsub.f32 1.0, %v2374_v5 }
 0x14e   : >> { %v1178_v37 = vmul.u32 %v1171_v53, %v1162_v4  ;;  %v1023_v7 = vshrl.u32 %v1022_v57, 23  ;;  %vm906_vm7 = vcmp.lt.s32.totalorder %v905_v42, 2  ;;  %v2566_v13 = vrot.slane %v2366_v2, 4 }
 0x14f   : >> { %v1181_v48 = vadd.s32 1, %v5509_v50  ;;  %v6379_v45 = vand.u32 2147483647, %v5488_v34  ;;  %4292 = vmatmul.mubr.msk.bf16.gmra.mrb[4].mxu0 %vm6389_vm0, %v5520_v43  ;;  %vm907_vm9 = vcmp.eq.s32.totalorder %v905_v42, 0  ;;  %v2669_v9 = vsel %vm2665_vm12, %v2518_v56, %v2542_v54 }
 0x150   : >> { %vm1180_vm10 = vc.u32 %v5514_v59, %v5508_v0  ;;  %v4233_v60 = vadd.s32 4294967169, %v1023_v7  ;;  %v6479_v32 = vmov 0   ;;  %v4498_v53 = vpop.eup %4497  ;;  %vm910_vm2 = vcmp.eq.s32.totalorder %v905_v42, 2 }
 0x151   : >> { %2807 = vmatprep.mubr.bf16.mxu0 %v6479_v32  ;;  %vm6480_vm13 = vcmask 1042432   ;;  %v1182_v55 = vsel %vm1180_vm10, %v1181_v48, %v5509_v50  ;;  %v530_v46 = vmul.f32 %v522_v3, %v4841_v31  ;;  %v4500_v28 = vpop.eup %4499  ;;  %v911_v49 = vxor.u32 2147483648, %v4498_v53 }
 0x152   : >> { %v2651_v38 = vsel %vm6480_vm13, %v5458_v58, %v2494_v41  ;;  %v2590_v2 = vrot.slane %v2382_v36, 1  ;;  %v1183_v5 = vadd.s32 %v1182_v55, %v1178_v37  ;;  %v1029_v52 = vadd.s32 1, %v4233_v60 }
 0x153   : >> { %v908_v15 = vxor.u32 2147483648, %v4500_v28  ;;  %v2677_v4 = vsel %vm2612_vm3, %v2669_v9, %v2566_v13  ;;  %v1026_v51 = vand.u32 8388607, %v6379_v45  ;;  %v529_v54 = vmul.f32 %v522_v3, %v4839_v30 }
 0x154   : >> { %v912_v33 = vsel %vm910_vm2, %v911_v49, %v4500_v28  ;;  %v1741_v58 = vsel %vm1739_vm14, %v911_v49, %v4500_v28  ;;  %v1184_v50 = vadd.s32 536870912, %v1183_v5  ;;  %vm1030_vm15 = vcmp.gt.s32.totalorder %v1029_v52, 0 }
 0x155   : >> { %v909_v57 = vsel %vm907_vm9, %v4498_v53, %v908_v15  ;;  %v1738_v41 = vsel %vm1736_vm11, %v4498_v53, %v908_v15  ;;  %v1031_v36 = vsel %vm1030_vm15, %v1029_v52, 0  ;;  %v5546_v37 = vadd.f32 %v530_v46, %v6424_v26 }
 0x156   : >> { %v913_v7 = vsel %vm906_vm7, %v909_v57, %v912_v33  ;;  %v1742_v3 = vsel %vm1735_vm5, %v1738_v41, %v1741_v58  ;;  %v2660_v13 = vsel %vm2656_vm4, %v2651_v38, %v2518_v56  ;;  %v1185_v48 = vshrl.u32 %v1184_v50, 30  ;;  %vm6485_vm7 = vmmov %vm6480_vm13 }
 0x157   : >> { %v914_v9 = vsel %vm903_vm6, nan, %v913_v7  ;;  %v1743_v60 = vsel %vm903_vm6, nan, %v1742_v3  ;;  %v1027_v55 = vor.u32 8388608, %v1026_v51  ;;  %v5556_v53 = vand.u32 31, %v1031_v36 }
 0x158   : >> { %v2261_v28 = vmul.f32 2.0, %v914_v9  ;;  %v2397_v46 = vrot.slane %v914_v9, 4  ;;  %vm6481_vm11 = vcmask 1046528   ;;  %v1186_v49 = vshll.u32 %v1185_v48, 30 }
 0x159   : >> { %v2685_v42 = vsel %vm6481_vm11, %v2677_v4, %v2590_v2  ;;  %v2421_v52 = vrot.slane %v1743_v60, 1  ;;  %v6482_v39 = vmov 0.0   ;;  %v570_v56 = vrot.slane %v5546_v37, %v4784_v16  ;;  %vm6483_vm6 = vmmov %vm6481_vm11 }
 0x15a   : >> { %v5560_v15 = vpack.c.bf16 %v6482_v39, %v2590_v2  ;;  %v5565_v38 = vadd.f32 %v529_v54, %v6425_v25  ;;  %v2269_v33 = vmul.f32 %v2261_v28, %v1743_v60  ;;  %v2277_v58 = vmul.f32 %v2261_v28, %v914_v9  ;;  %vm6486_vm15 = vmmov %vm6483_vm6 }
 0x15b   : >> { %v2615_v51 = vsel %vm2612_vm3, %v5473_v14, %v2397_v46  ;;  %vm1125_vm5 = vcmp.lt.s32.totalorder %v5379_v62, 0  ;;  %v5570_v50 = vsub.s32 %v1183_v5, %v1186_v49  ;;  %v2709_v4 = vpack.c.bf16 %v2685_v42, %v2660_v13 }
 0x15c   : >> { %v5574_v2 = vadd.s32 %v5508_v0, %v5514_v59  ;;  %v1034_v57 = vsub.s32 32, %v5556_v53  ;;  %v5577_v41 = vshll.u32 %v1027_v55, 8  ;;  %v2285_v54 = vsub.f32 1.0, %v2277_v58 }
 0x15d   : >> { %v2293_v7 = vmul.f32 2.0, %v2269_v33  ;;  %v2445_v3 = vrot.slane %v2269_v33, 6  ;;  %v1189_v9 = vsub.s32 0, %v5570_v50  ;;  %v2624_v14 = vsel %vm6483_vm6, %v2615_v51, %v2421_v52 }
 0x15e   : >> { %v5581_v60 = vshrl.u32 %v1031_v36, 5  ;;  %v578_v5 = vmul.f32 %v570_v56, %v6426_v24  ;;  %v2469_v28 = vrot.slane %v2285_v54, 3  ;;  %vm6484_vm14 = vcmask 1041408  }
 0x15f   : >> { %v2301_v0 = vmul.f32 %v2293_v7, %v2285_v54  ;;  %v2309_v59 = vmul.f32 %v2293_v7, %v2269_v33  ;;  %v2633_v55 = vsel %vm6484_vm14, %v2421_v52, %v2445_v3  ;;  %v4238_v46 = vmin.u32 %v1189_v9, %v5570_v50 }
 0x160   : >> { %v1209_v42 = vsub.s32 4, %v1185_v48  ;;  %v1036_v49 = vshll.u32 %v6449_v12, %v5556_v53  ;;  %v1039_v36 = vshll.u32 %v6440_v40, %v5556_v53  ;;  %v2642_v56 = vsel %vm2639_vm8, %v2633_v55, %v2469_v28 }
 0x161   : >> { %v2325_v58 = vmul.f32 2.0, %v2301_v0  ;;  %v2317_v51 = vsub.f32 1.0, %v2309_v59  ;;  %v1037_v45 = vshrl.u32 %v6440_v40, %v1034_v57  ;;  %v2700_v13 = vpack.c.bf16 %v2642_v56, %v2624_v14 }
 0x162   : >> { %v1191_v33 = vclz %v4238_v46  ;;  %v1040_v54 = vshrl.u32 %v6441_v47, %v1034_v57  ;;  %v1042_v52 = vshll.u32 %v6441_v47, %v5556_v53  ;;  %v1043_v20 = vshrl.u32 %v6442_v44, %v1034_v57 }
 0x163   : >> { %v2333_v7 = vmul.f32 %v2325_v58, %v2317_v51  ;;  %v2341_v3 = vmul.f32 %v2325_v58, %v2301_v0  ;;  %v2493_v9 = vrot.slane %v2317_v51, 5  ;;  %2829 = vmatpush1.bf16.msra.mxu1 %v2700_v13  ;;  %v5600_v28 = vsel %vm1125_vm5, %v1209_v42, %v1185_v48 }
 0x164   : >> { %v4239_v21 = vadd.s32 4294967294, %v1191_v33  ;;  %v1035_v59 = vshrl.u32 %v6449_v12, %v1034_v57  ;;  %v586_v14 = vadd.f32 %v578_v5, %v6421_v23  ;;  %2830 = vmatprep.subr.bf16.mxu1 %v2709_v4  ;;  %v1038_v22 = vor.u32 %v1037_v45, %v1036_v49 }
 0x165   : >> { %v2349_v55 = vsub.f32 1.0, %v2341_v3  ;;  %v2357_v46 = vmul.f32 2.0, %v2333_v7  ;;  %v2517_v56 = vrot.slane %v2333_v7, 2  ;;  %v2650_v58 = vsel %vm6485_vm7, %v2301_v0, %v2493_v9 }
 0x166   : >> { %vm4240_vm9 = vcmp.lt.s32.totalorder %v4239_v21, 0  ;;  %v1041_v51 = vor.u32 %v1040_v54, %v1039_v36  ;;  %v1045_v13 = vshll.u32 %v6442_v44, %v5556_v53  ;;  %v1044_v42 = vor.u32 %v1043_v20, %v1042_v52 }
 0x167   : >> { %v2365_v33 = vmul.f32 %v2357_v46, %v2349_v55  ;;  %v2373_v24 = vmul.f32 %v2357_v46, %v2333_v7  ;;  %v2541_v48 = vrot.slane %v2349_v55, 7  ;;  %v1194_v25 = vsel %vm4240_vm9, 0, %v4239_v21 }
 0x168   : >> { %v1046_v26 = vshrl.u32 %v6443_v63, %v1034_v57  ;;  %v1048_v4 = vshll.u32 %v6443_v63, %v5556_v53  ;;  %v1049_v5 = vshrl.u32 %v6444_v11, %v1034_v57  ;;  %v1195_v36 = vsub.s32 32, %v1194_v25 }
 0x169   : >> { %v2381_v45 = vsub.f32 1.0, %v2373_v24  ;;  %v2565_v49 = vrot.slane %v2365_v33, 4  ;;  %v2668_v0 = vsel %vm2665_vm12, %v2517_v56, %v2541_v48  ;;  %v2659_v54 = vsel %vm2656_vm4, %v2650_v58, %v2517_v56 }
 0x16a   : >> { %v1196_v3 = vshll.u32 %v5570_v50, %v1194_v25  ;;  %v1199_v7 = vsub.s32 4294967266, %v1194_v25  ;;  %v1047_v9 = vor.u32 %v1046_v26, %v1045_v13  ;;  %v1197_v52 = vshrl.u32 %v5574_v2, %v1195_v36 }
 0x16b   : >> { %v2589_v20 = vrot.slane %v2381_v45, 1  ;;  %v2676_v21 = vsel %vm2612_vm3, %v2668_v0, %v2565_v49  ;;  %vm1051_vm10 = vcmp.lt.s32.totalorder %v5581_v60, 1  ;;  %v1050_v57 = vor.u32 %v1049_v5, %v1048_v4 }
 0x16c   : >> { %v1200_v53 = vadd.s32 127, %v1199_v7  ;;  %vm1052_vm2 = vcmp.lt.s32.totalorder %v5581_v60, 2  ;;  %vm1054_vm13 = vcmp.lt.s32.totalorder %v5581_v60, 4  ;;  %v1198_v55 = vor.u32 %v1197_v52, %v1196_v3 }
 0x16d   : >> { %v2684_v24 = vsel %vm6486_vm15, %v2676_v21, %v2589_v20  ;;  %vm1053_vm11 = vcmp.lt.s32.totalorder %v5581_v60, 3  ;;  %v1055_v25 = vsel %vm1051_vm10, %v1035_v59, %v1038_v22  ;;  %v1056_v2 = vsel %vm1054_vm13, %v1044_v42, 2102212464 }
 0x16e   : >> { %v2708_v26 = vpack.c.bf16 %v2684_v24, %v2659_v54  ;;  %v1201_v50 = vshll.u32 %v1200_v53, 23  ;;  %v1059_v46 = vsel %vm1051_vm10, %v1038_v22, %v1041_v51  ;;  %v4299_v56 = vpack.c.bf16 %v6482_v39, %v2589_v20 }
 0x16f   : >> { %v1057_v58 = vsel %vm1053_vm11, %v1041_v51, %v1056_v2  ;;  %v1060_v13 = vsel %vm1054_vm13, %v1047_v9, 920167782  ;;  %v1063_v33 = vsel %vm1051_vm10, %v1041_v51, %v1044_v42  ;;  %v1205_v48 = vcvt.s32.f32 %v1198_v55 }
 0x170   : >> { %2831 = vmatpush1.bf16.msra.mxu1 %v2708_v26  ;;  %v1202_v59 = vor.u32 4788187, %v1201_v50  ;;  %v1061_v4 = vsel %vm1053_vm11, %v1044_v42, %v1060_v13  ;;  %v1064_v22 = vsel %vm1054_vm13, %v1050_v57, 1326507024  ;;  %v1058_v5 = vsel %vm1052_vm2, %v1055_v25, %v1057_v58 }
 0x171   : >> { %4297 = vmatprep.subr.msk.bf16.mxu1 %vm5405_vm1, %v5560_v15  ;;  %v1062_v45 = vsel %vm1052_vm2, %v1059_v46, %v1061_v4  ;;  %v1065_v51 = vsel %vm1053_vm11, %v1047_v9, %v1064_v22  ;;  %v5647_v49 = vclamps-f32 %v586_v14, 1.0  ;;  %v6487_v7 = vand.u32 2147483647, %v5379_v62 }
 0x172   : >> { %v1203_v0 = vand.u32 2147483647, %v1202_v59  ;;  %v1066_v42 = vsel %vm1052_vm2, %v1063_v33, %v1065_v51  ;;  %v5652_v36 = vmul.u32.u64.low %v5577_v41, %v1062_v45  ;;  %v5653_v54 = vmul.u32.u64.high %v5577_v41, %v1062_v45, %v5652_v36 }
 0x173   : >> { %v5656_v15 = vmul.u32.u64.low %v5577_v41, %v1066_v42  ;;  %v5657_v3 = vmul.u32.u64.high %v5577_v41, %v1066_v42, %v5656_v15  ;;  %vm5663_vm6 = vcmp.le.f32.partialorder %v6487_v7, 0.7853982  ;;  %v1334_v60 = vand.u32 2139095040, %v5647_v49  ;;  %v6491_v42 = vld [vmem:[#allocation12_spill] sm:$0xff] }
 0x174   : >> { %4300 = vmatpush1.bf16.msk.msra.mxu1 %vm5405_vm1, %v4299_v56  ;;  %v1206_v9 = vmul.f32 %v1205_v48, %v1203_v0  ;;  %v1212_v20 = vsel %vm5663_vm6, 0, %v5600_v28  ;;  %v1074_v21 = vmul.u32 %v5577_v41, %v1058_v5  ;;  %v6490_v52 = vrot.slane %v5565_v38, %v4784_v16 }
 0x175   : >> { %v1077_v24 = vadd.s32 1, %v5653_v54  ;;  %v6383_v55 = vand.u32 2147483647, %v5647_v49  ;;  %v1335_v25 = vshrl.u32 %v1334_v60, 23  ;;  %vm1076_vm14 = vc.u32 %v5657_v3, %v5652_v36 }
 0x176   : >> { %v577_v53 = vmul.f32 %v6490_v52, %v6422_v19  ;;  %v1207_v57 = vxor.u32 2147483648, %v1206_v9  ;;  %v1216_v26 = vadd.s32 3, %v1212_v20  ;;  %v5691_v33 = vand.u32 3, %v1212_v20 }
 0x177   : >> { %4301 = vmatmul.mubr.msk.bf16.vlgmr.msra.gmra.mrb[0].mxu1 %vm6389_vm0, %v5427_v35  ;;  %v1078_v50 = vsel %vm1076_vm14, %v1077_v24, %v5653_v54  ;;  %v4245_v2 = vadd.s32 4294967169, %v1335_v25  ;;  %v1338_v58 = vand.u32 8388607, %v6383_v55  ;;  %v5697_v45 = vsel %vm6485_vm7, %v5379_v62, 1.0 }
 0x178   : >> { %v585_v28 = vadd.f32 %v577_v53, %v6423_v18  ;;  %v1208_v41 = vsel %vm1125_vm5, %v1207_v57, %v1206_v9  ;;  %2870 = vmatprep.mubr.bf16.mxu1 %v6479_v32  ;;  %v1079_v56 = vadd.s32 %v1078_v50, %v1074_v21  ;;  %v1217_v4 = vand.u32 3, %v1216_v26 }
 0x179   : >> { %v1211_v46 = vsel %vm5663_vm6, %v5379_v62, %v1208_v41  ;;  %v1341_v13 = vadd.s32 1, %v4245_v2  ;;  %v1339_v51 = vor.u32 8388608, %v1338_v58  ;;  %v5701_v54 = vcombine.low %v6491_v42, %v4836_v29 }
 0x17a   : >> { %4501 = vcosq.f32 %v1211_v46  ;;  %v1080_v59 = vadd.s32 536870912, %v1079_v56  ;;  %v5693_v48 = vclamps-f32 %v585_v28, 1.0  ;;  %vm1215_vm9 = vweird.f32 %v5379_v62 }
 0x17b   : >> { %4503 = vsinq.f32 %v1211_v46  ;;  %vm1342_vm5 = vcmp.gt.s32.totalorder %v1341_v13, 0  ;;  %vm2044_vm10 = vcmp.lt.s32.totalorder %v5691_v33, 2  ;;  %vm1021_vm2 = vcmp.lt.s32.totalorder %v5488_v34, 0  ;;  %4293 = vmatmul.mubr.msk.bf16.gmra.mrb[8].mxu0 %vm6389_vm0, %v5701_v54 }
 0x17c   : >> { %v1081_v22 = vshrl.u32 %v1080_v59, 30  ;;  %v1343_v5 = vsel %vm1342_vm5, %v1341_v13, 0  ;;  %v1230_v7 = vand.u32 2139095040, %v5693_v48  ;;  %vm1218_vm13 = vcmp.lt.s32.totalorder %v1217_v4, 2  ;;  %2817 = vmatprep.mubr.bf16.mxu0 %v6479_v32 }
 0x17d   : >> { %v1345_v0 = vand.u32 31, %v1343_v5  ;;  %vm2045_vm15 = vcmp.eq.s32.totalorder %v5691_v33, 0  ;;  %vm1219_vm11 = vcmp.eq.s32.totalorder %v1217_v4, 0  ;;  %vm1222_vm6 = vcmp.eq.s32.totalorder %v1217_v4, 2 }
 0x17e   : >> { %v1082_v15 = vshll.u32 %v1081_v22, 30  ;;  %v1105_v14 = vsub.s32 4, %v1081_v22  ;;  %vm2048_vm14 = vcmp.eq.s32.totalorder %v5691_v33, 2  ;;  %v1075_v20 = vadd.s32 %v5652_v36, %v5657_v3 }
 0x17f   : >> { %4302 = vmatmul.mubr.msk.bf16.gmra.mrb[4].mxu1 %vm6389_vm0, %v5520_v43  ;;  %v1346_v9 = vsub.s32 32, %v1345_v0  ;;  %v5718_v21 = vshrl.u32 %v1343_v5, 5  ;;  %v5720_v52 = vshll.u32 %v1339_v51, 8  ;;  %v1348_v24 = vshll.u32 %v6449_v12, %v1345_v0 }
 0x180   : >> { %2880 = vmatprep.mubr.bf16.mxu1 %v6479_v32  ;;  %v5714_v60 = vsub.s32 %v1079_v56, %v1082_v15  ;;  %v1351_v25 = vshll.u32 %v6440_v40, %v1345_v0  ;;  %v5726_v28 = vshrl.u32 %v1230_v7, 23  ;;  %v5730_v26 = vsel %vm1021_vm2, %v1105_v14, %v1081_v22 }
 0x181   : >> { %v1349_v36 = vshrl.u32 %v6440_v40, %v1346_v9  ;;  %v1352_v3 = vshrl.u32 %v6441_v47, %v1346_v9  ;;  %v1354_v50 = vshll.u32 %v6441_v47, %v1345_v0  ;;  %v1355_v58 = vshrl.u32 %v6442_v44, %v1346_v9 }
 0x182   : >> { %v1085_v57 = vsub.s32 0, %v5714_v60  ;;  %v1357_v13 = vshll.u32 %v6442_v44, %v1345_v0  ;;  %v1358_v5 = vshrl.u32 %v6443_v63, %v1346_v9  ;;  %v1360_v22 = vshll.u32 %v6443_v63, %v1345_v0 }
 0x183   : >> { %v1361_v51 = vshrl.u32 %v6444_v11, %v1346_v9  ;;  %v1347_v14 = vshrl.u32 %v6449_v12, %v1346_v9  ;;  %v1350_v53 = vor.u32 %v1349_v36, %v1348_v24  ;;  %v1353_v0 = vor.u32 %v1352_v3, %v1351_v25 }
 0x184   : >> { %v4502_v41 = vpop.eup %4501  ;;  %v4234_v56 = vmin.u32 %v1085_v57, %v5714_v60  ;;  %v1359_v23 = vor.u32 %v1358_v5, %v1357_v13  ;;  %vm1363_vm7 = vcmp.lt.s32.totalorder %v5718_v21, 1 }
 0x185   : >> { %v4504_v2 = vpop.eup %4503  ;;  %v1223_v46 = vxor.u32 2147483648, %v4502_v41  ;;  %v1362_v27 = vor.u32 %v1361_v51, %v1360_v22 }
 0x186   : >> { %v1220_v59 = vxor.u32 2147483648, %v4504_v2  ;;  %v1087_v7 = vclz %v4234_v56  ;;  %v1356_v56 = vor.u32 %v1355_v58, %v1354_v50 }
 0x187   : >> { %v1224_v42 = vsel %vm1222_vm6, %v1223_v46, %v4504_v2  ;;  %v2050_v15 = vsel %vm2048_vm14, %v1223_v46, %v4504_v2  ;;  %4303 = vmatmul.mubr.msk.bf16.gmra.mrb[8].mxu1 %vm6389_vm0, %v5701_v54  ;;  %vm6496_vm6 = vcmask 1041408  }
 0x188   : >> { %v1221_v57 = vsel %vm1219_vm11, %v4502_v41, %v1220_v59  ;;  %v2047_v55 = vsel %vm2045_vm15, %v4502_v41, %v1220_v59  ;;  %2890 = vmatprep.mubr.bf16.mxu1 %v6479_v32  ;;  %v4235_v46 = vadd.s32 4294967294, %v1087_v7  ;;  %vm1366_vm15 = vcmp.lt.s32.totalorder %v5718_v21, 4 }
 0x189   : >> { %v1225_v18 = vsel %vm1218_vm13, %v1221_v57, %v1224_v42  ;;  %v2051_v2 = vsel %vm2044_vm10, %v2047_v55, %v2050_v15  ;;  %vm1364_vm13 = vcmp.lt.s32.totalorder %v5718_v21, 2  ;;  %vm1365_vm10 = vcmp.lt.s32.totalorder %v5718_v21, 3 }
 0x18a   : >> { %v1226_v9 = vsel %vm1215_vm9, nan, %v1225_v18  ;;  %v2052_v19 = vsel %vm1215_vm9, nan, %v2051_v2  ;;  %vm4236_vm5 = vcmp.lt.s32.totalorder %v4235_v46, 0  ;;  %v6492_v18 = vand.u32 2147483647, %v5488_v34 }
 0x18b   : >> { %v2264_v41 = vmul.f32 2.0, %v1226_v9  ;;  %v2400_v24 = vrot.slane %v1226_v9, 4  ;;  %v2424_v4 = vrot.slane %v2052_v19, 1  ;;  %v1090_v25 = vsel %vm4236_vm5, 0, %v4235_v46 }
 0x18c   : >> { %vm5767_vm9 = vcmp.le.f32.partialorder %v6492_v18, 0.7853982  ;;  %v1091_v3 = vsub.s32 32, %v1090_v25  ;;  %v1092_v58 = vshll.u32 %v5714_v60, %v1090_v25  ;;  %v1095_v13 = vsub.s32 4294967266, %v1090_v25 }
 0x18d   : >> { %v5761_v55 = vmul.f32 %v2264_v41, %v2052_v19  ;;  %v5763_v33 = vmul.f32 %v2264_v41, %v1226_v9  ;;  %v2618_v50 = vsel %vm2612_vm3, %v5697_v45, %v2400_v24  ;;  %v1367_v19 = vsel %vm1363_vm7, %v1347_v14, %v1350_v53 }
 0x18e   : >> { %v1093_v22 = vshrl.u32 %v1075_v20, %v1091_v3  ;;  %v1368_v51 = vsel %vm1366_vm15, %v1356_v56, 2102212464  ;;  %v1096_v42 = vadd.s32 127, %v1095_v13  ;;  %v1371_v45 = vsel %vm1363_vm7, %v1350_v53, %v1353_v0 }
 0x18f   : >> { %v2288_v59 = vsub.f32 1.0, %v5763_v33  ;;  %v2448_v5 = vrot.slane %v5761_v55, 6  ;;  %v1369_v15 = vsel %vm1365_vm10, %v1353_v0, %v1368_v51  ;;  %v1372_v60 = vsel %vm1366_vm15, %v1359_v23, 920167782  ;;  %v6499_v51 = vld [vmem:[#allocation13_spill] sm:$0xff] }
 0x190   : >> { %vm6495_vm11 = vcmask 1046528   ;;  %v1094_v2 = vor.u32 %v1093_v22, %v1092_v58  ;;  %v1097_v20 = vshll.u32 %v1096_v42, 23  ;;  %v1373_v46 = vsel %vm1365_vm10, %v1356_v56, %v1372_v60  ;;  %v6498_v22 = vld [vmem:[#allocation14_spill] sm:$0xff] }
 0x191   : >> { %v2472_v7 = vrot.slane %v2288_v59, 3  ;;  %v2627_v14 = vsel %vm6495_vm11, %v2618_v50, %v2424_v4  ;;  %v2636_v57 = vsel %vm6496_vm6, %v2424_v4, %v2448_v5  ;;  %v1375_v9 = vsel %vm1363_vm7, %v1353_v0, %v1356_v56 }
 0x192   : >> { %v1376_v41 = vsel %vm1366_vm15, %v1362_v27, 1326507024  ;;  %v1370_v24 = vsel %vm1364_vm13, %v1367_v19, %v1369_v15  ;;  %v1374_v25 = vsel %vm1364_vm13, %v1371_v45, %v1373_v46  ;;  %v1098_v18 = vor.u32 4788187, %v1097_v20 }
 0x193   : >> { %v2645_v53 = vsel %vm2639_vm8, %v2636_v57, %v2472_v7  ;;  %v1377_v4 = vsel %vm1365_vm10, %v1359_v23, %v1376_v41  ;;  %v1101_v3 = vcvt.s32.f32 %v1094_v2  ;;  %v1108_v23 = vsel %vm5767_vm9, 0, %v5730_v26 }
 0x194   : >> { %v2703_v33 = vpack.c.bf16 %v2645_v53, %v2627_v14  ;;  %v1378_v0 = vsel %vm1364_vm13, %v1375_v9, %v1377_v4  ;;  %v5809_v50 = vmul.u32.u64.low %v5720_v52, %v1374_v25  ;;  %v5810_v58 = vmul.u32.u64.high %v5720_v52, %v1374_v25, %v5809_v50 }
 0x195   : >> { %v5805_v56 = vmul.u32.u64.low %v5720_v52, %v1378_v0  ;;  %v5806_v27 = vmul.u32.u64.high %v5720_v52, %v1378_v0, %v5805_v56  ;;  %v1099_v13 = vand.u32 2147483647, %v1098_v18  ;;  %v4241_v19 = vadd.s32 4294967169, %v5726_v28 }
 0x196   : >> { %2901 = vmatprep.subr.bf16.mxu0 %v2703_v33  ;;  %v6497_v21 = vand.u32 2147483647, %v5693_v48  ;;  %v5821_v42 = vcombine.low %v6499_v51, %v6498_v22  ;;  %v1386_v45 = vmul.u32 %v5720_v52, %v1370_v24  ;;  %v1112_v7 = vadd.s32 3, %v1108_v23 }
 0x197   : >> { %v1102_v15 = vmul.f32 %v1101_v3, %v1099_v13  ;;  %v1237_v60 = vadd.s32 1, %v4241_v19  ;;  %vm1388_vm14 = vc.u32 %v5806_v27, %v5809_v50  ;;  %v1389_v14 = vadd.s32 1, %v5810_v58 }
 0x198   : >> { %v1234_v5 = vand.u32 8388607, %v6497_v21  ;;  %v2296_v26 = vmul.f32 2.0, %v5761_v55  ;;  %4294 = vmatmul.mubr.msk.bf16.gmra.mrb[12].mxu0 %vm6389_vm0, %v5821_v42  ;;  %4304 = vmatmul.mubr.msk.bf16.gmra.mrb[12].mxu1 %vm6389_vm0, %v5821_v42  ;;  %vm6500_vm7 = vcmask 1042432   ;;  %v5841_v9 = vand.u32 3, %v1108_v23 }
 0x199   : >> { %v1103_v28 = vxor.u32 2147483648, %v1102_v15  ;;  %vm1238_vm5 = vcmp.gt.s32.totalorder %v1237_v60, 0  ;;  %2933 = vmatprep.mubr.bf16.mxu0 %v6479_v32  ;;  %3006 = vmatprep.mubr.bf16.mxu1 %v6479_v32  ;;  %v5836_v52 = vsel %vm6500_vm7, %v5488_v34, 1.0  ;;  %v1390_v57 = vsel %vm1388_vm14, %v1389_v14, %v5810_v58 }
 0x19a   : >> { %v1235_v2 = vor.u32 8388608, %v1234_v5  ;;  %v1239_v20 = vsel %vm1238_vm5, %v1237_v60, 0  ;;  %v1391_v41 = vadd.s32 %v1390_v57, %v1386_v45  ;;  %v5846_v25 = vand.u32 3, %v1112_v7 }
 0x19b   : >> { %v1104_v46 = vsel %vm1021_vm2, %v1103_v28, %v1102_v15  ;;  %v1241_v53 = vand.u32 31, %v1239_v20  ;;  %v5848_v4 = vmul.f32 %v2296_v26, %v2288_v59  ;;  %v2312_v33 = vmul.f32 %v2296_v26, %v5761_v55 }
 0x19c   : >> { %v1107_v24 = vsel %vm5767_vm9, %v5488_v34, %v1104_v46  ;;  %v1392_v18 = vadd.s32 536870912, %v1391_v41  ;;  %v5851_v3 = vshrl.u32 %v1239_v20, 5  ;;  %vm1942_vm2 = vcmp.eq.s32.totalorder %v5841_v9, 0 }
 0x19d   : >> { %4505 = vcosq.f32 %v1107_v24  ;;  %v1242_v0 = vsub.s32 32, %v1241_v53  ;;  %v1244_v56 = vshll.u32 %v6449_v12, %v1241_v53  ;;  %v1247_v58 = vshll.u32 %v6440_v40, %v1241_v53 }
 0x19e   : >> { %4507 = vsinq.f32 %v1107_v24  ;;  %v1253_v13 = vshll.u32 %v6442_v44, %v1241_v53  ;;  %v5856_v36 = vshrl.u32 %v1392_v18, 30  ;;  %v1250_v55 = vshll.u32 %v6441_v47, %v1241_v53 }
 0x19f   : >> { %v1245_v23 = vshrl.u32 %v6440_v40, %v1242_v0  ;;  %v1248_v59 = vshrl.u32 %v6441_v47, %v1242_v0  ;;  %v1251_v19 = vshrl.u32 %v6442_v44, %v1242_v0  ;;  %v1254_v21 = vshrl.u32 %v6443_v63, %v1242_v0 }
 0x1a0   : >> { %v1256_v5 = vshll.u32 %v6443_v63, %v1241_v53  ;;  %v1257_v22 = vshrl.u32 %v6444_v11, %v1242_v0  ;;  %vm1114_vm13 = vcmp.lt.s32.totalorder %v5846_v25, 2  ;;  %vm1115_vm10 = vcmp.eq.s32.totalorder %v5846_v25, 0 }
 0x1a1   : >> { %vm1941_vm9 = vcmp.lt.s32.totalorder %v5841_v9, 2  ;;  %vm1945_vm15 = vcmp.eq.s32.totalorder %v5841_v9, 2  ;;  %v1394_v40 = vshll.u32 %v5856_v36, 30  ;;  %vm1111_vm11 = vweird.f32 %v5488_v34 }
 0x1a2   : >> { %vm1118_vm6 = vcmp.eq.s32.totalorder %v5846_v25, 2  ;;  %v1255_v47 = vor.u32 %v1254_v21, %v1253_v13  ;;  %v2320_v44 = vsub.f32 1.0, %v2312_v33  ;;  %v2328_v63 = vmul.f32 2.0, %v5848_v4 }
 0x1a3   : >> { %v5874_v51 = vsub.s32 %v1391_v41, %v1394_v40  ;;  %v1243_v11 = vshrl.u32 %v6449_v12, %v1242_v0  ;;  %v1252_v15 = vor.u32 %v1251_v19, %v1250_v55  ;;  %v5877_v45 = vshll.u32 %v1235_v2, 8 }
 0x1a4   : >> { %v1246_v60 = vor.u32 %v1245_v23, %v1244_v56  ;;  %v1249_v7 = vor.u32 %v1248_v59, %v1247_v58  ;;  %v1258_v14 = vor.u32 %v1257_v22, %v1256_v5  ;;  %vm1262_vm14 = vcmp.lt.s32.totalorder %v5851_v3, 4 }
 0x1a5   : >> { %v1387_v26 = vadd.s32 %v5809_v50, %v5806_v27  ;;  %v1397_v28 = vsub.s32 0, %v5874_v51  ;;  %vm1259_vm5 = vcmp.lt.s32.totalorder %v5851_v3, 1  ;;  %v1264_v57 = vsel %vm1262_vm14, %v1252_v15, 2102212464 }
 0x1a6   : >> { %vm1261_vm7 = vcmp.lt.s32.totalorder %v5851_v3, 3  ;;  %v1268_v12 = vsel %vm1262_vm14, %v1255_v47, 920167782  ;;  %v5889_v2 = vmul.f32 %v2328_v63, %v2320_v44  ;;  %v2344_v20 = vmul.f32 %v2328_v63, %v5848_v4 }
 0x1a7   : >> { %v4506_v46 = vpop.eup %4505  ;;  %v4246_v41 = vmin.u32 %v1397_v28, %v5874_v51  ;;  %v1263_v27 = vsel %vm1259_vm5, %v1243_v11, %v1246_v60  ;;  %v1265_v50 = vsel %vm1261_vm7, %v1249_v7, %v1264_v57  ;;  %v2496_v53 = vrot.slane %v2320_v44, 5 }
 0x1a8   : >> { %v4508_v24 = vpop.eup %4507  ;;  %v1119_v33 = vxor.u32 2147483648, %v4506_v46  ;;  %vm1260_vm0 = vcmp.lt.s32.totalorder %v5851_v3, 2  ;;  %v1267_v18 = vsel %vm1259_vm5, %v1246_v60, %v1249_v7  ;;  %v1272_v0 = vsel %vm1262_vm14, %v1258_v14, 1326507024 }
 0x1a9   : >> { %v1116_v56 = vxor.u32 2147483648, %v4508_v24  ;;  %v1399_v58 = vclz %v4246_v41  ;;  %v1269_v13 = vsel %vm1261_vm7, %v1252_v15, %v1268_v12  ;;  %v1271_v23 = vsel %vm1259_vm5, %v1249_v7, %v1252_v15 }
 0x1aa   : >> { %v1120_v59 = vsel %vm1118_vm6, %v1119_v33, %v4508_v24  ;;  %v1947_v55 = vsel %vm1945_vm15, %v1119_v33, %v4508_v24  ;;  %v1417_v19 = vsub.s32 4, %v5856_v36  ;;  %v5913_v21 = vsel %vm1260_vm0, %v1263_v27, %v1265_v50 }
 0x1ab   : >> { %v1117_v5 = vsel %vm1115_vm10, %v4506_v46, %v1116_v56  ;;  %v1944_v22 = vsel %vm1942_vm2, %v4506_v46, %v1116_v56  ;;  %v4247_v40 = vadd.s32 4294967294, %v1399_v58  ;;  %v1273_v44 = vsel %vm1261_vm7, %v1255_v47, %v1272_v0 }
 0x1ac   : >> { %v1121_v63 = vsel %vm1114_vm13, %v1117_v5, %v1120_v59  ;;  %v1948_v11 = vsel %vm1941_vm9, %v1944_v22, %v1947_v55  ;;  %v1270_v15 = vsel %vm1260_vm0, %v1267_v18, %v1269_v13  ;;  %v1274_v60 = vsel %vm1260_vm0, %v1271_v23, %v1273_v44 }
 0x1ad   : >> { %v1122_v7 = vsel %vm1111_vm11, nan, %v1121_v63  ;;  %v1949_v14 = vsel %vm1111_vm11, nan, %v1948_v11  ;;  %vm4248_vm2 = vcmp.lt.s32.totalorder %v4247_v40, 0  ;;  %v2352_v47 = vsub.f32 1.0, %v2344_v20 }
 0x1ae   : >> { %v2263_v28 = vmul.f32 2.0, %v1122_v7  ;;  %v2399_v25 = vrot.slane %v1122_v7, 4  ;;  %v2423_v57 = vrot.slane %v1949_v14, 1  ;;  %v1402_v12 = vsel %vm4248_vm2, 0, %v4247_v40 }
 0x1af   : >> { %v1403_v9 = vsub.s32 32, %v1402_v12  ;;  %v1404_v46 = vshll.u32 %v5874_v51, %v1402_v12  ;;  %v1407_v41 = vsub.s32 4294967266, %v1402_v12  ;;  %v2360_v27 = vmul.f32 2.0, %v5889_v2 }
 0x1b0   : >> { %v2271_v3 = vmul.f32 %v2263_v28, %v1949_v14  ;;  %v2279_v50 = vmul.f32 %v2263_v28, %v1122_v7  ;;  %v2617_v24 = vsel %vm2612_vm3, %v5836_v52, %v2399_v25  ;;  %v2520_v33 = vrot.slane %v5889_v2, 2 }
 0x1b1   : >> { %vm6501_vm0 = vcmask 1046528   ;;  %v1405_v20 = vshrl.u32 %v1387_v26, %v1403_v9  ;;  %v1408_v0 = vadd.s32 127, %v1407_v41  ;;  %v2368_v56 = vmul.f32 %v2360_v27, %v2352_v47 }
 0x1b2   : >> { %v2626_v18 = vsel %vm6501_vm0, %v2617_v24, %v2423_v57  ;;  %v2287_v58 = vsub.f32 1.0, %v2279_v50  ;;  %v2447_v13 = vrot.slane %v2271_v3, 6  ;;  %vm6502_vm13 = vcmask 1041408   ;;  %vm6504_vm11 = vmmov %vm6501_vm0 }
 0x1b3   : >> { %v5940_v23 = vmul.u32.u64.low %v5877_v45, %v1274_v60  ;;  %v5941_v51 = vmul.u32.u64.high %v5877_v45, %v1274_v60, %v5940_v23  ;;  %v1406_v59 = vor.u32 %v1405_v20, %v1404_v46  ;;  %v1409_v55 = vshll.u32 %v1408_v0, 23 }
 0x1b4   : >> { %v5944_v5 = vmul.u32.u64.low %v5877_v45, %v1270_v15  ;;  %v5945_v22 = vmul.u32.u64.high %v5877_v45, %v1270_v15, %v5944_v5  ;;  %v2471_v52 = vrot.slane %v2287_v58, 3  ;;  %v2635_v40 = vsel %vm6502_vm13, %v2423_v57, %v2447_v13  ;;  %vm6507_vm13 = vmmov %vm6504_vm11 }
 0x1b5   : >> { %v2376_v26 = vmul.f32 %v2360_v27, %v5889_v2  ;;  %v2544_v44 = vrot.slane %v2352_v47, 7  ;;  %v1410_v63 = vor.u32 4788187, %v1409_v55  ;;  %v1413_v11 = vcvt.s32.f32 %v1406_v59 }
 0x1b6   : >> { %v2568_v7 = vrot.slane %v2368_v56, 4  ;;  %vm6503_vm10 = vcmask 1042432   ;;  %v2644_v14 = vsel %vm2639_vm8, %v2635_v40, %v2471_v52  ;;  %v1282_v28 = vmul.u32 %v5877_v45, %v5913_v21 }
 0x1b7   : >> { %v2653_v60 = vsel %vm6503_vm10, %v5848_v4, %v2496_v53  ;;  %vm1284_vm9 = vc.u32 %v5941_v51, %v5944_v5  ;;  %v2384_v15 = vsub.f32 1.0, %v2376_v26  ;;  %v2702_v25 = vpack.c.bf16 %v2644_v14, %v2626_v18  ;;  %vm6506_vm14 = vmmov %vm6503_vm10 }
 0x1b8   : >> { %vm1333_vm15 = vcmp.lt.s32.totalorder %v5647_v49, 0  ;;  %v1411_v2 = vand.u32 2147483647, %v1410_v63  ;;  %v1285_v47 = vadd.s32 1, %v5945_v22  ;;  %v2662_v12 = vsel %vm2656_vm4, %v2653_v60, %v2520_v33 }
 0x1b9   : >> { %v2592_v57 = vrot.slane %v2384_v15, 1  ;;  %v2671_v4 = vsel %vm2665_vm12, %v2520_v33, %v2544_v44  ;;  %v2295_v53 = vmul.f32 2.0, %v2271_v3  ;;  %2902 = vmatpush1.bf16.msra.mxu0 %v2702_v25  ;;  %v1418_v45 = vsel %vm1333_vm15, %v1417_v19, %v5856_v36 }
 0x1ba   : >> { %v1414_v9 = vmul.f32 %v1413_v11, %v1411_v2  ;;  %v1286_v21 = vsel %vm1284_vm9, %v1285_v47, %v5945_v22  ;;  %v2679_v46 = vsel %vm2612_vm3, %v2671_v4, %v2568_v7  ;;  %v6505_v18 = vand.u32 2147483647, %v5647_v49 }
 0x1bb   : >> { %v1287_v41 = vadd.s32 %v1286_v21, %v1282_v28  ;;  %v2687_v27 = vsel %vm6504_vm11, %v2679_v46, %v2592_v57  ;;  %v2303_v50 = vmul.f32 %v2295_v53, %v2287_v58  ;;  %v2311_v24 = vmul.f32 %v2295_v53, %v2271_v3 }
 0x1bc   : >> { %vm1332_vm6 = vcmp.le.f32.partialorder %v6505_v18, 0.7853982  ;;  %v1415_v33 = vxor.u32 2147483648, %v1414_v9  ;;  %v2711_v20 = vpack.c.bf16 %v2687_v27, %v2662_v12  ;;  %vm1423_vm5 = vweird.f32 %v5647_v49 }
 0x1bd   : >> { %v1288_v0 = vadd.s32 536870912, %v1287_v41  ;;  %v2319_v56 = vsub.f32 1.0, %v2311_v24  ;;  %v2327_v13 = vmul.f32 2.0, %v2303_v50  ;;  %v1420_v19 = vsel %vm1332_vm6, 0, %v1418_v45 }
 0x1be   : >> { %v1416_v36 = vsel %vm1333_vm15, %v1415_v33, %v1414_v9  ;;  %2903 = vmatprep.subr.bf16.mxu0 %v2711_v20  ;;  %v1424_v40 = vadd.s32 3, %v1420_v19  ;;  %v2249_v14 = vand.u32 3, %v1420_v19  ;;  %v4306_v27 = vpack.c.bf16 %v6482_v39, %v2592_v57 }
 0x1bf   : >> { %v1419_v23 = vsel %vm1332_vm6, %v5647_v49, %v1416_v36  ;;  %v5972_v59 = vshrl.u32 %v1288_v0, 30  ;;  %v2335_v55 = vmul.f32 %v2327_v13, %v2319_v56  ;;  %v2343_v58 = vmul.f32 %v2327_v13, %v2303_v50  ;;  %vm6508_vm6 = vmmov %vm6506_vm14 }
 0x1c0   : >> { %4509 = vcosq.f32 %v1419_v23  ;;  %v2495_v52 = vrot.slane %v2319_v56, 5  ;;  %v1425_v2 = vand.u32 3, %v1424_v40  ;;  %vm2251_vm7 = vcmp.eq.s32.totalorder %v2249_v14, 0 }
 0x1c1   : >> { %4511 = vsinq.f32 %v1419_v23  ;;  %v1290_v3 = vshll.u32 %v5972_v59, 30  ;;  %v2351_v22 = vsub.f32 1.0, %v2343_v58  ;;  %v2359_v26 = vmul.f32 2.0, %v2335_v55 }
 0x1c2   : >> { %v2519_v44 = vrot.slane %v2335_v55, 2  ;;  %v2652_v15 = vsel %vm6506_vm14, %v2303_v50, %v2495_v52  ;;  %vm1430_vm2 = vcmp.eq.s32.totalorder %v1425_v2, 2  ;;  %vm2254_vm0 = vcmp.eq.s32.totalorder %v2249_v14, 2 }
 0x1c3   : >> { %v1291_v63 = vsub.s32 %v1287_v41, %v1290_v3  ;;  %v2543_v11 = vrot.slane %v2351_v22, 7  ;;  %v2367_v7 = vmul.f32 %v2359_v26, %v2351_v22  ;;  %v2375_v60 = vmul.f32 %v2359_v26, %v2335_v55 }
 0x1c4   : >> { %v2661_v9 = vsel %vm2656_vm4, %v2652_v15, %v2519_v44  ;;  %vm1427_vm10 = vcmp.eq.s32.totalorder %v1425_v2, 0  ;;  %vm1426_vm9 = vcmp.lt.s32.totalorder %v1425_v2, 2  ;;  %vm2250_vm15 = vcmp.lt.s32.totalorder %v2249_v14, 2 }
 0x1c5   : >> { %v1293_v28 = vsub.s32 0, %v1291_v63  ;;  %v2670_v25 = vsel %vm2665_vm12, %v2519_v44, %v2543_v11  ;;  %v2383_v47 = vsub.f32 1.0, %v2375_v60  ;;  %v2567_v12 = vrot.slane %v2367_v7, 4 }
 0x1c6   : >> { %v1283_v0 = vadd.s32 %v5944_v5, %v5941_v51  ;;  %v2611_v44 = vsel %vm6508_vm6, %v5647_v49, 1.0  ;;  %vm6509_vm14 = vcmask 392192  }
 0x1c7   : >> { %v4242_v4 = vmin.u32 %v1293_v28, %v1291_v63  ;;  %v2591_v53 = vrot.slane %v2383_v47, 1  ;;  %v2678_v45 = vsel %vm2612_vm3, %v2670_v25, %v2567_v12 }
 0x1c9   : >> { %v1295_v21 = vclz %v4242_v4  ;;  %v2686_v41 = vsel %vm6507_vm13, %v2678_v45, %v2591_v53  ;;  %v4309_v36 = vpack.c.bf16 %v6482_v39, %v2591_v53 }
 0x1ca   : >> { %v4510_v46 = vpop.eup %4509  ;;  %v2710_v33 = vpack.c.bf16 %v2686_v41, %v2661_v9  ;;  %v1313_v41 = vsub.s32 4, %v5972_v59 }
 0x1cb   : >> { %v4512_v50 = vpop.eup %4511  ;;  %v1431_v24 = vxor.u32 2147483648, %v4510_v46  ;;  %v4243_v18 = vadd.s32 4294967294, %v1295_v21 }
 0x1cc   : >> { %v1428_v20 = vxor.u32 2147483648, %v4512_v50  ;;  %2904 = vmatpush1.bf16.msra.mxu0 %v2710_v33 }
 0x1cd   : >> { %v1432_v56 = vsel %vm1430_vm2, %v1431_v24, %v4512_v50  ;;  %v2256_v13 = vsel %vm2254_vm0, %v1431_v24, %v4512_v50  ;;  %vm4244_vm11 = vcmp.lt.s32.totalorder %v4243_v18, 0  ;;  %4307 = vmatprep.subr.msk.bf16.mxu0 %vm5405_vm1, %v4306_v27  ;;  %vm1229_vm2 = vcmp.lt.s32.totalorder %v5693_v48, 0 }
 0x1ce   : >> { %v1429_v19 = vsel %vm1427_vm10, %v4510_v46, %v1428_v20  ;;  %v2253_v57 = vsel %vm2251_vm7, %v4510_v46, %v1428_v20  ;;  %v1298_v23 = vsel %vm4244_vm11, 0, %v4243_v18  ;;  %vm6511_vm7 = vcmask 1041408  }
 0x1cf   : >> { %v1433_v55 = vsel %vm1426_vm9, %v1429_v19, %v1432_v56  ;;  %v2257_v58 = vsel %vm2250_vm15, %v2253_v57, %v2256_v13  ;;  %v1299_v3 = vsub.s32 32, %v1298_v23  ;;  %v1300_v22 = vshll.u32 %v1291_v63, %v1298_v23 }
 0x1d0   : >> { %v1434_v51 = vsel %vm1423_vm5, nan, %v1433_v55  ;;  %v2258_v5 = vsel %vm1423_vm5, nan, %v2257_v58  ;;  %v1303_v52 = vsub.s32 4294967266, %v1298_v23  ;;  %4310 = vmatpush1.bf16.msk.msra.mxu0 %vm5405_vm1, %v4309_v36  ;;  %vm6510_vm5 = vmmov %vm6507_vm13  ;;  %v6512_v20 = vand.u32 2147483647, %v5693_v48 }
 0x1d1   : >> { %v2266_v40 = vmul.f32 2.0, %v1434_v51  ;;  %v2402_v26 = vrot.slane %v1434_v51, 4  ;;  %v1301_v11 = vshrl.u32 %v1283_v0, %v1299_v3  ;;  %v2426_v63 = vrot.slane %v2258_v5, 1  ;;  %vm6513_vm13 = vmmov %vm6509_vm14 }
 0x1d2   : >> { %v1304_v7 = vadd.s32 127, %v1303_v52  ;;  %vm1228_vm0 = vcmp.le.f32.partialorder %v6512_v20, 0.7853982  ;;  %v1314_v56 = vsel %vm1229_vm2, %v1313_v41, %v5972_v59  ;;  %vm6514_vm10 = vmmov %vm6513_vm13 }
 0x1d3   : >> { %v2274_v60 = vmul.f32 %v2266_v40, %v2258_v5  ;;  %v2282_v14 = vmul.f32 %v2266_v40, %v1434_v51  ;;  %v1302_v28 = vor.u32 %v1301_v11, %v1300_v22  ;;  %v2620_v15 = vsel %vm2612_vm3, %v2611_v44, %v2402_v26  ;;  %4311 = vmatmul.mubr.msk.bf16.vlgmr.msra.gmra.mrb[16].mxu0 %vm6509_vm14, %v5427_v35 }
 0x1d4   : >> { %v1305_v25 = vshll.u32 %v1304_v7, 23  ;;  %2943 = vmatprep.mubr.bf16.mxu0 %v6479_v32  ;;  %v2629_v45 = vsel %vm6510_vm5, %v2620_v15, %v2426_v63  ;;  %v1316_v23 = vsel %vm1228_vm0, 0, %v1314_v56 }
 0x1d5   : >> { %v2290_v2 = vsub.f32 1.0, %v2282_v14  ;;  %v2450_v47 = vrot.slane %v2274_v60, 6  ;;  %v1309_v4 = vcvt.s32.f32 %v1302_v28  ;;  %v2298_v53 = vmul.f32 2.0, %v2274_v60 }
 0x1d6   : >> { %v1306_v12 = vor.u32 4788187, %v1305_v25  ;;  %v1320_v55 = vadd.s32 3, %v1316_v23  ;;  %v2146_v22 = vand.u32 3, %v1316_v23 }
 0x1d7   : >> { %v2474_v9 = vrot.slane %v2290_v2, 3  ;;  %v2638_v21 = vsel %vm6511_vm7, %v2426_v63, %v2450_v47  ;;  %v2306_v18 = vmul.f32 %v2298_v53, %v2290_v2  ;;  %v2314_v33 = vmul.f32 %v2298_v53, %v2274_v60  ;;  %vm6515_vm7 = vmmov %vm6514_vm10 }
 0x1d8   : >> { %v1307_v46 = vand.u32 2147483647, %v1306_v12  ;;  %v1321_v59 = vand.u32 3, %v1320_v55  ;;  %vm2147_vm15 = vcmp.lt.s32.totalorder %v2146_v22, 2  ;;  %vm2151_vm11 = vcmp.eq.s32.totalorder %v2146_v22, 2 }
 0x1d9   : >> { %v2647_v27 = vsel %vm2639_vm8, %v2638_v21, %v2474_v9  ;;  %v2322_v36 = vsub.f32 1.0, %v2314_v33  ;;  %v2330_v19 = vmul.f32 2.0, %v2306_v18  ;;  %vm2148_vm14 = vcmp.eq.s32.totalorder %v2146_v22, 0 }
 0x1da   : >> { %v2705_v50 = vpack.c.bf16 %v2647_v27, %v2629_v45  ;;  %v1310_v24 = vmul.f32 %v1309_v4, %v1307_v46  ;;  %vm1326_vm9 = vcmp.eq.s32.totalorder %v1321_v59, 2  ;;  %vm1323_vm6 = vcmp.eq.s32.totalorder %v1321_v59, 0 }
 0x1db   : >> { %4312 = vmatmul.mubr.msk.bf16.gmra.mrb[20].mxu0 %vm6513_vm13, %v5520_v43  ;;  %v2338_v58 = vmul.f32 %v2330_v19, %v2322_v36  ;;  %v2346_v3 = vmul.f32 %v2330_v19, %v2306_v18  ;;  %vm1322_vm5 = vcmp.lt.s32.totalorder %v1321_v59, 2  ;;  %v2498_v47 = vrot.slane %v2322_v36, 5 }
 0x1dc   : >> { %2974 = vmatprep.subr.bf16.mxu1 %v2705_v50  ;;  %v1311_v0 = vxor.u32 2147483648, %v1310_v24  ;;  %2953 = vmatprep.mubr.bf16.mxu0 %v6479_v32 }
 0x1dd   : >> { %v2362_v51 = vmul.f32 2.0, %v2338_v58  ;;  %v2354_v5 = vsub.f32 1.0, %v2346_v3  ;;  %v2522_v60 = vrot.slane %v2338_v58, 2 }
 0x1de   : >> { %v1312_v13 = vsel %vm1229_vm2, %v1311_v0, %v1310_v24  ;;  %vm1319_vm2 = vweird.f32 %v5693_v48 }
 0x1df   : >> { %v1315_v57 = vsel %vm1228_vm0, %v5693_v48, %v1312_v13  ;;  %v2378_v40 = vmul.f32 %v2362_v51, %v2338_v58  ;;  %v2370_v11 = vmul.f32 %v2362_v51, %v2354_v5  ;;  %v2546_v14 = vrot.slane %v2354_v5, 7 }
 0x1e0   : >> { %4513 = vcosq.f32 %v1315_v57  ;;  %vm6516_vm0 = vcmask 1042432  }
 0x1e1   : >> { %4515 = vsinq.f32 %v1315_v57  ;;  %v2386_v2 = vsub.f32 1.0, %v2378_v40  ;;  %v2570_v53 = vrot.slane %v2370_v11, 4  ;;  %v2610_v21 = vsel %vm6516_vm0, %v5693_v48, 1.0  ;;  %vm6517_vm13 = vmmov %vm6516_vm0 }
 0x1e2   : >> { %v2673_v46 = vsel %vm2665_vm12, %v2522_v60, %v2546_v14  ;;  %v2655_v33 = vsel %vm6517_vm13, %v2306_v18, %v2498_v47 }
 0x1e3   : >> { %4313 = vmatmul.mubr.msk.bf16.gmra.mrb[24].mxu0 %vm6514_vm10, %v5701_v54  ;;  %v2594_v24 = vrot.slane %v2386_v2, 1  ;;  %v2681_v13 = vsel %vm2612_vm3, %v2673_v46, %v2570_v53  ;;  %vm6518_vm10 = vcmask 1046528   ;;  %v2664_v55 = vsel %vm2656_vm4, %v2655_v33, %v2522_v60 }
 0x1e4   : >> { %2963 = vmatprep.mubr.bf16.mxu0 %v6479_v32 }
 0x1e5   : >> { %v4316_v46 = vpack.c.bf16 %v6482_v39, %v2594_v24 }
 0x1ea   : >> { %v4514_v52 = vpop.eup %4513 }
 0x1eb   : >> { %v4516_v26 = vpop.eup %4515  ;;  %v1327_v44 = vxor.u32 2147483648, %v4514_v52  ;;  %4314 = vmatmul.mubr.msk.bf16.gmra.mrb[28].mxu0 %vm6515_vm7, %v5821_v42 }
 0x1ec   : >> { %v1324_v7 = vxor.u32 2147483648, %v4516_v26  ;;  %3208 = vmatprep.mubr.bf16.mxu0 %v6479_v32 }
 0x1ed   : >> { %v1328_v63 = vsel %vm1326_vm9, %v1327_v44, %v4516_v26  ;;  %v2153_v28 = vsel %vm2151_vm11, %v1327_v44, %v4516_v26  ;;  %vm6519_vm9 = vmmov %vm6518_vm10 }
 0x1ee   : >> { %v1325_v15 = vsel %vm1323_vm6, %v4514_v52, %v1324_v7  ;;  %v2150_v25 = vsel %vm2148_vm14, %v4514_v52, %v1324_v7  ;;  %v2689_v58 = vsel %vm6519_vm9, %v2681_v13, %v2594_v24  ;;  %vm6521_vm11 = vmmov %vm6516_vm0 }
 0x1ef   : >> { %v1329_v12 = vsel %vm1322_vm5, %v1325_v15, %v1328_v63  ;;  %v2154_v4 = vsel %vm2147_vm15, %v2150_v25, %v2153_v28  ;;  %vm6520_vm15 = vcmask 1041408   ;;  %v2713_v5 = vpack.c.bf16 %v2689_v58, %v2664_v55  ;;  %vm6522_vm6 = vmmov %vm6519_vm9 }
 0x1f0   : >> { %v1330_v9 = vsel %vm1319_vm2, nan, %v1329_v12  ;;  %v2155_v45 = vsel %vm1319_vm2, nan, %v2154_v4  ;;  %vm3163_vm5 = vcmask 523264  }
 0x1f1   : >> { %v2265_v41 = vmul.f32 2.0, %v1330_v9  ;;  %v2401_v27 = vrot.slane %v1330_v9, 4  ;;  %v2425_v50 = vrot.slane %v2155_v45, 1 }
 0x1f3   : >> { %v2273_v20 = vmul.f32 %v2265_v41, %v2155_v45  ;;  %v2281_v0 = vmul.f32 %v2265_v41, %v1330_v9  ;;  %v2619_v56 = vsel %vm2612_vm3, %v2610_v21, %v2401_v27 }
 0x1f4   : >> { %v2628_v23 = vsel %vm6518_vm10, %v2619_v56, %v2425_v50 }
 0x1f5   : >> { %v2289_v36 = vsub.f32 1.0, %v2281_v0  ;;  %v2449_v19 = vrot.slane %v2273_v20, 6  ;;  %v2297_v57 = vmul.f32 2.0, %v2273_v20 }
 0x1f7   : >> { %v2473_v3 = vrot.slane %v2289_v36, 3  ;;  %v2637_v59 = vsel %vm6520_vm15, %v2425_v50, %v2449_v19  ;;  %v2305_v22 = vmul.f32 %v2297_v57, %v2289_v36  ;;  %v2313_v18 = vmul.f32 %v2297_v57, %v2273_v20 }
 0x1f9   : >> { %v2646_v51 = vsel %vm2639_vm8, %v2637_v59, %v2473_v3  ;;  %v2321_v52 = vsub.f32 1.0, %v2313_v18  ;;  %v2329_v40 = vmul.f32 2.0, %v2305_v22 }
 0x1fa   : >> { %v2704_v26 = vpack.c.bf16 %v2646_v51, %v2628_v23 }
 0x1fb   : >> { %v2337_v44 = vmul.f32 %v2329_v40, %v2321_v52  ;;  %v2345_v11 = vmul.f32 %v2329_v40, %v2305_v22  ;;  %v2497_v7 = vrot.slane %v2321_v52, 5 }
 0x1fc   : >> { %2975 = vmatpush1.bf16.msra.mxu1 %v2704_v26 }
 0x1fd   : >> { %2976 = vmatprep.subr.bf16.mxu1 %v2713_v5  ;;  %v2353_v14 = vsub.f32 1.0, %v2345_v11  ;;  %v2361_v60 = vmul.f32 2.0, %v2337_v44  ;;  %v2521_v63 = vrot.slane %v2337_v44, 2  ;;  %v2654_v2 = vsel %vm6521_vm11, %v2305_v22, %v2497_v7 }
 0x1ff   : >> { %v2369_v28 = vmul.f32 %v2361_v60, %v2353_v14  ;;  %v2377_v15 = vmul.f32 %v2361_v60, %v2337_v44  ;;  %v2545_v25 = vrot.slane %v2353_v14, 7  ;;  %v2663_v9 = vsel %vm2656_vm4, %v2654_v2, %v2521_v63  ;;  %vm6523_vm4 = vmmov %vm6515_vm7 }
 0x200   : > { %vm6565_vm7 = vcmask (%p504_p4), 1042432  }
 0x201   : >> { %v2385_v47 = vsub.f32 1.0, %v2377_v15  ;;  %v2569_v12 = vrot.slane %v2369_v28, 4  ;;  %v2672_v4 = vsel %vm2665_vm12, %v2521_v63, %v2545_v25  ;;  %vm6524_vm12 = vmmov %vm6523_vm4 }
 0x202   : > { %vm6566_vm2 = vmmov (%p504_p4), %vm6565_vm7 }
 0x203   : >> { %v2593_v53 = vrot.slane %v2385_v47, 1  ;;  %v2680_v45 = vsel %vm2612_vm3, %v2672_v4, %v2569_v12 }
 0x205   : >> { %v2688_v21 = vsel %vm6522_vm6, %v2680_v45, %v2593_v53  ;;  %v4319_v27 = vpack.c.bf16 %v6482_v39, %v2593_v53 }
 0x206   : >> { %v2712_v41 = vpack.c.bf16 %v2688_v21, %v2663_v9 }
 0x208   : >> { %2977 = vmatpush1.bf16.msra.mxu1 %v2712_v41  ;;  %v2789_v50 = vpop.f32.mrb[0].mxu0 }
 0x209   : >> { %4317 = vmatprep.subr.msk.bf16.mxu1 %vm5405_vm1, %v4316_v46  ;;  %v2791_v33 = vpop.f32.mrb[1].mxu0  ;;  %v3047_v0 = vmax.f32 %v2789_v50, 0.0 }
 0x20a   : >> { %v2793_v20 = vpop.f32.mrb[2].mxu0  ;;  %v3048_v36 = vmax.f32 %v2791_v33, 0.0 }
 0x20b   : >> { %v3055_v56 = vmax.f32 %v2793_v20, 0.0  ;;  %v2795_v13 = vpop.f32.mrb[3].mxu0 }
 0x20c   : >> { %4320 = vmatpush1.bf16.msk.msra.mxu1 %vm5405_vm1, %v4319_v27  ;;  %v3056_v19 = vmax.f32 %v2795_v13, 0.0  ;;  %vm6525_vm1 = vmmov %vm6523_vm4 }
 0x20d   : >> { %v3111_v24 = vpack.c.bf16 %v3055_v56, %v3047_v0  ;;  %vm6526_vm14 = vmmov %vm6525_vm1 }
 0x20e   : >> { %v3112_v39 = vpack.c.bf16 %v3056_v19, %v3048_v36 }
 0x20f   : >> { %4321 = vmatmul.mubr.msk.bf16.vlgmr.msra.gmra.mrb[16].mxu1 %vm6523_vm4, %v5427_v35 }
 0x210   : >> { %3016 = vmatprep.mubr.bf16.mxu1 %v6479_v32  ;;  %3176 = vmatprep.subr.bf16.mxu0 %v3112_v39 }
 0x211   : >> { %3177 = vmatpush1.bf16.msra.mxu0 %v3111_v24 }
 0x217   : >> { %4322 = vmatmul.mubr.msk.bf16.gmra.mrb[20].mxu1 %vm6524_vm12, %v5520_v43 }
 0x218   : >> { %3026 = vmatprep.mubr.bf16.mxu1 %v6479_v32 }
 0x21f   : >> { %4323 = vmatmul.mubr.msk.bf16.gmra.mrb[24].mxu1 %vm6525_vm1, %v5701_v54 }
 0x220   : >> { %3036 = vmatprep.mubr.bf16.mxu1 %v6479_v32 }
 0x222   : >> { %v2799_v10 = vpop.f32.mrb[4].mxu0 }
 0x223   : >> { %v2801_v57 = vpop.f32.mrb[5].mxu0  ;;  %v3063_v35 = vmax.f32 %v2799_v10, 0.0 }
 0x224   : >> { %v2803_v23 = vpop.f32.mrb[6].mxu0  ;;  %v3064_v3 = vmax.f32 %v2801_v57, 0.0 }
 0x225   : >> { %v3071_v55 = vmax.f32 %v2803_v23, 0.0  ;;  %v2805_v58 = vpop.f32.mrb[7].mxu0 }
 0x226   : >> { %v3072_v59 = vmax.f32 %v2805_v58, 0.0 }
 0x227   : >> { %4324 = vmatmul.mubr.msk.bf16.gmra.mrb[28].mxu1 %vm6526_vm14, %v5821_v42  ;;  %v3119_v22 = vpack.c.bf16 %v3071_v55, %v3063_v35 }
 0x228   : >> { %3281 = vmatprep.mubr.bf16.mxu1 %v6479_v32  ;;  %v3120_v43 = vpack.c.bf16 %v3072_v59, %v3064_v3 }
 0x22a   : >> { %3178 = vmatprep.subr.bf16.mxu0 %v3120_v43 }
 0x22b   : >> { %3179 = vmatpush1.bf16.msra.mxu0 %v3119_v22 }
 0x24a   : >> { %v2862_v54 = vpop.f32.mrb[0].mxu1 }
 0x24b   : >> { %v3049_v18 = vmax.f32 %v2862_v54, 0.0  ;;  %v2864_v51 = vpop.f32.mrb[1].mxu1 }
 0x24c   : >> { %v3050_v5 = vmax.f32 %v2864_v51, 0.0  ;;  %v2866_v52 = vpop.f32.mrb[2].mxu1 }
 0x24d   : >> { %v3057_v40 = vmax.f32 %v2866_v52, 0.0  ;;  %v2868_v26 = vpop.f32.mrb[3].mxu1 }
 0x24e   : >> { %v3058_v44 = vmax.f32 %v2868_v26, 0.0  ;;  %v2809_v63 = vpop.f32.mrb[8].mxu0 }
 0x24f   : >> { %v3113_v11 = vpack.c.bf16 %v3057_v40, %v3049_v18  ;;  %v2811_v25 = vpop.f32.mrb[9].mxu0  ;;  %v3079_v53 = vmax.f32 %v2809_v63, 0.0  ;;  %v6528_v63 = vld [vmem:[#allocation15_spill] sm:$0xff] }
 0x250   : >> { %v3114_v7 = vpack.c.bf16 %v3058_v44, %v3050_v5  ;;  %v2813_v12 = vpop.f32.mrb[10].mxu0  ;;  %v3080_v46 = vmax.f32 %v2811_v25, 0.0  ;;  %v6530_v25 = vld [vmem:[#allocation17_spill] sm:$0xff] }
 0x251   : >> { %v3087_v9 = vmax.f32 %v2813_v12, 0.0  ;;  %v2815_v45 = vpop.f32.mrb[11].mxu0  ;;  %v6532_v12 = vld [vmem:[#allocation19_spill] sm:$0xff] }
 0x252   : >> { %v2872_v14 = vpop.f32.mrb[4].mxu1  ;;  %3249 = vmatprep.subr.bf16.mxu1 %v3114_v7  ;;  %v3088_v41 = vmax.f32 %v2815_v45, 0.0 }
 0x253   : >> { %v3065_v42 = vmax.f32 %v2872_v14, 0.0  ;;  %v2874_v60 = vpop.f32.mrb[5].mxu1  ;;  %3250 = vmatpush1.bf16.msra.mxu1 %v3113_v11  ;;  %v3127_v50 = vpack.c.bf16 %v3087_v9, %v3079_v53  ;;  %v6533_v53 = vld [vmem:[#allocation22_spill] sm:$0xff]  ;;  %v6534_v9 = vld [vmem:[#allocation21_spill] sm:$0xff] }
 0x254   : >> { %v3066_v28 = vmax.f32 %v2874_v60, 0.0  ;;  %v2876_v15 = vpop.f32.mrb[6].mxu1  ;;  %v3128_v33 = vpack.c.bf16 %v3088_v41, %v3080_v46  ;;  %v6527_v60 = vld [vmem:[#allocation16_spill] sm:$0xff]  ;;  %v6086_v45 = vcombine.low %v6534_v9, %v6533_v53 }
 0x255   : >> { %v3073_v2 = vmax.f32 %v2876_v15, 0.0  ;;  %v2878_v47 = vpop.f32.mrb[7].mxu1  ;;  %v6529_v15 = vld [vmem:[#allocation18_spill] sm:$0xff] }
 0x256   : >> { %v3074_v4 = vmax.f32 %v2878_v47, 0.0  ;;  %3180 = vmatprep.subr.bf16.mxu0 %v3128_v33  ;;  %v6531_v47 = vld [vmem:[#allocation20_spill] sm:$0xff] }
 0x257   : >> { %v3121_v21 = vpack.c.bf16 %v3073_v2, %v3065_v42  ;;  %3181 = vmatpush1.bf16.msra.mxu0 %v3127_v50  ;;  %v6066_v2 = vcombine.low %v6530_v25, %v6529_v15 }
 0x258   : >> { %v3122_v27 = vpack.c.bf16 %v3074_v4, %v3066_v28  ;;  %v6056_v28 = vcombine.low %v6528_v63, %v6527_v60  ;;  %v6076_v4 = vcombine.low %v6532_v12, %v6531_v47 }
 0x25a   : >> { %v2882_v20 = vpop.f32.mrb[8].mxu1  ;;  %3251 = vmatprep.subr.bf16.mxu1 %v3122_v27 }
 0x25b   : >> { %v3081_v0 = vmax.f32 %v2882_v20, 0.0  ;;  %v2884_v56 = vpop.f32.mrb[9].mxu1  ;;  %3252 = vmatpush1.bf16.msra.mxu1 %v3121_v21 }
 0x25c   : >> { %v3082_v13 = vmax.f32 %v2884_v56, 0.0  ;;  %v2886_v36 = vpop.f32.mrb[10].mxu1 }
 0x25d   : >> { %v3089_v19 = vmax.f32 %v2886_v36, 0.0  ;;  %v2888_v24 = vpop.f32.mrb[11].mxu1 }
 0x25e   : >> { %v3090_v39 = vmax.f32 %v2888_v24, 0.0 }
 0x25f   : >> { %v3129_v10 = vpack.c.bf16 %v3089_v19, %v3081_v0 }
 0x260   : >> { %v3130_v57 = vpack.c.bf16 %v3090_v39, %v3082_v13 }
 0x262   : >> { %3253 = vmatprep.subr.bf16.mxu1 %v3130_v57 }
 0x263   : >> { %3254 = vmatpush1.bf16.msra.mxu1 %v3129_v10 }
 0x26b   : >> { %v2819_v23 = vpop.f32.mrb[12].mxu0  ;;  %v2892_v35 = vpop.f32.mrb[12].mxu1 }
 0x26c   : >> { %v2821_v55 = vpop.f32.mrb[13].mxu0  ;;  %v3097_v58 = vmax.f32 %v2892_v35, 0.0  ;;  %v2894_v3 = vpop.f32.mrb[13].mxu1  ;;  %v3095_v54 = vmax.f32 %v2819_v23, 0.0 }
 0x26d   : >> { %v2823_v59 = vpop.f32.mrb[14].mxu0  ;;  %v3098_v22 = vmax.f32 %v2894_v3, 0.0  ;;  %v2896_v43 = vpop.f32.mrb[14].mxu1  ;;  %v3096_v40 = vmax.f32 %v2821_v55, 0.0 }
 0x26e   : >> { %v3103_v18 = vmax.f32 %v2823_v59, 0.0  ;;  %v2825_v51 = vpop.f32.mrb[15].mxu0  ;;  %v3105_v5 = vmax.f32 %v2896_v43, 0.0  ;;  %v2898_v52 = vpop.f32.mrb[15].mxu1 }
 0x26f   : >> { %v3104_v26 = vmax.f32 %v2825_v51, 0.0  ;;  %v3106_v44 = vmax.f32 %v2898_v52, 0.0 }
 0x270   : >> { %v3135_v11 = vpack.c.bf16 %v3103_v18, %v3095_v54  ;;  %v3137_v7 = vpack.c.bf16 %v3105_v5, %v3097_v58 }
 0x271   : >> { %v3136_v14 = vpack.c.bf16 %v3104_v26, %v3096_v40  ;;  %v3138_v42 = vpack.c.bf16 %v3106_v44, %v3098_v22 }
 0x273   : >> { %3182 = vmatprep.subr.bf16.mxu0 %v3136_v14  ;;  %3255 = vmatprep.subr.bf16.mxu1 %v3138_v42 }
 0x274   : >> { %3183 = vmatpush1.bf16.msra.mxu0 %v3135_v11  ;;  %3256 = vmatpush1.bf16.msra.mxu1 %v3137_v7 }
 0x277   : >> { %4329 = vmatmul.mubr.msk.bf16.vlgmr.msra.gmra.mrb[32].mxu0 %vm3163_vm5, %v6056_v28  ;;  %4333 = vmatmul.mubr.msk.bf16.vlgmr.msra.gmra.mrb[32].mxu1 %vm3163_vm5, %v6056_v28 }
 0x278   : >> { %3218 = vmatprep.mubr.bf16.mxu0 %v6479_v32  ;;  %3291 = vmatprep.mubr.bf16.mxu1 %v6479_v32 }
 0x27f   : >> { %4330 = vmatmul.mubr.msk.bf16.gmra.mrb[36].mxu0 %vm3163_vm5, %v6066_v2  ;;  %4334 = vmatmul.mubr.msk.bf16.gmra.mrb[36].mxu1 %vm3163_vm5, %v6066_v2 }
 0x280   : >> { %3228 = vmatprep.mubr.bf16.mxu0 %v6479_v32  ;;  %3301 = vmatprep.mubr.bf16.mxu1 %v6479_v32 }
 0x287   : >> { %4331 = vmatmul.mubr.msk.bf16.gmra.mrb[40].mxu0 %vm3163_vm5, %v6076_v4  ;;  %4335 = vmatmul.mubr.msk.bf16.gmra.mrb[40].mxu1 %vm3163_vm5, %v6076_v4 }
 0x288   : >> { %3238 = vmatprep.mubr.bf16.mxu0 %v6479_v32  ;;  %3311 = vmatprep.mubr.bf16.mxu1 %v6479_v32 }
 0x28f   : >> { %4332 = vmatmul.mubr.msk.bf16.gmra.mrb[44].mxu0 %vm3163_vm5, %v6086_v45  ;;  %4336 = vmatmul.mubr.msk.bf16.gmra.mrb[44].mxu1 %vm3163_vm5, %v6086_v45 }
 0x290   : >> { %3354 = vmatprep.mubr.bf16.mxu0 %v6479_v32  ;;  %3427 = vmatprep.mubr.bf16.mxu1 %v6479_v32 }
 0x2a6   : >> { %v2935_v21 = vpop.f32.mrb[16].mxu0 }
 0x2a7   : >> { %v2937_v46 = vpop.f32.mrb[17].mxu0  ;;  %v3051_v27 = vmax.f32 %v2935_v21, 0.0 }
 0x2a8   : >> { %v2939_v41 = vpop.f32.mrb[18].mxu0  ;;  %v3052_v20 = vmax.f32 %v2937_v46, 0.0 }
 0x2a9   : >> { %v3059_v50 = vmax.f32 %v2939_v41, 0.0  ;;  %v2941_v33 = vpop.f32.mrb[19].mxu0 }
 0x2aa   : >> { %v3060_v0 = vmax.f32 %v2941_v33, 0.0 }
 0x2ab   : >> { %v3115_v56 = vpack.c.bf16 %v3059_v50, %v3051_v27 }
 0x2ac   : >> { %v3116_v13 = vpack.c.bf16 %v3060_v0, %v3052_v20 }
 0x2ae   : >> { %v2945_v36 = vpop.f32.mrb[20].mxu0  ;;  %3322 = vmatprep.subr.bf16.mxu0 %v3116_v13 }
 0x2af   : >> { %v2947_v19 = vpop.f32.mrb[21].mxu0  ;;  %3323 = vmatpush1.bf16.msra.mxu0 %v3115_v56  ;;  %v3067_v39 = vmax.f32 %v2945_v36, 0.0 }
 0x2b0   : >> { %v2949_v24 = vpop.f32.mrb[22].mxu0  ;;  %v3068_v23 = vmax.f32 %v2947_v19, 0.0 }
 0x2b1   : >> { %v3075_v10 = vmax.f32 %v2949_v24, 0.0  ;;  %v2951_v57 = vpop.f32.mrb[23].mxu0 }
 0x2b2   : >> { %v3076_v35 = vmax.f32 %v2951_v57, 0.0 }
 0x2b3   : >> { %v3123_v55 = vpack.c.bf16 %v3075_v10, %v3067_v39 }
 0x2b4   : >> { %v3124_v58 = vpack.c.bf16 %v3076_v35, %v3068_v23 }
 0x2b6   : >> { %v2955_v3 = vpop.f32.mrb[24].mxu0  ;;  %3324 = vmatprep.subr.bf16.mxu0 %v3124_v58 }
 0x2b7   : >> { %v2957_v59 = vpop.f32.mrb[25].mxu0  ;;  %3325 = vmatpush1.bf16.msra.mxu0 %v3123_v55  ;;  %v3083_v43 = vmax.f32 %v2955_v3, 0.0 }
 0x2b8   : >> { %v2959_v22 = vpop.f32.mrb[26].mxu0  ;;  %v3084_v51 = vmax.f32 %v2957_v59, 0.0 }
 0x2b9   : >> { %v3091_v54 = vmax.f32 %v2959_v22, 0.0  ;;  %v2961_v18 = vpop.f32.mrb[27].mxu0 }
 0x2ba   : >> { %v3092_v5 = vmax.f32 %v2961_v18, 0.0 }
 0x2bb   : >> { %v3131_v52 = vpack.c.bf16 %v3091_v54, %v3083_v43 }
 0x2bc   : >> { %v3132_v40 = vpack.c.bf16 %v3092_v5, %v3084_v51 }
 0x2be   : >> { %v2965_v26 = vpop.f32.mrb[28].mxu0  ;;  %3326 = vmatprep.subr.bf16.mxu0 %v3132_v40 }
 0x2bf   : >> { %v2967_v44 = vpop.f32.mrb[29].mxu0  ;;  %3327 = vmatpush1.bf16.msra.mxu0 %v3131_v52  ;;  %v3099_v7 = vmax.f32 %v2965_v26, 0.0 }
 0x2c0   : >> { %v2969_v11 = vpop.f32.mrb[30].mxu0  ;;  %v3100_v60 = vmax.f32 %v2967_v44, 0.0 }
 0x2c1   : >> { %v3107_v14 = vmax.f32 %v2969_v11, 0.0  ;;  %v2971_v42 = vpop.f32.mrb[31].mxu0 }
 0x2c2   : >> { %v3108_v63 = vmax.f32 %v2971_v42, 0.0 }
 0x2c3   : >> { %v3139_v15 = vpack.c.bf16 %v3107_v14, %v3099_v7 }
 0x2c4   : >> { %v3140_v25 = vpack.c.bf16 %v3108_v63, %v3100_v60 }
 0x2c6   : >> { %3328 = vmatprep.subr.bf16.mxu0 %v3140_v25 }
 0x2c7   : >> { %3329 = vmatpush1.bf16.msra.mxu0 %v3139_v15 }
 0x2ca   : >> { %4337 = vmatmul.mubr.msk.bf16.vlgmr.msra.gmra.mrb[48].mxu0 %vm3163_vm5, %v6056_v28 }
 0x2cb   : >> { %3364 = vmatprep.mubr.bf16.mxu0 %v6479_v32 }
 0x2d2   : >> { %4338 = vmatmul.mubr.msk.bf16.gmra.mrb[52].mxu0 %vm3163_vm5, %v6066_v2 }
 0x2d3   : >> { %3374 = vmatprep.mubr.bf16.mxu0 %v6479_v32 }
 0x2da   : >> { %4339 = vmatmul.mubr.msk.bf16.gmra.mrb[56].mxu0 %vm3163_vm5, %v6076_v4 }
 0x2db   : >> { %3384 = vmatprep.mubr.bf16.mxu0 %v6479_v32 }
 0x2e2   : >> { %v3008_v47 = vpop.f32.mrb[16].mxu1  ;;  %4340 = vmatmul.mubr.msk.bf16.gmra.mrb[60].mxu0 %vm3163_vm5, %v6086_v45 }
 0x2e3   : >> { %v3053_v12 = vmax.f32 %v3008_v47, 0.0  ;;  %v3010_v53 = vpop.f32.mrb[17].mxu1  ;;  %3599 = vmatprep.mubr.bf16.mxu0 %v6479_v32 }
 0x2e4   : >> { %v3054_v9 = vmax.f32 %v3010_v53, 0.0  ;;  %v3012_v21 = vpop.f32.mrb[18].mxu1 }
 0x2e5   : >> { %v3061_v46 = vmax.f32 %v3012_v21, 0.0  ;;  %v3014_v41 = vpop.f32.mrb[19].mxu1  ;;  %v6536_v21 = vld [vmem:[#allocation27_spill] sm:$0xff] }
 0x2e6   : >> { %v3062_v27 = vmax.f32 %v3014_v41, 0.0 }
 0x2e7   : >> { %v3117_v50 = vpack.c.bf16 %v3061_v46, %v3053_v12 }
 0x2e8   : >> { %v3118_v33 = vpack.c.bf16 %v3062_v27, %v3054_v9 }
 0x2ea   : >> { %v3018_v20 = vpop.f32.mrb[20].mxu1  ;;  %3395 = vmatprep.subr.bf16.mxu1 %v3118_v33 }
 0x2eb   : >> { %v3069_v0 = vmax.f32 %v3018_v20, 0.0  ;;  %v3020_v56 = vpop.f32.mrb[21].mxu1  ;;  %3396 = vmatpush1.bf16.msra.mxu1 %v3117_v50 }
 0x2ec   : >> { %v3070_v13 = vmax.f32 %v3020_v56, 0.0  ;;  %v3022_v36 = vpop.f32.mrb[22].mxu1 }
 0x2ed   : >> { %v3077_v19 = vmax.f32 %v3022_v36, 0.0  ;;  %v3024_v24 = vpop.f32.mrb[23].mxu1 }
 0x2ee   : >> { %v3078_v39 = vmax.f32 %v3024_v24, 0.0 }
 0x2ef   : >> { %v3125_v10 = vpack.c.bf16 %v3077_v19, %v3069_v0 }
 0x2f0   : >> { %v3126_v57 = vpack.c.bf16 %v3078_v39, %v3070_v13 }
 0x2f2   : >> { %v3028_v23 = vpop.f32.mrb[24].mxu1  ;;  %3397 = vmatprep.subr.bf16.mxu1 %v3126_v57 }
 0x2f3   : >> { %v3085_v35 = vmax.f32 %v3028_v23, 0.0  ;;  %v3030_v55 = vpop.f32.mrb[25].mxu1  ;;  %3398 = vmatpush1.bf16.msra.mxu1 %v3125_v10 }
 0x2f4   : >> { %v3086_v58 = vmax.f32 %v3030_v55, 0.0  ;;  %v3032_v3 = vpop.f32.mrb[26].mxu1 }
 0x2f5   : >> { %v3093_v59 = vmax.f32 %v3032_v3, 0.0  ;;  %v3034_v22 = vpop.f32.mrb[27].mxu1  ;;  %v6537_v3 = vld [vmem:[#allocation24_spill] sm:$0xff] }
 0x2f6   : >> { %v3094_v43 = vmax.f32 %v3034_v22, 0.0 }
 0x2f7   : >> { %v3133_v54 = vpack.c.bf16 %v3093_v59, %v3085_v35 }
 0x2f8   : >> { %v3134_v18 = vpack.c.bf16 %v3094_v43, %v3086_v58 }
 0x2fa   : >> { %v3038_v51 = vpop.f32.mrb[28].mxu1  ;;  %3399 = vmatprep.subr.bf16.mxu1 %v3134_v18 }
 0x2fb   : >> { %v3101_v5 = vmax.f32 %v3038_v51, 0.0  ;;  %v3040_v52 = vpop.f32.mrb[29].mxu1  ;;  %3400 = vmatpush1.bf16.msra.mxu1 %v3133_v54 }
 0x2fc   : >> { %v3102_v40 = vmax.f32 %v3040_v52, 0.0  ;;  %v3042_v26 = vpop.f32.mrb[30].mxu1 }
 0x2fd   : >> { %v3109_v44 = vmax.f32 %v3042_v26, 0.0  ;;  %v3044_v11 = vpop.f32.mrb[31].mxu1 }
 0x2fe   : >> { %v3110_v7 = vmax.f32 %v3044_v11, 0.0 }
 0x2ff   : >> { %v3141_v14 = vpack.c.bf16 %v3109_v44, %v3101_v5 }
 0x300   : >> { %v3142_v42 = vpack.c.bf16 %v3110_v7, %v3102_v40  ;;  %v6538_v40 = vld [vmem:[#allocation26_spill] sm:$0xff] }
 0x302   : >> { %3401 = vmatprep.subr.bf16.mxu1 %v3142_v42 }
 0x303   : >> { %3402 = vmatpush1.bf16.msra.mxu1 %v3141_v14 }
 0x306   : >> { %4341 = vmatmul.mubr.msk.bf16.vlgmr.msra.gmra.mrb[48].mxu1 %vm3163_vm5, %v6056_v28  ;;  %v6535_v28 = vld [vmem:[#allocation25_spill] sm:$0xff] }
 0x307   : >> { %3437 = vmatprep.mubr.bf16.mxu1 %v6479_v32 }
 0x30e   : >> { %4342 = vmatmul.mubr.msk.bf16.gmra.mrb[52].mxu1 %vm3163_vm5, %v6066_v2 }
 0x30f   : >> { %3447 = vmatprep.mubr.bf16.mxu1 %v6479_v32 }
 0x316   : >> { %4343 = vmatmul.mubr.msk.bf16.gmra.mrb[56].mxu1 %vm3163_vm5, %v6076_v4 }
 0x317   : >> { %3457 = vmatprep.mubr.bf16.mxu1 %v6479_v32 }
 0x31e   : >> { %4344 = vmatmul.mubr.msk.bf16.gmra.mrb[60].mxu1 %vm3163_vm5, %v6086_v45 }
 0x31f   : >> { %3640 = vmatprep.mubr.bf16.mxu1 %v6479_v32 }
 0x34a   : >> { %v3210_v60 = vpop.f32.mrb[32].mxu0  ;;  %v3283_v63 = vpop.f32.mrb[32].mxu1 }
 0x34b   : >> { %v3211_v15 = vadd.f32 %v3210_v60, %v6535_v28  ;;  %v3212_v25 = vpop.f32.mrb[33].mxu0  ;;  %v3284_v47 = vadd.f32 %v3283_v63, %v6535_v28  ;;  %v3285_v2 = vpop.f32.mrb[33].mxu1 }
 0x34c   : >> { %v3213_v12 = vadd.f32 %v3212_v25, %v6535_v28  ;;  %v3214_v53 = vpop.f32.mrb[34].mxu0  ;;  %v3286_v4 = vadd.f32 %v3285_v2, %v6535_v28  ;;  %v3287_v9 = vpop.f32.mrb[34].mxu1 }
 0x34d   : >> { %v3215_v46 = vadd.f32 %v3214_v53, %v6536_v21  ;;  %v3216_v41 = vpop.f32.mrb[35].mxu0  ;;  %v3470_v45 = vmax.f32 %v3284_v47, 0.0  ;;  %v3288_v27 = vadd.f32 %v3287_v9, %v6536_v21  ;;  %v3289_v50 = vpop.f32.mrb[35].mxu1  ;;  %v3468_v56 = vmax.f32 %v3211_v15, 0.0 }
 0x34e   : >> { %v3217_v33 = vadd.f32 %v3216_v41, %v6536_v21  ;;  %v3471_v20 = vmax.f32 %v3286_v4, 0.0  ;;  %v3290_v0 = vadd.f32 %v3289_v50, %v6536_v21  ;;  %v3469_v19 = vmax.f32 %v3213_v12, 0.0  ;;  %v6539_v50 = vld [vmem:[#allocation29_spill] sm:$0xff] }
 0x34f   : >> { %v3476_v13 = vmax.f32 %v3215_v46, 0.0  ;;  %v3478_v36 = vmax.f32 %v3288_v27, 0.0 }
 0x350   : >> { %v3477_v24 = vmax.f32 %v3217_v33, 0.0  ;;  %v3479_v39 = vmax.f32 %v3290_v0, 0.0 }
 0x351   : >> { %v3532_v10 = vpack.c.bf16 %v3476_v13, %v3468_v56  ;;  %v3534_v57 = vpack.c.bf16 %v3478_v36, %v3470_v45 }
 0x352   : >> { %v3533_v23 = vpack.c.bf16 %v3477_v24, %v3469_v19  ;;  %v3220_v35 = vpop.f32.mrb[36].mxu0  ;;  %v3535_v55 = vpack.c.bf16 %v3479_v39, %v3471_v20  ;;  %v3293_v58 = vpop.f32.mrb[36].mxu1  ;;  %v6540_v39 = vld [vmem:[#allocation28_spill] sm:$0xff] }
 0x353   : >> { %v3221_v59 = vadd.f32 %v3220_v35, %v6537_v3  ;;  %v3222_v22 = vpop.f32.mrb[37].mxu0  ;;  %v3294_v43 = vadd.f32 %v3293_v58, %v6537_v3  ;;  %v3295_v54 = vpop.f32.mrb[37].mxu1 }
 0x354   : >> { %v3223_v18 = vadd.f32 %v3222_v22, %v6537_v3  ;;  %v3224_v51 = vpop.f32.mrb[38].mxu0  ;;  %3567 = vmatprep.subr.bf16.mxu0 %v3533_v23  ;;  %v3296_v5 = vadd.f32 %v3295_v54, %v6537_v3  ;;  %v3297_v52 = vpop.f32.mrb[38].mxu1  ;;  %3608 = vmatprep.subr.bf16.mxu1 %v3535_v55 }
 0x355   : >> { %v3225_v26 = vadd.f32 %v3224_v51, %v6538_v40  ;;  %v3226_v44 = vpop.f32.mrb[39].mxu0  ;;  %3568 = vmatpush1.bf16.msra.mxu0 %v3532_v10  ;;  %v3486_v11 = vmax.f32 %v3294_v43, 0.0  ;;  %v3298_v7 = vadd.f32 %v3297_v52, %v6538_v40  ;;  %v3299_v14 = vpop.f32.mrb[39].mxu1  ;;  %3609 = vmatpush1.bf16.msra.mxu1 %v3534_v57  ;;  %v3484_v15 = vmax.f32 %v3221_v59, 0.0 }
 0x356   : >> { %v3227_v42 = vadd.f32 %v3226_v44, %v6538_v40  ;;  %v3487_v60 = vmax.f32 %v3296_v5, 0.0  ;;  %v3300_v63 = vadd.f32 %v3299_v14, %v6538_v40  ;;  %v3485_v2 = vmax.f32 %v3223_v18, 0.0 }
 0x357   : >> { %v3492_v25 = vmax.f32 %v3225_v26, 0.0  ;;  %v3494_v47 = vmax.f32 %v3298_v7, 0.0 }
 0x358   : >> { %v3493_v12 = vmax.f32 %v3227_v42, 0.0  ;;  %v3495_v53 = vmax.f32 %v3300_v63, 0.0 }
 0x359   : >> { %v3540_v4 = vpack.c.bf16 %v3492_v25, %v3484_v15  ;;  %v3542_v9 = vpack.c.bf16 %v3494_v47, %v3486_v11 }
 0x35a   : >> { %v3541_v46 = vpack.c.bf16 %v3493_v12, %v3485_v2  ;;  %v3230_v41 = vpop.f32.mrb[40].mxu0  ;;  %v3543_v45 = vpack.c.bf16 %v3495_v53, %v3487_v60  ;;  %v3303_v27 = vpop.f32.mrb[40].mxu1  ;;  %v6541_v60 = vld [vmem:[#allocation31_spill] sm:$0xff] }
 0x35b   : >> { %v3231_v33 = vadd.f32 %v3230_v41, %v6539_v50  ;;  %v3232_v20 = vpop.f32.mrb[41].mxu0  ;;  %v3304_v0 = vadd.f32 %v3303_v27, %v6539_v50  ;;  %v3305_v56 = vpop.f32.mrb[41].mxu1 }
 0x35c   : >> { %v3233_v13 = vadd.f32 %v3232_v20, %v6539_v50  ;;  %v3234_v36 = vpop.f32.mrb[42].mxu0  ;;  %3569 = vmatprep.subr.bf16.mxu0 %v3541_v46  ;;  %v3306_v19 = vadd.f32 %v3305_v56, %v6539_v50  ;;  %v3307_v24 = vpop.f32.mrb[42].mxu1  ;;  %3610 = vmatprep.subr.bf16.mxu1 %v3543_v45 }
 0x35d   : >> { %v3235_v10 = vadd.f32 %v3234_v36, %v6540_v39  ;;  %v3236_v57 = vpop.f32.mrb[43].mxu0  ;;  %3570 = vmatpush1.bf16.msra.mxu0 %v3540_v4  ;;  %v3502_v23 = vmax.f32 %v3304_v0, 0.0  ;;  %v3308_v35 = vadd.f32 %v3307_v24, %v6540_v39  ;;  %v3309_v55 = vpop.f32.mrb[43].mxu1  ;;  %3611 = vmatpush1.bf16.msra.mxu1 %v3542_v9  ;;  %v3500_v43 = vmax.f32 %v3231_v33, 0.0  ;;  %v6542_v9 = vld [vmem:[#allocation30_spill] sm:$0xff] }
 0x35e   : >> { %v3237_v58 = vadd.f32 %v3236_v57, %v6540_v39  ;;  %v3503_v59 = vmax.f32 %v3306_v19, 0.0  ;;  %v3310_v22 = vadd.f32 %v3309_v55, %v6540_v39  ;;  %v3501_v51 = vmax.f32 %v3233_v13, 0.0 }
 0x35f   : >> { %v3508_v54 = vmax.f32 %v3235_v10, 0.0  ;;  %v3510_v18 = vmax.f32 %v3308_v35, 0.0 }
 0x360   : >> { %v3509_v5 = vmax.f32 %v3237_v58, 0.0  ;;  %v3511_v52 = vmax.f32 %v3310_v22, 0.0 }
 0x361   : >> { %v3548_v26 = vpack.c.bf16 %v3508_v54, %v3500_v43  ;;  %v3550_v44 = vpack.c.bf16 %v3510_v18, %v3502_v23 }
 0x362   : >> { %v3549_v11 = vpack.c.bf16 %v3509_v5, %v3501_v51  ;;  %v3240_v7 = vpop.f32.mrb[44].mxu0  ;;  %v3551_v14 = vpack.c.bf16 %v3511_v52, %v3503_v59  ;;  %v3313_v42 = vpop.f32.mrb[44].mxu1  ;;  %v6543_v59 = vld [vmem:[#allocation23_spill] sm:$0xff] }
 0x363   : >> { %v3241_v63 = vadd.f32 %v3240_v7, %v6541_v60  ;;  %v3242_v15 = vpop.f32.mrb[45].mxu0  ;;  %v3314_v25 = vadd.f32 %v3313_v42, %v6541_v60  ;;  %v3315_v47 = vpop.f32.mrb[45].mxu1  ;;  %v6544_v22 = vmov %v6543_v59 }
 0x364   : >> { %v3243_v2 = vadd.f32 %v3242_v15, %v6541_v60  ;;  %v3244_v12 = vpop.f32.mrb[46].mxu0  ;;  %3571 = vmatprep.subr.bf16.mxu0 %v3549_v11  ;;  %v3316_v53 = vadd.f32 %v3315_v47, %v6541_v60  ;;  %v3317_v4 = vpop.f32.mrb[46].mxu1  ;;  %3612 = vmatprep.subr.bf16.mxu1 %v3551_v14 }
 0x365   : >> { %v3245_v46 = vadd.f32 %v3244_v12, %v6542_v9  ;;  %v3246_v41 = vpop.f32.mrb[47].mxu0  ;;  %3572 = vmatpush1.bf16.msra.mxu0 %v3548_v26  ;;  %v3518_v45 = vmax.f32 %v3314_v25, 0.0  ;;  %v3318_v27 = vadd.f32 %v3317_v4, %v6542_v9  ;;  %v3319_v33 = vpop.f32.mrb[47].mxu1  ;;  %3613 = vmatpush1.bf16.msra.mxu1 %v3550_v44  ;;  %v3516_v13 = vmax.f32 %v3241_v63, 0.0 }
 0x366   : >> { %v3247_v20 = vadd.f32 %v3246_v41, %v6542_v9  ;;  %v3519_v0 = vmax.f32 %v3316_v53, 0.0  ;;  %v3320_v56 = vadd.f32 %v3319_v33, %v6542_v9  ;;  %v3517_v24 = vmax.f32 %v3243_v2, 0.0 }
 0x367   : >> { %v3524_v36 = vmax.f32 %v3245_v46, 0.0  ;;  %v3526_v19 = vmax.f32 %v3318_v27, 0.0 }
 0x368   : >> { %v3525_v10 = vmax.f32 %v3247_v20, 0.0  ;;  %v3527_v57 = vmax.f32 %v3320_v56, 0.0 }
 0x369   : >> { %v3556_v23 = vpack.c.bf16 %v3524_v36, %v3516_v13  ;;  %v3558_v35 = vpack.c.bf16 %v3526_v19, %v3518_v45 }
 0x36a   : >> { %v3557_v55 = vpack.c.bf16 %v3525_v10, %v3517_v24  ;;  %v3559_v58 = vpack.c.bf16 %v3527_v57, %v3519_v0 }
 0x36c   : >> { %3573 = vmatprep.subr.bf16.mxu0 %v3557_v55  ;;  %3614 = vmatprep.subr.bf16.mxu1 %v3559_v58 }
 0x36d   : >> { %3574 = vmatpush1.bf16.msra.mxu0 %v3556_v23  ;;  %3615 = vmatpush1.bf16.msra.mxu1 %v3558_v35 }
 0x370   : >> { %4345 = vmatmul.mubr.msk.bf16.vlgmr.msra.gmra.mrb[64].mxu0 %vm3163_vm5, %v6543_v59  ;;  %4346 = vmatmul.mubr.msk.bf16.vlgmr.msra.gmra.mrb[64].mxu1 %vm3163_vm5, %v6544_v22 }
 0x371   : >> { %3681 = vmatprep.mubr.bf16.mxu0 %v6479_v32  ;;  %3722 = vmatprep.mubr.bf16.mxu1 %v6479_v32 }
 0x39d   : >> { %v3356_v43 = vpop.f32.mrb[48].mxu0 }
 0x39e   : >> { %v3357_v54 = vadd.f32 %v3356_v43, %v6535_v28  ;;  %v3358_v18 = vpop.f32.mrb[49].mxu0 }
 0x39f   : >> { %v3359_v51 = vadd.f32 %v3358_v18, %v6535_v28  ;;  %v3360_v5 = vpop.f32.mrb[50].mxu0 }
 0x3a0   : >> { %v3361_v52 = vadd.f32 %v3360_v5, %v6536_v21  ;;  %v3362_v26 = vpop.f32.mrb[51].mxu0  ;;  %v3472_v11 = vmax.f32 %v3357_v54, 0.0 }
 0x3a1   : >> { %v3363_v44 = vadd.f32 %v3362_v26, %v6536_v21  ;;  %v3473_v14 = vmax.f32 %v3359_v51, 0.0 }
 0x3a2   : >> { %v3480_v7 = vmax.f32 %v3361_v52, 0.0 }
 0x3a3   : >> { %v3481_v42 = vmax.f32 %v3363_v44, 0.0 }
 0x3a4   : >> { %v3536_v63 = vpack.c.bf16 %v3480_v7, %v3472_v11 }
 0x3a5   : >> { %v3537_v15 = vpack.c.bf16 %v3481_v42, %v3473_v14  ;;  %v3366_v25 = vpop.f32.mrb[52].mxu0 }
 0x3a6   : >> { %v3367_v32 = vadd.f32 %v3366_v25, %v6537_v3  ;;  %v3368_v47 = vpop.f32.mrb[53].mxu0 }
 0x3a7   : >> { %v3369_v2 = vadd.f32 %v3368_v47, %v6537_v3  ;;  %v3370_v12 = vpop.f32.mrb[54].mxu0  ;;  %3649 = vmatprep.subr.bf16.mxu0 %v3537_v15 }
 0x3a8   : >> { %v3371_v53 = vadd.f32 %v3370_v12, %v6538_v40  ;;  %v3372_v4 = vpop.f32.mrb[55].mxu0  ;;  %3650 = vmatpush1.bf16.msra.mxu0 %v3536_v63  ;;  %v3488_v41 = vmax.f32 %v3367_v32, 0.0 }
 0x3a9   : >> { %v3373_v46 = vadd.f32 %v3372_v4, %v6538_v40  ;;  %v3489_v27 = vmax.f32 %v3369_v2, 0.0 }
 0x3aa   : >> { %v3496_v45 = vmax.f32 %v3371_v53, 0.0 }
 0x3ab   : >> { %v3497_v33 = vmax.f32 %v3373_v46, 0.0 }
 0x3ac   : >> { %v3544_v20 = vpack.c.bf16 %v3496_v45, %v3488_v41 }
 0x3ad   : >> { %v3545_v0 = vpack.c.bf16 %v3497_v33, %v3489_v27  ;;  %v3376_v56 = vpop.f32.mrb[56].mxu0 }
 0x3ae   : >> { %v3377_v13 = vadd.f32 %v3376_v56, %v6539_v50  ;;  %v3378_v36 = vpop.f32.mrb[57].mxu0 }
 0x3af   : >> { %v3379_v19 = vadd.f32 %v3378_v36, %v6539_v50  ;;  %v3380_v24 = vpop.f32.mrb[58].mxu0  ;;  %3651 = vmatprep.subr.bf16.mxu0 %v3545_v0 }
 0x3b0   : >> { %v3381_v10 = vadd.f32 %v3380_v24, %v6540_v39  ;;  %v3382_v57 = vpop.f32.mrb[59].mxu0  ;;  %3652 = vmatpush1.bf16.msra.mxu0 %v3544_v20  ;;  %v3504_v35 = vmax.f32 %v3377_v13, 0.0 }
 0x3b1   : >> { %v3383_v23 = vadd.f32 %v3382_v57, %v6540_v39  ;;  %v3505_v58 = vmax.f32 %v3379_v19, 0.0 }
 0x3b2   : >> { %v3512_v55 = vmax.f32 %v3381_v10, 0.0 }
 0x3b3   : >> { %v3513_v59 = vmax.f32 %v3383_v23, 0.0 }
 0x3b4   : >> { %v3552_v43 = vpack.c.bf16 %v3512_v55, %v3504_v35 }
 0x3b5   : >> { %v3553_v54 = vpack.c.bf16 %v3513_v59, %v3505_v58  ;;  %v3386_v18 = vpop.f32.mrb[60].mxu0 }
 0x3b6   : >> { %v3387_v51 = vadd.f32 %v3386_v18, %v6541_v60  ;;  %v3388_v5 = vpop.f32.mrb[61].mxu0 }
 0x3b7   : >> { %v3389_v52 = vadd.f32 %v3388_v5, %v6541_v60  ;;  %v3390_v26 = vpop.f32.mrb[62].mxu0  ;;  %3653 = vmatprep.subr.bf16.mxu0 %v3553_v54 }
 0x3b8   : >> { %v3391_v44 = vadd.f32 %v3390_v26, %v6542_v9  ;;  %v3392_v11 = vpop.f32.mrb[63].mxu0  ;;  %3654 = vmatpush1.bf16.msra.mxu0 %v3552_v43  ;;  %v3520_v14 = vmax.f32 %v3387_v51, 0.0 }
 0x3b9   : >> { %v3393_v7 = vadd.f32 %v3392_v11, %v6542_v9  ;;  %v3521_v63 = vmax.f32 %v3389_v52, 0.0 }
 0x3ba   : >> { %v3528_v42 = vmax.f32 %v3391_v44, 0.0 }
 0x3bb   : >> { %v3529_v15 = vmax.f32 %v3393_v7, 0.0 }
 0x3bc   : >> { %v3560_v25 = vpack.c.bf16 %v3528_v42, %v3520_v14 }
 0x3bd   : >> { %v3561_v32 = vpack.c.bf16 %v3529_v15, %v3521_v63 }
 0x3bf   : >> { %3655 = vmatprep.subr.bf16.mxu0 %v3561_v32 }
 0x3c0   : >> { %3656 = vmatpush1.bf16.msra.mxu0 %v3560_v25 }
 0x3c3   : >> { %4347 = vmatmul.mubr.msk.bf16.vlgmr.msra.gmra.mrb[68].mxu0 %vm3163_vm5, %v6544_v22 }
 0x3d9   : >> { %v3429_v47 = vpop.f32.mrb[48].mxu1 }
 0x3da   : >> { %v3430_v2 = vadd.f32 %v3429_v47, %v6535_v28  ;;  %v3431_v12 = vpop.f32.mrb[49].mxu1 }
 0x3db   : >> { %v3432_v53 = vadd.f32 %v3431_v12, %v6535_v28  ;;  %v3433_v4 = vpop.f32.mrb[50].mxu1 }
 0x3dc   : >> { %v3474_v46 = vmax.f32 %v3430_v2, 0.0  ;;  %v3434_v41 = vadd.f32 %v3433_v4, %v6536_v21  ;;  %v3435_v45 = vpop.f32.mrb[51].mxu1 }
 0x3dd   : >> { %v3475_v27 = vmax.f32 %v3432_v53, 0.0  ;;  %v3436_v33 = vadd.f32 %v3435_v45, %v6536_v21 }
 0x3de   : >> { %v3482_v20 = vmax.f32 %v3434_v41, 0.0 }
 0x3df   : >> { %v3483_v0 = vmax.f32 %v3436_v33, 0.0 }
 0x3e0   : >> { %v3538_v56 = vpack.c.bf16 %v3482_v20, %v3474_v46 }
 0x3e1   : >> { %v3539_v13 = vpack.c.bf16 %v3483_v0, %v3475_v27  ;;  %v3439_v36 = vpop.f32.mrb[52].mxu1 }
 0x3e2   : >> { %v3440_v19 = vadd.f32 %v3439_v36, %v6537_v3  ;;  %v3441_v24 = vpop.f32.mrb[53].mxu1 }
 0x3e3   : >> { %v3442_v10 = vadd.f32 %v3441_v24, %v6537_v3  ;;  %v3443_v57 = vpop.f32.mrb[54].mxu1  ;;  %3690 = vmatprep.subr.bf16.mxu1 %v3539_v13  ;;  %v3731_v24 = vmul.f32 %v4996_v61, %v4996_v61 }
 0x3e4   : >> { %v3490_v23 = vmax.f32 %v3440_v19, 0.0  ;;  %v3444_v35 = vadd.f32 %v3443_v57, %v6538_v40  ;;  %v3445_v55 = vpop.f32.mrb[55].mxu1  ;;  %3691 = vmatpush1.bf16.msra.mxu1 %v3538_v56  ;;  %v3733_v57 = vmul.f32 %v5101_v8, %v5101_v8 }
 0x3e5   : >> { %v3491_v58 = vmax.f32 %v3442_v10, 0.0  ;;  %v3446_v59 = vadd.f32 %v3445_v55, %v6538_v40  ;;  %v3732_v10 = vmul.f32 %v4994_v17, %v4994_v17 }
 0x3e6   : >> { %v3498_v43 = vmax.f32 %v3444_v35, 0.0  ;;  %v3747_v35 = vrot.slane %v3731_v24, 1 }
 0x3e7   : >> { %v3499_v54 = vmax.f32 %v3446_v59, 0.0  ;;  %v3748_v55 = vrot.slane %v3732_v10, 1 }
 0x3e8   : >> { %v3546_v18 = vpack.c.bf16 %v3498_v43, %v3490_v23  ;;  %v3734_v23 = vmul.f32 %v5005_v6, %v5005_v6  ;;  %v3763_v43 = vadd.f32 %v3747_v35, %v3731_v24 }
 0x3e9   : >> { %v3547_v51 = vpack.c.bf16 %v3499_v54, %v3491_v58  ;;  %v3449_v5 = vpop.f32.mrb[56].mxu1  ;;  %v3749_v58 = vrot.slane %v3733_v57, 1  ;;  %v3771_v54 = vrot.slane %v3731_v24, 2 }
 0x3ea   : >> { %v3450_v52 = vadd.f32 %v3449_v5, %v6539_v50  ;;  %v3451_v26 = vpop.f32.mrb[57].mxu1  ;;  %v3750_v59 = vrot.slane %v3734_v23, 1 }
 0x3eb   : >> { %v3452_v44 = vadd.f32 %v3451_v26, %v6539_v50  ;;  %v3453_v11 = vpop.f32.mrb[58].mxu1  ;;  %3692 = vmatprep.subr.bf16.mxu1 %v3547_v51  ;;  %v3772_v51 = vrot.slane %v3732_v10, 2  ;;  %v3765_v5 = vadd.f32 %v3749_v58, %v3733_v57  ;;  %v3774_v26 = vrot.slane %v3734_v23, 2 }
 0x3ec   : >> { %v3506_v7 = vmax.f32 %v3450_v52, 0.0  ;;  %v3454_v14 = vadd.f32 %v3453_v11, %v6540_v39  ;;  %v3455_v42 = vpop.f32.mrb[59].mxu1  ;;  %3693 = vmatpush1.bf16.msra.mxu1 %v3546_v18  ;;  %v3764_v18 = vadd.f32 %v3748_v55, %v3732_v10  ;;  %v3773_v52 = vrot.slane %v3733_v57, 2 }
 0x3ed   : >> { %v3507_v63 = vmax.f32 %v3452_v44, 0.0  ;;  %v3456_v15 = vadd.f32 %v3455_v42, %v6540_v39  ;;  %v3766_v61 = vadd.f32 %v3750_v59, %v3734_v23  ;;  %v3787_v44 = vadd.f32 %v3771_v54, %v3763_v43 }
 0x3ee   : >> { %v3514_v25 = vmax.f32 %v3454_v14, 0.0  ;;  %v3788_v17 = vadd.f32 %v3772_v51, %v3764_v18  ;;  %v3789_v11 = vadd.f32 %v3773_v52, %v3765_v5 }
 0x3ef   : >> { %v3515_v32 = vmax.f32 %v3456_v15, 0.0  ;;  %v3795_v8 = vmul.f32 -2.0, %v3787_v44 }
 0x3f0   : >> { %v3554_v47 = vpack.c.bf16 %v3514_v25, %v3506_v7  ;;  %v3790_v7 = vadd.f32 %v3774_v26, %v3766_v61  ;;  %v3796_v14 = vmul.f32 -2.0, %v3788_v17  ;;  %v3797_v42 = vmul.f32 -2.0, %v3789_v11 }
 0x3f1   : >> { %v3555_v2 = vpack.c.bf16 %v3515_v32, %v3507_v63  ;;  %v3459_v12 = vpop.f32.mrb[60].mxu1  ;;  %v3803_v63 = vmul.f32 1.442695, %v3795_v8 }
 0x3f2   : >> { %v3460_v53 = vadd.f32 %v3459_v12, %v6541_v60  ;;  %v3461_v4 = vpop.f32.mrb[61].mxu1  ;;  %v3798_v6 = vmul.f32 -2.0, %v3790_v7  ;;  %v3805_v15 = vmul.f32 1.442695, %v3796_v14  ;;  %v3807_v25 = vmul.f32 1.442695, %v3797_v42 }
 0x3f3   : >> { %v3462_v46 = vadd.f32 %v3461_v4, %v6541_v60  ;;  %v3463_v41 = vpop.f32.mrb[62].mxu1  ;;  %3694 = vmatprep.subr.bf16.mxu1 %v3555_v2  ;;  %4517 = vpow2.f32 %v3803_v63 }
 0x3f4   : >> { %v3522_v45 = vmax.f32 %v3460_v53, 0.0  ;;  %v3464_v27 = vadd.f32 %v3463_v41, %v6542_v9  ;;  %v3465_v33 = vpop.f32.mrb[63].mxu1  ;;  %3695 = vmatpush1.bf16.msra.mxu1 %v3554_v47  ;;  %v3809_v32 = vmul.f32 1.442695, %v3798_v6  ;;  %4519 = vpow2.f32 %v3805_v15 }
 0x3f5   : >> { %v3523_v20 = vmax.f32 %v3462_v46, 0.0  ;;  %v3466_v0 = vadd.f32 %v3465_v33, %v6542_v9  ;;  %4521 = vpow2.f32 %v3807_v25 }
 0x3f6   : >> { %v3530_v56 = vmax.f32 %v3464_v27, 0.0  ;;  %4523 = vpow2.f32 %v3809_v32 }
 0x3f7   : >> { %v3531_v13 = vmax.f32 %v3466_v0, 0.0 }
 0x3f8   : >> { %v3562_v36 = vpack.c.bf16 %v3530_v56, %v3522_v45 }
 0x3f9   : >> { %v3563_v19 = vpack.c.bf16 %v3531_v13, %v3523_v20  ;;  %v6545_v20 = vld [vmem:[#allocation32_spill] sm:$0xff] }
 0x3fb   : >> { %3696 = vmatprep.subr.bf16.mxu1 %v3563_v19 }
 0x3fc   : >> { %3697 = vmatpush1.bf16.msra.mxu1 %v3562_v36 }
 0x3fd   : >> { %v4518_v47 = vpop.eup %4517 }
 0x3fe   : >> { %v4520_v2 = vpop.eup %4519  ;;  %v3819_v4 = vmul.f32 0.5, %v4518_v47 }
 0x3ff   : >> { %4348 = vmatmul.mubr.msk.bf16.vlgmr.msra.gmra.mrb[68].mxu1 %vm3163_vm5, %v6544_v22  ;;  %v4522_v12 = vpop.eup %4521  ;;  %v3820_v45 = vmul.f32 0.5, %v4520_v2 }
 0x400   : >> { %v4524_v53 = vpop.eup %4523  ;;  %v3821_v46 = vmul.f32 0.5, %v4522_v12 }
 0x401   : >> { %v3822_v33 = vmul.f32 0.5, %v4524_v53 }
 0x443   : >> { %v3601_v41 = vpop.f32.mrb[64].mxu0  ;;  %v3642_v27 = vpop.f32.mrb[64].mxu1 }
 0x444   : >> { %v3602_v0 = vadd.f32 %v3601_v41, %v6545_v20  ;;  %v3603_v56 = vpop.f32.mrb[65].mxu0  ;;  %v3643_v13 = vadd.f32 %v3642_v27, %v6545_v20  ;;  %v3644_v36 = vpop.f32.mrb[65].mxu1 }
 0x445   : >> { %v3604_v19 = vadd.f32 %v3603_v56, %v6545_v20  ;;  %v3645_v24 = vadd.f32 %v3644_v36, %v6545_v20  ;;  %v3605_v10 = vpop.f32.mrb[66].mxu0  ;;  %v3646_v57 = vpop.f32.mrb[66].mxu1 }
 0x446   : >> { %v3827_v23 = vadd.f32 %v3819_v4, %v3602_v0  ;;  %v3829_v35 = vadd.f32 %v3821_v46, %v3643_v13  ;;  %v3606_v55 = vpop.f32.mrb[67].mxu0  ;;  %v3647_v58 = vpop.f32.mrb[67].mxu1  ;;  %v4349_v17 = vmul.f32 -1.442695, %v3602_v0  ;;  %v4351_v7 = vmul.f32 -1.442695, %v3643_v13 }
 0x447   : >> { %v3828_v59 = vadd.f32 %v3820_v45, %v3604_v19  ;;  %v3830_v43 = vadd.f32 %v3822_v33, %v3645_v24  ;;  %v4350_v11 = vmul.f32 -1.442695, %v3604_v19  ;;  %v4352_v8 = vmul.f32 -1.442695, %v3645_v24 }
 0x448   : >> { %v3835_v54 = vmin.f32 %v3827_v23, 15.0  ;;  %v3837_v18 = vmin.f32 %v3829_v35, 15.0 }
 0x449   : >> { %v3836_v51 = vmin.f32 %v3828_v59, 15.0  ;;  %v3838_v5 = vmin.f32 %v3830_v43, 15.0  ;;  %v6546_v43 = vld [vmem:[#allocation40_spill] sm:$0xff] }
 0x44a   : >> { %v3843_v52 = vmul.f32 1.442695, %v3835_v54  ;;  %v3847_v61 = vmul.f32 1.442695, %v3837_v18 }
 0x44b   : >> { %v3845_v26 = vmul.f32 1.442695, %v3836_v51  ;;  %v3849_v44 = vmul.f32 1.442695, %v3838_v5  ;;  %v6547_v5 = vld [vmem:[#allocation39_spill] sm:$0xff] }
 0x44c   : >> { %4525 = vpow2.f32 %v3843_v52 }
 0x44d   : >> { %4527 = vpow2.f32 %v3845_v26  ;;  %v3735_v26 = vmul.f32 %v5488_v34, %v5488_v34  ;;  %v6551_v34 = vld [vmem:[#allocation37_spill] sm:$0xff] }
 0x44e   : >> { %4529 = vpow2.f32 %v3847_v61 }
 0x44f   : >> { %4531 = vpow2.f32 %v3849_v44 }
 0x450   : >> { %4533 = vpow2.f32 %v4349_v17  ;;  %v6548_v17 = vld [vmem:[#allocation42_spill] sm:$0xff] }
 0x451   : >> { %4535 = vpow2.f32 %v4350_v11 }
 0x452   : >> { %4537 = vpow2.f32 %v4351_v7 }
 0x453   : >> { %4539 = vpow2.f32 %v4352_v8 }
 0x456   : >> { %v4526_v14 = vpop.eup %4525 }
 0x457   : >> { %v4528_v42 = vpop.eup %4527  ;;  %v3907_v6 = vsub.f32 0.0, %v4526_v14 }
 0x458   : >> { %v4530_v63 = vpop.eup %4529  ;;  %v3908_v15 = vsub.f32 0.0, %v4528_v42  ;;  %v6549_v42 = vld [vmem:[#allocation41_spill] sm:$0xff] }
 0x459   : >> { %v4532_v25 = vpop.eup %4531  ;;  %v3909_v32 = vmul.f32 %v3907_v6, %v4839_v30  ;;  %v3943_v47 = vsub.f32 0.0, %v4530_v63 }
 0x45a   : >> { %v4534_v2 = vpop.eup %4533  ;;  %v3910_v12 = vmul.f32 %v3908_v15, %v4841_v31  ;;  %v3944_v53 = vsub.f32 0.0, %v4532_v25 }
 0x45b   : >> { %v3911_v4 = vmul.f32 1.442695, %v3909_v32  ;;  %v3945_v46 = vmul.f32 %v3943_v47, %v4839_v30  ;;  %v4536_v27 = vpop.eup %4535  ;;  %v3883_v33 = vadd.f32 1.0, %v4534_v2  ;;  %v6550_v32 = vld [vmem:[#allocation38_spill] sm:$0xff] }
 0x45c   : >> { %v3913_v41 = vmul.f32 1.442695, %v3910_v12  ;;  %v3946_v45 = vmul.f32 %v3944_v53, %v4841_v31  ;;  %v4538_v13 = vpop.eup %4537  ;;  %v3884_v36 = vadd.f32 1.0, %v4536_v27  ;;  %v6552_v27 = vld [vmem:[#allocation36_spill] sm:$0xff] }
 0x45d   : >> { %4541 = vpow2.f32 %v3911_v4  ;;  %v3947_v0 = vmul.f32 1.442695, %v3945_v46  ;;  %v4540_v19 = vpop.eup %4539  ;;  %v3885_v24 = vadd.f32 1.0, %v4538_v13 }
 0x45e   : >> { %4543 = vpow2.f32 %v3913_v41  ;;  %v3949_v56 = vmul.f32 1.442695, %v3946_v45  ;;  %v3886_v10 = vadd.f32 1.0, %v4540_v19  ;;  %v3736_v45 = vmul.f32 %v5379_v62, %v5379_v62 }
 0x45f   : >> { %4545 = vpow2.f32 %v3947_v0  ;;  %v6553_v0 = vld [vmem:[#allocation35_spill] sm:$0xff] }
 0x460   : >> { %4547 = vpow2.f32 %v3949_v56 }
 0x461   : >> { %4549 = vrcp.f32 %v3883_v33 }
 0x462   : >> { %4551 = vrcp.f32 %v3884_v36 }
 0x463   : >> { %4553 = vrcp.f32 %v3885_v24  ;;  %v6554_v24 = vld [vmem:[#allocation34_spill] sm:$0xff] }
 0x464   : >> { %4555 = vrcp.f32 %v3886_v10 }
 0x467   : >> { %v4542_v57 = vpop.eup %4541 }
 0x468   : >> { %v4544_v23 = vpop.eup %4543  ;;  %v3915_v35 = vsub.f32 1.0, %v4542_v57 }
 0x469   : >> { %v4546_v55 = vpop.eup %4545  ;;  %v3916_v58 = vsub.f32 1.0, %v4544_v23 }
 0x46a   : >> { %v4548_v59 = vpop.eup %4547  ;;  %v3917_v54 = vmul.f32 %v6546_v43, %v3915_v35  ;;  %v3919_v18 = vsub.f32 1.0, %v3915_v35  ;;  %v3951_v8 = vsub.f32 1.0, %v4546_v55 }
 0x46b   : >> { %v4550_v51 = vpop.eup %4549  ;;  %v3918_v52 = vmul.f32 %v6547_v5, %v3916_v58  ;;  %v3920_v61 = vsub.f32 1.0, %v3916_v58  ;;  %v3952_v15 = vsub.f32 1.0, %v4548_v59  ;;  %v6555_v59 = vld [vmem:[#allocation44_spill] sm:$0xff] }
 0x46c   : >> { %v3921_v44 = vadd.f32 1e-10, %v3919_v18  ;;  %v3927_v11 = vmul.f32 %v3917_v54, %v6548_v17  ;;  %v3934_v7 = vrot.slane %v3917_v54, %v4784_v16  ;;  %v4552_v25 = vpop.eup %4551  ;;  %v3925_v47 = vadd.f32 %v6550_v32, %v3917_v54 }
 0x46d   : >> { %v3922_v14 = vadd.f32 1e-10, %v3920_v61  ;;  %v3928_v6 = vmul.f32 %v3918_v52, %v6549_v42  ;;  %v3938_v63 = vrot.slane %v3918_v52, %v4784_v16  ;;  %v3955_v53 = vsub.f32 1.0, %v3951_v8  ;;  %v4554_v19 = vpop.eup %4553 }
 0x46e   : >> { %v3939_v2 = vmul.f32 %v4550_v51, %v3934_v7  ;;  %v3923_v12 = vmul.f32 %v6546_v43, %v3921_v44  ;;  %v3926_v4 = vadd.f32 %v6551_v34, %v3918_v52  ;;  %v3956_v41 = vsub.f32 1.0, %v3952_v15  ;;  %v4556_v55 = vpop.eup %4555  ;;  %v6556_v51 = vld [vmem:[#allocation43_spill] sm:$0xff]  ;;  %v6557_v7 = vld [vmem:[#allocation33_spill] sm:$0xff] }
 0x46f   : >> { %v3924_v46 = vmul.f32 %v6547_v5, %v3922_v14  ;;  %v3929_v33 = vadd.f32 %v6552_v27, %v3927_v11  ;;  %v3930_v56 = vadd.f32 %v6553_v0, %v3928_v6  ;;  %v3957_v36 = vadd.f32 1e-10, %v3955_v53 }
 0x470   : >> { %v3953_v13 = vmul.f32 %v3951_v8, %v3923_v12  ;;  %v3941_v10 = vadd.f32 %v6554_v24, %v3939_v2  ;;  %v3940_v57 = vmul.f32 %v4552_v25, %v3938_v63  ;;  %v3958_v35 = vadd.f32 1e-10, %v3956_v41 }
 0x471   : >> { %v3954_v23 = vmul.f32 %v3952_v15, %v3924_v46  ;;  %v6229_v62 = vmul.f32 %v3957_v36, %v3923_v12  ;;  %v3751_v11 = vrot.slane %v3735_v26, 1  ;;  %v3752_v6 = vrot.slane %v3736_v45, 1 }
 0x472   : >> { %v6225_v58 = vadd.f32 %v3953_v13, %v3925_v47  ;;  %v3963_v43 = vmul.f32 %v3953_v13, %v6555_v59  ;;  %v3970_v54 = vrot.slane %v3953_v13, %v4784_v16  ;;  %v6235_v61 = vmul.f32 %v3958_v35, %v3924_v46 }
 0x473   : >> { %v6231_v18 = vadd.f32 %v3954_v23, %v3926_v4  ;;  %v3964_v5 = vmul.f32 %v3954_v23, %v6556_v51  ;;  %v3974_v52 = vrot.slane %v3954_v23, %v4784_v16  ;;  %v3942_v8 = vadd.f32 %v6557_v7, %v3940_v57 }
 0x474   : >> { %v6237_v44 = vadd.f32 %v3963_v43, %v3929_v33  ;;  %v3975_v17 = vmul.f32 %v4554_v19, %v3970_v54  ;;  %v3767_v25 = vadd.f32 %v3751_v11, %v3735_v26  ;;  %v3775_v32 = vrot.slane %v3735_v26, 2 }
 0x475   : >> { %v6240_v14 = vadd.f32 %v3964_v5, %v3930_v56  ;;  %v3976_v42 = vmul.f32 %v4556_v55, %v3974_v52  ;;  %v3768_v47 = vadd.f32 %v3752_v6, %v3736_v45  ;;  %v3776_v2 = vrot.slane %v3736_v45, 2 }
 0x476   : >> { %v6242_v63 = vadd.f32 %v3975_v17, %v3941_v10  ;;  %v3791_v12 = vadd.f32 %v3775_v32, %v3767_v25  ;;  %v3737_v5 = vmul.f32 %v5693_v48, %v5693_v48  ;;  %v3738_v11 = vmul.f32 %v5647_v49, %v5647_v49 }
 0x477   : >> { %v6244_v15 = vadd.f32 %v3976_v42, %v3942_v8  ;;  %v3792_v53 = vadd.f32 %v3776_v2, %v3768_v47 }
 0x478   : >> { %v3799_v34 = vmul.f32 -2.0, %v3791_v12  ;;  %v3753_v6 = vrot.slane %v3737_v5, 1  ;;  %v3754_v32 = vrot.slane %v3738_v11, 1 }
 0x479   : >> { %v3800_v4 = vmul.f32 -2.0, %v3792_v53 }
 0x47a   : >> { %v3811_v46 = vmul.f32 1.442695, %v3799_v34  ;;  %v3769_v53 = vadd.f32 %v3753_v6, %v3737_v5  ;;  %v3777_v34 = vrot.slane %v3737_v5, 2 }
 0x47b   : >> { %v3813_v41 = vmul.f32 1.442695, %v3800_v4  ;;  %v3770_v4 = vadd.f32 %v3754_v32, %v3738_v11 }
 0x47c   : >> { %4557 = vpow2.f32 %v3811_v46  ;;  %v3778_v46 = vrot.slane %v3738_v11, 2  ;;  %v3793_v49 = vadd.f32 %v3777_v34, %v3769_v53 }
 0x47d   : >> { %4559 = vpow2.f32 %v3813_v41 }
 0x486   : >> { %v4558_v27 = vpop.eup %4557 }
 0x487   : >> { %v4560_v33 = vpop.eup %4559  ;;  %v3823_v0 = vmul.f32 0.5, %v4558_v27  ;;  %v3794_v27 = vadd.f32 %v3778_v46, %v3770_v4 }
 0x488   : >> { %v3824_v13 = vmul.f32 0.5, %v4560_v33 }
 0x496   : >> { %v3683_v56 = vpop.f32.mrb[68].mxu0 }
 0x497   : >> { %v3684_v36 = vadd.f32 %v3683_v56, %v6545_v20  ;;  %v3685_v19 = vpop.f32.mrb[69].mxu0  ;;  %v3802_v56 = vmul.f32 -2.0, %v3794_v27 }
 0x498   : >> { %v3686_v26 = vadd.f32 %v3685_v19, %v6545_v20  ;;  %v3687_v24 = vpop.f32.mrb[70].mxu0 }
 0x499   : >> { %v3831_v45 = vadd.f32 %v3823_v0, %v3684_v36  ;;  %v3688_v10 = vpop.f32.mrb[71].mxu0  ;;  %v4353_v43 = vmul.f32 -1.442695, %v3684_v36  ;;  %v3801_v0 = vmul.f32 -2.0, %v3793_v49 }
 0x49a   : >> { %v3832_v57 = vadd.f32 %v3824_v13, %v3686_v26  ;;  %v4354_v54 = vmul.f32 -1.442695, %v3686_v26 }
 0x49b   : >> { %v3839_v23 = vmin.f32 %v3831_v45, 15.0 }
 0x49c   : >> { %v3840_v35 = vmin.f32 %v3832_v57, 15.0  ;;  %v3815_v57 = vmul.f32 1.442695, %v3801_v0 }
 0x49d   : >> { %v3851_v55 = vmul.f32 1.442695, %v3839_v23  ;;  %v3817_v23 = vmul.f32 1.442695, %v3802_v56 }
 0x49e   : >> { %v3853_v59 = vmul.f32 1.442695, %v3840_v35 }
 0x49f   : >> { %4561 = vpow2.f32 %v3851_v55 }
 0x4a0   : >> { %4563 = vpow2.f32 %v3853_v59 }
 0x4a1   : >> { %4565 = vpow2.f32 %v4353_v43 }
 0x4a2   : >> { %4567 = vpow2.f32 %v4354_v54 }
 0x4a9   : >> { %v4562_v51 = vpop.eup %4561 }
 0x4aa   : >> { %v4564_v52 = vpop.eup %4563  ;;  %v3979_v17 = vsub.f32 0.0, %v4562_v51 }
 0x4ab   : >> { %v3980_v7 = vsub.f32 0.0, %v4564_v52  ;;  %v4566_v47 = vpop.eup %4565  ;;  %v6558_v52 = vld [vmem:[#allocation45_spill] sm:$0xff] }
 0x4ac   : >> { %v3981_v8 = vmul.f32 %v3979_v17, %v4839_v30  ;;  %v4568_v12 = vpop.eup %4567  ;;  %v3887_v48 = vadd.f32 1.0, %v4566_v47 }
 0x4ad   : >> { %v3982_v42 = vmul.f32 %v3980_v7, %v4841_v31  ;;  %v3888_v41 = vadd.f32 1.0, %v4568_v12 }
 0x4ae   : >> { %v3983_v25 = vmul.f32 1.442695, %v3981_v8 }
 0x4af   : >> { %v3985_v2 = vmul.f32 1.442695, %v3982_v42 }
 0x4b0   : >> { %4569 = vpow2.f32 %v3983_v25 }
 0x4b1   : >> { %4571 = vpow2.f32 %v3985_v2 }
 0x4b2   : >> { %4573 = vrcp.f32 %v3887_v48 }
 0x4b3   : >> { %4575 = vrcp.f32 %v3888_v41 }
 0x4b4   : >> { %4577 = vpow2.f32 %v3815_v57 }
 0x4b5   : >> { %4579 = vpow2.f32 %v3817_v23 }
 0x4ba   : >> { %v4570_v33 = vpop.eup %4569 }
 0x4bb   : >> { %v4572_v13 = vpop.eup %4571  ;;  %v3987_v36 = vsub.f32 1.0, %v4570_v33 }
 0x4bc   : >> { %v3988_v19 = vsub.f32 1.0, %v4572_v13  ;;  %v4574_v54 = vpop.eup %4573 }
 0x4bd   : >> { %v3989_v26 = vmul.f32 %v3987_v36, %v6229_v62  ;;  %v3991_v24 = vsub.f32 1.0, %v3987_v36  ;;  %v4576_v7 = vpop.eup %4575 }
 0x4be   : >> { %v3990_v45 = vmul.f32 %v3988_v19, %v6235_v61  ;;  %v3992_v10 = vsub.f32 1.0, %v3988_v19 }
 0x4bf   : >> { %v3993_v35 = vadd.f32 1e-10, %v3991_v24  ;;  %v6257_v55 = vadd.f32 %v3989_v26, %v6225_v58  ;;  %v3999_v59 = vmul.f32 %v3989_v26, %v5110_v1  ;;  %v4006_v43 = vrot.slane %v3989_v26, %v4784_v16 }
 0x4c0   : >> { %v3994_v51 = vadd.f32 1e-10, %v3992_v10  ;;  %v6262_v5 = vadd.f32 %v3990_v45, %v6231_v18  ;;  %v4000_v17 = vmul.f32 %v3990_v45, %v6558_v52  ;;  %v4010_v11 = vrot.slane %v3990_v45, %v4784_v16 }
 0x4c1   : >> { %v6267_v8 = vadd.f32 %v3999_v59, %v6237_v44  ;;  %v4011_v42 = vmul.f32 %v4574_v54, %v4006_v43  ;;  %v6270_v58 = vmul.f32 %v3993_v35, %v6229_v62  ;;  %v4578_v44 = vpop.eup %4577 }
 0x4c2   : >> { %v6273_v1 = vadd.f32 %v4000_v17, %v6240_v14  ;;  %v4012_v6 = vmul.f32 %v4576_v7, %v4010_v11  ;;  %v6276_v25 = vmul.f32 %v3994_v51, %v6235_v61  ;;  %v4580_v47 = vpop.eup %4579  ;;  %v3825_v2 = vmul.f32 0.5, %v4578_v44 }
 0x4c3   : >> { %v6279_v18 = vadd.f32 %v4011_v42, %v6242_v63  ;;  %v3826_v12 = vmul.f32 0.5, %v4580_v47 }
 0x4c4   : >> { %v6282_v32 = vadd.f32 %v4012_v6, %v6244_v15 }
 0x4d2   : >> { %v3724_v62 = vpop.f32.mrb[68].mxu1 }
 0x4d3   : >> { %v3725_v14 = vadd.f32 %v3724_v62, %v6545_v20  ;;  %v3726_v53 = vpop.f32.mrb[69].mxu1 }
 0x4d4   : >> { %v3727_v48 = vadd.f32 %v3726_v53, %v6545_v20  ;;  %v3728_v61 = vpop.f32.mrb[70].mxu1 }
 0x4d5   : >> { %v3833_v34 = vadd.f32 %v3825_v2, %v3725_v14  ;;  %v3729_v4 = vpop.f32.mrb[71].mxu1  ;;  %v4355_v27 = vmul.f32 -1.442695, %v3725_v14 }
 0x4d6   : >> { %v3834_v63 = vadd.f32 %v3826_v12, %v3727_v48  ;;  %v4356_v33 = vmul.f32 -1.442695, %v3727_v48 }
 0x4d7   : >> { %v3841_v46 = vmin.f32 %v3833_v34, 15.0 }
 0x4d8   : >> { %v3842_v41 = vmin.f32 %v3834_v63, 15.0 }
 0x4d9   : >> { %v3855_v49 = vmul.f32 1.442695, %v3841_v46 }
 0x4da   : >> { %v3857_v15 = vmul.f32 1.442695, %v3842_v41 }
 0x4db   : >> { %4581 = vpow2.f32 %v3855_v49 }
 0x4dc   : >> { %4583 = vpow2.f32 %v3857_v15 }
 0x4dd   : >> { %4585 = vpow2.f32 %v4355_v27 }
 0x4de   : >> { %4587 = vpow2.f32 %v4356_v33 }
 0x4e5   : >> { %v4582_v0 = vpop.eup %4581 }
 0x4e6   : >> { %v4584_v56 = vpop.eup %4583  ;;  %v4015_v13 = vsub.f32 0.0, %v4582_v0 }
 0x4e7   : >> { %v4016_v36 = vsub.f32 0.0, %v4584_v56  ;;  %v4586_v45 = vpop.eup %4585 }
 0x4e8   : >> { %v4017_v19 = vmul.f32 %v4015_v13, %v4839_v30  ;;  %v4588_v57 = vpop.eup %4587  ;;  %v3889_v23 = vadd.f32 1.0, %v4586_v45 }
 0x4e9   : >> { %v4018_v26 = vmul.f32 %v4016_v36, %v4841_v31  ;;  %v3890_v35 = vadd.f32 1.0, %v4588_v57 }
 0x4ea   : >> { %v4019_v24 = vmul.f32 1.442695, %v4017_v19 }
 0x4eb   : >> { %v4021_v10 = vmul.f32 1.442695, %v4018_v26 }
 0x4ec   : >> { %4589 = vpow2.f32 %v4019_v24 }
 0x4ed   : >> { %4591 = vpow2.f32 %v4021_v10 }
 0x4ee   : >> { %4593 = vrcp.f32 %v3889_v23 }
 0x4ef   : >> { %4595 = vrcp.f32 %v3890_v35 }
 0x4f6   : >> { %v4590_v59 = vpop.eup %4589 }
 0x4f7   : >> { %v4592_v43 = vpop.eup %4591  ;;  %v4023_v54 = vsub.f32 1.0, %v4590_v59 }
 0x4f8   : >> { %v4024_v51 = vsub.f32 1.0, %v4592_v43  ;;  %v4594_v2 = vpop.eup %4593 }
 0x4f9   : >> { %v4025_v52 = vmul.f32 %v4023_v54, %v6270_v58  ;;  %v4027_v17 = vsub.f32 1.0, %v4023_v54  ;;  %v4596_v48 = vpop.eup %4595 }
 0x4fa   : >> { %v4026_v11 = vmul.f32 %v4024_v51, %v6276_v25  ;;  %v4028_v7 = vsub.f32 1.0, %v4024_v51 }
 0x4fb   : >> { %v4029_v42 = vadd.f32 1e-10, %v4027_v17  ;;  %v4033_v6 = vadd.f32 %v4025_v52, %v6257_v55   ;;  %v4035_v44 = vmul.f32 %v4025_v52, %v5565_v38  ;;  %v4042_v47 = vrot.slane %v4025_v52, %v4784_v16 }
 0x4fc   : >> { %v4030_v62 = vadd.f32 1e-10, %v4028_v7  ;;  %v4034_v12 = vadd.f32 %v4026_v11, %v6262_v5   ;;  %v4036_v14 = vmul.f32 %v4026_v11, %v5546_v37  ;;  %v4046_v53 = vrot.slane %v4026_v11, %v4784_v16  ;;  %506 = sbr.rel (!%p504_p4) target bundleno = 160 (0xa0), region = 102 }
 0x4fd   : >> { %v4031_v59 = vmul.f32 %v4029_v42, %v6270_v58   ;;  %v4037_v61 = vadd.f32 %v4035_v44, %v6267_v8   ;;  %v4047_v34 = vmul.f32 %v4594_v2, %v4042_v47  ;;  %v6564_v57 = vmov %v4033_v6 }
 0x4fe   : >> { %v4032_v58 = vmul.f32 %v4030_v62, %v6276_v25   ;;  %v4038_v38 = vadd.f32 %v4036_v14, %v6273_v1   ;;  %v4048_v55 = vmul.f32 %v4596_v48, %v4046_v53  ;;  %v6563_v56 = vmov %v4034_v12 }
 0x4ff   : >> { %v4049_v4 = vadd.f32 %v4047_v34, %v6279_v18   ;;  %v4059_v5 = vrot.slane (%p504_p4), %v4037_v61, 5  ;;  %v4065_v8 = vrot.slane (%p504_p4), %v4033_v6, 4  ;;  %v4066_v18 = vrot.slane (%p504_p4), %v4034_v12, 4 }
 0x500   : >> { %v4050_v63 = vadd.f32 %v4048_v55, %v6282_v32   ;;  %v6561_v54 = vmov %v4038_v38  ;;  %v6562_v55 = vmov %v4037_v61  ;;  %v4060_v25 = vrot.slane (%p504_p4), %v4038_v38, 5 }
 0x501   : >> { %v6560_v53 = vmov %v4049_v4  ;;  %v4053_v37 = vrot.slane (%p504_p4), %v4049_v4, 1 }
 0x502   : >> { %v6559_v52 = vmov %v4050_v63  ;;  %v4054_v1 = vrot.slane (%p504_p4), %v4050_v63, 1 }
 0x503   : > { %v4070_v32 = vsel %vm6565_vm7, %v4053_v37, %v4059_v5 }
 0x504   : > { %v4073_v46 = vsel %vm2612_vm3, %v4070_v32, %v4065_v8  ;;  %v4071_v41 = vsel %vm6566_vm2, %v4054_v1, %v4060_v25 }
 0x505   : > { %v4076_v49 = vsel %vm2639_vm8, %v4073_v46, 0.0  ;;  %v4074_v15 = vsel %vm2612_vm3, %v4071_v41, %v4066_v18 }
 0x506   : > { %4078 = vst [vmem:[%s4793_s27] sm:$0xff] %v4076_v49  ;;  %v4077_v16 = vsel %vm2639_vm8, %v4074_v15, 0.0 }
 0x507   : > { %4079 = vst [vmem:[%s4793_s27 + $0x8] sm:$0xff] %v4077_v16 }
 0x508 PF: > { %s19_s30 = sadd.s32 1, %s4639_s30  }
 0x509   : > { %p16_p5 = scmp.ge.s32.totalorder %s19_s30, 4  }
 0x50b   :  { %18 = sbr.rel (!%p16_p5) target bundleno = 1 (0x1), region = 113 }

</bundles_post_ra>
